<compile_context>
chip_gen: v7x
topology: tpu7x:2x2x1
jax: 0.10.0
libtpu: 0.0.40
codegen_flags: <defaults>
</compile_context>

<pallas_src>
import jax
import jax.numpy as jnp
from jax.experimental import pallas as pl
from jax.experimental.pallas import tpu as pltpu

IN_DIM = 34557            # fixed by the PyTorch module
IN_DIM_PAD = 34560        # 270 * 128 (zero-padded K axis)
MID_DIMS = 256
LATENT_DIMS = 32
BATCH = 2
BATCH_PAD = 8

TN = 128                  # N tile of the hidden dim -> 2 parallel blocks (v7x TCs)
TK = 17280                # K tile (34560 / 17280 = 2 reduction steps)
N_BLOCKS = MID_DIMS // TN
K_BLOCKS = IN_DIM_PAD // TK


def _encoder_fused_kernel(x_ref, w1_ref, b1_ref, w2_ref, zp_ref, acc_ref):
    """Tiled x @ W1 accumulation (bf16 weights, f32 accumulate); epilogue applies
    bias+ReLU and this hidden-block's partial contribution to the second Linear."""
    k = pl.program_id(1)

    @pl.when(k == 0)
    def _():
        acc_ref[...] = jnp.zeros_like(acc_ref)

    # bf16 x bf16 -> f32 accumulate on the MXU.
    acc_ref[...] += jnp.dot(
        x_ref[...].astype(jnp.bfloat16), w1_ref[...],
        preferred_element_type=jnp.float32,
    )

    @pl.when(k == pl.num_programs(1) - 1)
    def _():
        h1 = jnp.maximum(acc_ref[...] + b1_ref[...], 0.0)            # (B_pad, TN)
        zp_ref[0] = jnp.dot(h1, w2_ref[...],                         # (B_pad, latent)
                            preferred_element_type=jnp.float32)


def fused_encoder_matmul(x_p, w1_blocked, b1, w2):
    """x_p:(B_pad, K_pad) f32, w1_blocked:(NJ, K_pad, TN) bf16, b1:(1, MID) f32,
    w2:(MID, L) f32 -> z_partial:(NJ, B_pad, L) f32; caller sums over NJ, adds b2."""
    latent = w2.shape[1]
    w1_bytes = N_BLOCKS * IN_DIM_PAD * TN * 2                        # bf16 weight stream
    x_bytes = N_BLOCKS * BATCH_PAD * IN_DIM_PAD * 4                  # x re-read per N block
    cost = pl.CostEstimate(
        flops=2 * BATCH_PAD * IN_DIM_PAD * MID_DIMS
        + 2 * BATCH_PAD * MID_DIMS * latent,
        transcendentals=0,
        bytes_accessed=w1_bytes + x_bytes + N_BLOCKS * BATCH_PAD * latent * 4,
    )
    return pl.pallas_call(
        _encoder_fused_kernel,
        out_shape=jax.ShapeDtypeStruct((N_BLOCKS, BATCH_PAD, latent), jnp.float32),
        grid_spec=pltpu.PrefetchScalarGridSpec(
            num_scalar_prefetch=0,
            grid=(N_BLOCKS, K_BLOCKS),
            in_specs=[
                pl.BlockSpec((BATCH_PAD, TK), lambda j, k: (0, k)),            # x tile
                pl.BlockSpec((pl.Squeezed(), TK, TN), lambda j, k: (j, k, 0)),  # W1 tile (contiguous)
                pl.BlockSpec((1, TN), lambda j, k: (0, j)),                    # b1 slice
                pl.BlockSpec((TN, latent), lambda j, k: (j, 0)),               # W2 slice
            ],
            out_specs=pl.BlockSpec((1, BATCH_PAD, latent), lambda j, k: (j, 0, 0)),
            scratch_shapes=[pltpu.VMEM((BATCH_PAD, TN), jnp.float32)],
        ),
        compiler_params=pltpu.CompilerParams(
            dimension_semantics=("parallel", "arbitrary")
        ),
        cost_estimate=cost,
    )(x_p, w1_blocked, b1, w2)


def init_params(key, latent_dims=LATENT_DIMS, middims=MID_DIMS):
    """Raw params matching nn.Linear init; weights stored as (in, out)."""
    ks = jax.random.split(key, 4)

    def lin(kw, kb, fan_in, fan_out):
        scale = 1.0 / jnp.sqrt(jnp.float32(fan_in))
        w = jax.random.uniform(kw, (fan_in, fan_out), jnp.float32, -scale, scale)
        b = jax.random.uniform(kb, (fan_out,), jnp.float32, -scale, scale)
        return w, b

    p = {}
    p["w1"], p["b1"] = lin(ks[0], ks[1], IN_DIM, middims)        # Linear(34557, mid)
    p["w2"], p["b2"] = lin(ks[2], ks[3], middims, latent_dims)   # Linear(mid, latent)
    return p


def prepare_encoder_params(raw):
    """One-time (init-time) padding + re-blocking + bf16 cast for the kernel."""
    middims = raw["w1"].shape[1]
    assert middims % TN == 0, "middims must be a multiple of 128"
    w1_pad = (
        jnp.zeros((IN_DIM_PAD, middims), jnp.float32).at[:IN_DIM, :].set(raw["w1"])
    )
    # (K_pad, NJ*TN) -> (NJ, K_pad, TN): each (TK, TN) tile is contiguous in HBM.
    w1_blocked = w1_pad.reshape(IN_DIM_PAD, N_BLOCKS, TN).transpose(1, 0, 2)
    return {
        "w1_blocked": w1_blocked.astype(jnp.bfloat16),   # halves the HBM stream
        "b1": raw["b1"].reshape(1, middims),
        "w2": raw["w2"],
        "b2": raw["b2"],
    }


def encoder_forward(x, ep):
    """Matches PyTorch Encoder.forward: linear2(relu(linear1(x)))."""
    B = x.shape[0]
    x_p = jnp.pad(x, ((0, BATCH_PAD - B), (0, IN_DIM_PAD - IN_DIM)))
    z_partial = fused_encoder_matmul(x_p, ep["w1_blocked"], ep["b1"], ep["w2"])
    z = jnp.sum(z_partial, axis=0) + ep["b2"]     # 2-way partial sum + bias (tiny, XLA)
    return z[:B]


def encoder_reference(x, raw):
    h1 = jnp.maximum(
        jnp.dot(x, raw["w1"], precision=jax.lax.Precision.HIGHEST) + raw["b1"], 0.0
    )
    return jnp.dot(h1, raw["w2"], precision=jax.lax.Precision.HIGHEST) + raw["b2"]


if __name__ == "__main__":
    key = jax.random.PRNGKey(0)
    k_x, k_p = jax.random.split(key)

    x = jax.random.normal(k_x, (BATCH, IN_DIM), jnp.float32)
    raw = init_params(k_p)
    enc_params = prepare_encoder_params(raw)   # padding/blocking/bf16 happen ONCE here

    fwd = jax.jit(encoder_forward)
    z = fwd(x, enc_params)
    jax.block_until_ready(z)

    z_ref = encoder_reference(x, raw)

    assert z.shape == (BATCH, LATENT_DIMS)
    # bf16 weights over a 34557-term contraction (f32 accumulate): validate with a
    # tolerance consistent with the expected ~1e-3 rounding noise.
    max_err = float(jnp.max(jnp.abs(z - z_ref)))
    rel_err = float(jnp.linalg.norm(z - z_ref) / (jnp.linalg.norm(z_ref) + 1e-12))
    assert max_err < 2e-2 and rel_err < 2e-2, (max_err, rel_err)

    print("KERNEL_OK")
</pallas_src>

<mosaic_0001>
module attributes {stable_mosaic.version = 11 : i64} {
  func.func @_encoder_fused_kernel(%arg0: i32, %arg1: i32, %arg2: memref<8x17280xf32, #tpu.memory_space<vmem>>, %arg3: memref<1x17280x128xbf16, #tpu.memory_space<vmem>>, %arg4: memref<1x128xf32, #tpu.memory_space<vmem>>, %arg5: memref<128x32xf32, #tpu.memory_space<vmem>>, %arg6: memref<1x8x32xf32, #tpu.memory_space<vmem>>, %arg7: memref<8x128xf32, #tpu.memory_space<vmem>>) attributes {dimension_semantics = [#tpu.dimension_semantics<parallel>, #tpu.dimension_semantics<arbitrary>], iteration_bounds = array<i64: 2, 2>, scalar_prefetch = 0 : i64, scratch_operands = 1 : i64, tpu.core_type = #tpu.core_type<tc>, window_params = [{transform_indices = @transform_0, window_bounds = array<i64: 8, 17280>}, {transform_indices = @transform_1, window_bounds = array<i64: 1, 17280, 128>}, {transform_indices = @transform_2, window_bounds = array<i64: 1, 128>}, {transform_indices = @transform_3, window_bounds = array<i64: 128, 32>}, {transform_indices = @transform_4, window_bounds = array<i64: 1, 8, 32>}]} {
    %c0_i32 = arith.constant 0 : i32
    %0 = arith.cmpi eq, %arg1, %c0_i32 : i32
    %1 = arith.extui %0 : i1 to i32
    %c0_i32_0 = arith.constant 0 : i32
    %2 = arith.cmpi ne, %1, %c0_i32_0 : i32
    scf.if %2 {
      %cst_10 = arith.constant 0.000000e+00 : f32
      %14 = vector.broadcast %cst_10 : f32 to vector<8x128xf32>
      %c0_11 = arith.constant 0 : index
      %c0_12 = arith.constant 0 : index
      %15 = vector.load %arg7[%c0_11, %c0_12] : memref<8x128xf32, #tpu.memory_space<vmem>>, vector<8x128xf32>
      tpu.vector_store %arg7[%c0_11, %c0_12], %14 {strides = array<i32>} : memref<8x128xf32, #tpu.memory_space<vmem>>, vector<8x128xf32>,
    } else {
    }
    %c0 = arith.constant 0 : index
    %c0_1 = arith.constant 0 : index
    %3 = vector.load %arg7[%c0, %c0_1] : memref<8x128xf32, #tpu.memory_space<vmem>>, vector<8x128xf32>
    %c0_2 = arith.constant 0 : index
    %c0_3 = arith.constant 0 : index
    %4 = vector.load %arg2[%c0_2, %c0_3] : memref<8x17280xf32, #tpu.memory_space<vmem>>, vector<8x17280xf32>
    %5 = arith.truncf %4 : vector<8x17280xf32> to vector<8x17280xbf16>
    %c0_4 = arith.constant 0 : index
    %c0_5 = arith.constant 0 : index
    %c0_6 = arith.constant 0 : index
    %6 = vector.load %arg3[%c0_4, %c0_5, %c0_6] : memref<1x17280x128xbf16, #tpu.memory_space<vmem>>, vector<1x17280x128xbf16>
    %7 = vector.shape_cast %6 : vector<1x17280x128xbf16> to vector<17280x128xbf16>
    %cst = arith.constant dense<0.000000e+00> : vector<8x128xf32>
    %8 = tpu.matmul %5, %7, %cst {dimension_numbers = #tpu.dot_dimension_numbers<[1], [0], [0], [1], [0, 0, 1, 1], [], []>} : vector<8x17280xbf16>, vector<17280x128xbf16>, vector<8x128xf32> -> vector<8x128xf32>
    %9 = arith.addf %3, %8 : vector<8x128xf32>
    %c0_7 = arith.constant 0 : index
    %c0_8 = arith.constant 0 : index
    %10 = vector.load %arg7[%c0_7, %c0_8] : memref<8x128xf32, #tpu.memory_space<vmem>>, vector<8x128xf32>
    tpu.vector_store %arg7[%c0_7, %c0_8], %9 {strides = array<i32>} : memref<8x128xf32, #tpu.memory_space<vmem>>, vector<8x128xf32>,
    %c1_i32 = arith.constant 1 : i32
    %11 = arith.cmpi eq, %arg1, %c1_i32 : i32
    %12 = arith.extui %11 : i1 to i32
    %c0_i32_9 = arith.constant 0 : i32
    %13 = arith.cmpi ne, %12, %c0_i32_9 : i32
    scf.if %13 {
      %c0_10 = arith.constant 0 : index
      %c0_11 = arith.constant 0 : index
      %14 = vector.load %arg7[%c0_10, %c0_11] : memref<8x128xf32, #tpu.memory_space<vmem>>, vector<8x128xf32>
      %c0_12 = arith.constant 0 : index
      %c0_13 = arith.constant 0 : index
      %15 = vector.load %arg4[%c0_12, %c0_13] : memref<1x128xf32, #tpu.memory_space<vmem>>, vector<1x128xf32>
      %16 = vector.broadcast %15 : vector<1x128xf32> to vector<8x128xf32>
      %17 = arith.addf %14, %16 : vector<8x128xf32>
      %cst_14 = arith.constant 0.000000e+00 : f32
      %18 = vector.broadcast %cst_14 : f32 to vector<8x128xf32>
      %19 = arith.maximumf %17, %18 : vector<8x128xf32>
      %c0_15 = arith.constant 0 : index
      %c0_16 = arith.constant 0 : index
      %20 = vector.load %arg5[%c0_15, %c0_16] : memref<128x32xf32, #tpu.memory_space<vmem>>, vector<128x32xf32>
      %cst_17 = arith.constant dense<0.000000e+00> : vector<8x32xf32>
      %21 = tpu.matmul %19, %20, %cst_17 {dimension_numbers = #tpu.dot_dimension_numbers<[1], [0], [0], [1], [0, 0, 1, 1], [], []>} : vector<8x128xf32>, vector<128x32xf32>, vector<8x32xf32> -> vector<8x32xf32>
      %c0_18 = arith.constant 0 : index
      %c0_19 = arith.constant 0 : index
      %c0_20 = arith.constant 0 : index
      %22 = vector.load %arg6[%c0_18, %c0_19, %c0_20] : memref<1x8x32xf32, #tpu.memory_space<vmem>>, vector<1x8x32xf32>
      %23 = vector.shape_cast %22 : vector<1x8x32xf32> to vector<8x32xf32>
      %24 = vector.shape_cast %21 : vector<8x32xf32> to vector<1x8x32xf32>
      tpu.vector_store %arg6[%c0_18, %c0_19, %c0_20], %24 {strides = array<i32>} : memref<1x8x32xf32, #tpu.memory_space<vmem>>, vector<1x8x32xf32>,
    } else {
    }
    return
  }
  func.func @transform_0(%arg0: i32, %arg1: i32) -> (i32, i32) {
    %c0_i32 = arith.constant 0 : i32
    %c0_i32_0 = arith.constant 0 : i32
    return %c0_i32, %arg1 : i32, i32
  }
  func.func @transform_1(%arg0: i32, %arg1: i32) -> (i32, i32, i32) {
    %c0_i32 = arith.constant 0 : i32
    %c0_i32_0 = arith.constant 0 : i32
    return %arg0, %arg1, %c0_i32 : i32, i32, i32
  }
  func.func @transform_2(%arg0: i32, %arg1: i32) -> (i32, i32) {
    %c0_i32 = arith.constant 0 : i32
    %c0_i32_0 = arith.constant 0 : i32
    return %c0_i32, %arg0 : i32, i32
  }
  func.func @transform_3(%arg0: i32, %arg1: i32) -> (i32, i32) {
    %c0_i32 = arith.constant 0 : i32
    %c0_i32_0 = arith.constant 0 : i32
    return %arg0, %c0_i32 : i32, i32
  }
  func.func @transform_4(%arg0: i32, %arg1: i32) -> (i32, i32, i32) {
    %c0_i32 = arith.constant 0 : i32
    %c0_i32_0 = arith.constant 0 : i32
    %c0_i32_1 = arith.constant 0 : i32
    return %arg0, %c0_i32, %c0_i32_0 : i32, i32, i32
  }
}

</mosaic_0001>

<bundles_post_ra>
// kernel: encoder_forward.1
= control target key start
LH: loop header
LB: loop body
LE: loop exit
PB: predicated region body
PF: predicated region fallthrough
CT: control target
= control target key end

     0   :  { %s17816_s0 = inlined_call_operand.vmem [shape: f32[8,34560], index: 0, kind: input, shape index: {}]   ;;  %s17817_s1 = inlined_call_operand.hbm [shape: bf16[2,34560,128], index: 1, kind: input, shape index: {}]   ;;  %s17818_s2 = inlined_call_operand.hbm [shape: f32[1,256], index: 2, kind: input, shape index: {}]   ;;  %s17819_s3 = inlined_call_operand.vmem [shape: f32[256,32], index: 3, kind: input, shape index: {}]   ;;  %s17820_s4 = inlined_call_operand.vmem [shape: f32[2,8,32], index: 4, kind: output, shape index: {}]  }
   0x1   :  { %17828 = sst [smem:[#allocation12_spill]] %s17820_s4 }
   0x2   :  { %9 = vsyncpa [#allocation4], 0 }
   0x3   :  { %11 = vsyncpa [#allocation4 + $0x1], 0 }
   0x4   :  { %12 = vsyncpa [#allocation6], 0 }
   0x5   :  { %14 = vsyncpa [#allocation6 + $0x1], 0  ;;  %s16232_s15 = smov 0   ;;  %s16234_s16 = smov 0  }
   0x6   :  { %s16236_s17 = smov 0   ;;  %s16238_s18 = smov 0  }
   0x7   :  { %s16240_s19 = smov 0   ;;  %s16242_s20 = smov 0  }
   0x8   :  { %s16244_s21 = smov 0   ;;  %s16246_s22 = smov 0  }
   0x9   :  { %s16248_s23 = smov 0   ;;  %s16250_s24 = smov 0  }
   0xa   :  { %s16252_s25 = smov 0  }
   0xb LB: > { %17829 = sst [smem:[#allocation9_spill]] %s16187_s23  ;;  %s29_s26 = sadd.s32 1, %s16187_s23  ;;  %s16195_s25 = sphi %s16252_s25, %s20_s25   ;;  %s16191_s24 = sphi %s16250_s24, %s17852_s24   ;;  %s16187_s23 = sphi %s16248_s23, %s17843_s23   ;;  %s16183_s22 = sphi %s16246_s22, %s17851_s22   ;;  %s16179_s21 = sphi %s16244_s21, %s17842_s21   ;;  %s16175_s20 = sphi %s16242_s20, %s17850_s20   ;;  %s16171_s19 = sphi %s16240_s19, %s17849_s19   ;;  %s16167_s18 = sphi %s16238_s18, %s17848_s18   ;;  %s16163_s17 = sphi %s16236_s17, %s17847_s17   ;;  %s16159_s16 = sphi %s16234_s16, %s17846_s16   ;;  %s16155_s15 = sphi %s16232_s15, %s17845_s15  }
   0xc   : > { %s32_s27 = sadd.s32 1, %s16191_s24  ;;  %p30_p0 = scmp.ge.s32.totalorder %s29_s26, 2 }
   0xd   : > { %s67_s28 = sadd.s32 1, %s16175_s20  ;;  %p74_p1 = scmp.ne.s32.totalorder %s16175_s20, %s16171_s19 }
   0xe   : > { %p17825_p2 = scmp.eq.s32.totalorder %s16195_s25, 0  ;;  %s17854_s26 = smov (%p30_p0, %s29_s26), 0 }
   0xf   : > { %17830 = sst [smem:[#allocation10_spill]] %s17854_s26  ;;  %s17856_s27 = smov (!%p30_p0, %s32_s27), %s16191_s24 }
  0x10   : > { %s63_s29 = ssub.s32 %s16187_s23, %s17854_s26  ;;  %p76_p3 = por %p17825_p2, %p74_p1 }
  0x11   : > { %p34_p4 = scmp.ge.s32.totalorder %s17856_s27, 2  ;;  %p80_p5 = scmp.ne.s32.totalorder %s16171_s19, %s16167_s18 }
  0x12   : > { %p17824_p6 = scmp.lt.s32.totalorder %s16195_s25, 4  ;;  %s191_s30 = sand.u32 1, %s16175_s20  }
  0x13   : > { %s17858_s27 = smov (%p34_p4, %s17856_s27), 0  ;;  %s196_s5 = smul.u32 2160, %s16187_s23 }
  0x14   : > { %17831 = sst [smem:[#allocation11_spill]] %s17858_s27  ;;  %s16309_s6 = ssub.s32 %s16191_s24, %s17858_s27 }
  0x15   : > { %s64_s7 = sor.u32 %s63_s29, %s16309_s6  ;;  %s14850_s8 = smul.u32 8640, %s191_s30 }
  0x16   : > { %p65_p7 = scmp.eq.s32.totalorder %s64_s7, 0  ;;  %s14851_s9 = smul.u32 4320, %s16191_s24 }
  0x17   : > { %p16315_p8 = pnand %p17824_p6, %p76_p3  ;;  %s195_s13 = scalar_lea.vmem [#allocation3], %s14850_s8 }
  0x18   : > { %s16320_s11 = scalar_select %p65_p7, %s16175_s20, %s67_s28  }
  0x19   : > { %s201_s12 = sadd.s32 %s14851_s9, %s196_s5  ;;  %s204_s14 = sshll.u32 %s195_s13, 4  ;;  %s16322_s14 = int_to_ptr.vmem [resolvable:$true] %s204_s14 }
  0x1a   : > { %s12179_s26 = sshll.u32 %s201_s12, 6  ;;  %s16329_s23 = scalar_lea.sflag [#allocation4], %s191_s30 }
  0x1b   : > { %s16327_s7 = scalar_lea.hbm %s17817_s1, %s12179_s26  ;;  %p16043_p10 = pneg %p16315_p8 }
  0x1c   : > { %s16041_s4 = scalar_lea.hbm %s16327_s7, 138240  ;;  %s16046_s27 = scalar_lea.hbm %s17817_s1, 552960 }
  0x1d   : > { %p16042_p9 = scmp.ne.s32.totalorder %s16327_s7, %s16041_s4  ;;  %p16047_p13 = scmp.lt.u32.totalorder %s16327_s7, %s17817_s1 }
  0x1e   : > { %p16048_p0 = scmp.lt.u32.totalorder %s16046_s27, %s16041_s4  ;;  %p16050_p3 = scmp.lt.u32.totalorder %s16041_s4, %s16327_s7 }
  0x1f   : > { %p16044_p11 = pnand %p16043_p10, %p16042_p9 }
  0x20   : > { %p16049_p1 = por %p16048_p0, %p16047_p13 }
  0x21   : > { %p16045_p12 = pneg %p16044_p11 }
  0x22   : > { %p16051_p4 = por %p16050_p3, %p16049_p1 }
  0x24   : > { %p16052_p7 = pnand %p16051_p4, %p16045_p12 }
  0x26   : > { %16055 = shalt.err (!%p16052_p7)
}
  0x27   : > { %s16056_s30 = scalar_lea.vmem %s16322_s14, 138240  ;;  %s16197_s9 = smov [#allocation3]  }
  0x28   : > { %p16057_p9 = scmp.ne.s32.totalorder %s16322_s14, %s16056_s30  ;;  %s16061_s12 = sshll.u32 %s16197_s9, 4  ;;  %s16062_s12 = int_to_ptr.vmem [resolvable:$false] %s16061_s12 }
  0x29   : > { %s16063_s13 = scalar_lea.vmem %s16062_s12, 276480  ;;  %p16064_p2 = scmp.lt.s32.totalorder %s16322_s14, %s16062_s12 }
  0x2a   : > { %p16059_p11 = pnand %p16057_p9, %p16043_p10  ;;  %p16065_p13 = scmp.lt.s32.totalorder %s16063_s13, %s16056_s30 }
  0x2c   : > { %p16060_p6 = pneg %p16059_p11  ;;  %p16066_p0 = por %p16065_p13, %p16064_p2 }
  0x2e   : > { %p16067_p1 = pnand %p16066_p0, %p16060_p6 }
  0x30   : > { %16070 = shalt.err (!%p16067_p1)
}
  0x31   : > { %s16198_s4 = smov 64   ;;  %s16199_s29 = smov 4  }
  0x32   : > { %14860 = dma.hbm_to_vmem [thread:$0]  (!%p16315_p8), %s16327_s7, 138240, %s16322_s14, %s16329_s23, %s16198_s4, %s16198_s4, %s16199_s29  }
  0x33   : > { %p12181_p2 = scmp.ge.s32.totalorder %s16195_s25, 1  ;;  %p238_p6 = scmp.lt.s32.totalorder %s16195_s25, 5 }
  0x34   : > { %s12175_s5 = sadd.s32 4294967295, %s16195_s25   ;;  %p91_p3 = scmp.eq.s32.totalorder %s16309_s6, 0 }
  0x35   : > { %p16359_p10 = pnand %p12181_p2, %p238_p6  ;;  %p81_p12 = scmp.eq.s32.totalorder %s12175_s5, 0 }
  0x36   : > { %s93_s27 = sadd.s32 1, %s16163_s17  ;;  %p100_p4 = scmp.ne.s32.totalorder %s16163_s17, %s16159_s16 }
  0x37   : > { %p16371_p7 = por %p81_p12, %p80_p5  ;;  %p106_p9 = scmp.ne.s32.totalorder %s16159_s16, %s16155_s15 }
  0x38   : > { %s16378_s10 = scalar_select %p91_p3, %s16163_s17, %s93_s27  }
  0x39   : > { %s17834_s26 = scalar_select %p16371_p7, 1, 0 }
  0x3a   : > { %p17835_p8 = scmp.eq.s32.totalorder %s16195_s25, 0  ;;  %p16382_p13 = por %p106_p9, %p81_p12 }
  0x3b   : > { %s214_s14 = sand.u32 1, %s16163_s17   ;;  %s12180_s7 = sshll.u32 %s16191_s24, 4 }
  0x3c   : > { %p102_p11 = por %p100_p4, %p17835_p8  ;;  %s16391_s30 = scalar_lea.hbm %s17818_s2, %s12180_s7 }
  0x3d   : > { %s17836_s23 = scalar_select %p16382_p13, 1, 0 }
  0x3e   : > { %s217_s15 = scalar_lea.vmem [#allocation5], %s214_s14  ;;  %p17837_p5 = scmp.lt.s32.totalorder %s16195_s25, 4 }
  0x3f   : > { %s224_s18 = sshll.u32 %s217_s15, 4  ;;  %s215_s12 = scalar_lea.sflag [#allocation6], %s214_s14  ;;  %s16393_s18 = int_to_ptr.vmem [resolvable:$true] %s224_s18 }
  0x40   : > { %p16397_p0 = pnand %p17837_p5, %p102_p11  ;;  %s16071_s13 = scalar_lea.hbm %s16391_s30, 16 }
  0x41   : > { %p16072_p1 = scmp.ne.s32.totalorder %s16391_s30, %s16071_s13  ;;  %s16076_s5 = scalar_lea.hbm %s17818_s2, 32 }
  0x42   : > { %p16073_p2 = pneg %p16397_p0  ;;  %p16077_p3 = scmp.lt.u32.totalorder %s16391_s30, %s17818_s2 }
  0x43   : > { %p16078_p4 = scmp.lt.u32.totalorder %s16076_s5, %s16071_s13  ;;  %p16080_p8 = scmp.lt.u32.totalorder %s16071_s13, %s16391_s30 }
  0x44   : > { %p16074_p6 = pnand %p16073_p2, %p16072_p1 }
  0x45   : > { %p16079_p9 = por %p16078_p4, %p16077_p3 }
  0x46   : > { %p16075_p12 = pneg %p16074_p6 }
  0x47   : > { %p16081_p11 = por %p16080_p8, %p16079_p9 }
  0x49   : > { %p16082_p5 = pnand %p16081_p11, %p16075_p12 }
  0x4b   : > { %16085 = shalt.err (!%p16082_p5)
}
  0x4c   : > { %s16086_s14 = scalar_lea.vmem %s16393_s18, 16  ;;  %s16200_s8 = smov [#allocation5]  }
  0x4d   : > { %p16087_p1 = scmp.ne.s32.totalorder %s16393_s18, %s16086_s14  ;;  %s16091_s6 = sshll.u32 %s16200_s8, 4  ;;  %s16092_s6 = int_to_ptr.vmem [resolvable:$false] %s16091_s6 }
  0x4e   : > { %s16093_s15 = scalar_lea.vmem %s16092_s6, 32  ;;  %p16094_p7 = scmp.lt.s32.totalorder %s16393_s18, %s16092_s6 }
  0x4f   : > { %p16089_p6 = pnand %p16087_p1, %p16073_p2  ;;  %p16095_p3 = scmp.lt.s32.totalorder %s16093_s15, %s16086_s14 }
  0x51   : > { %p16090_p13 = pneg %p16089_p6  ;;  %p16096_p4 = por %p16095_p3, %p16094_p7 }
  0x53   : > { %p16097_p9 = pnand %p16096_p4, %p16090_p13 }
  0x55   : > { %16100 = shalt.err (!%p16097_p9)
}
  0x56   : > { %14863 = dma.hbm_to_vmem [thread:$0]  (!%p16397_p0), %s16391_s30, 16, %s16393_s18, %s215_s12  }
  0x57   : > { %242 = sbr.rel (%p16359_p10) target bundleno = 1650 (0x672), region = 36  ;;  %s244_s13 = sand.u32 (!%p16359_p10), 1, %s16171_s19  }
  0x58   : > { %s14852_s4 = smul.u32 (!%p16359_p10), 8640, %s244_s13  ;;  %s245_s29 = scalar_lea.sflag (!%p16359_p10), [#allocation4], %s244_s13 }
  0x59   : > { %p17839_p2 = scmp.ne.s32.totalorder (!%p16359_p10), %s17834_s26, 0 }
  0x5a   : > { %s16429_s5 = scalar_lea.vmem (!%p16359_p10), [#allocation3], %s14852_s4 }
  0x5e   : > { %16146 = dma.done.wait (%p17839_p2), %s245_s29, 138240  }
  0x5f   : > { %16148 = vsyncadd (%p17839_p2), %s245_s29, 4294829056  ;;  %s253_s9 = sand.u32 1, %s16159_s16   ;;  %p17840_p7 = scmp.ne.s32.totalorder %s17836_s23, 0 }
  0x60   : > { %s254_s27 = scalar_lea.sflag [#allocation6], %s253_s9  ;;  %s16436_s30 = scalar_lea.vmem [#allocation5], %s253_s9 }
  0x61   : > { %16150 = dma.done.wait (%p17840_p7), %s254_s27, 16  }
  0x62   : > { %16152 = vsyncadd (%p17840_p7), %s254_s27, 4294967280  ;;  %s294_s28 = smul.u32 135, %s16179_s21  ;;  %s12183_s18 = sshll.u32 %s16183_s22, 4 }
  0x63   : > { %p302_p10 = scmp.lt.s32.totalorder %s12183_s18, 31  ;;  %p307_p0 = scmp.lt.s32.totalorder %s16183_s22, 1 }
  0x64   : > { %p295_p13 = scmp.lt.s32.totalorder %s294_s28, 269  ;;  %s17841_s9 = sld [smem:[#allocation12_spill]] }
  0x65   : > { %s17860_s18 = smov (!%p302_p10, %s12183_s18), 31  ;;  %s17864_s22 = smov (!%p307_p0, %s16183_s22), 1 }
  0x66   : > { %s17862_s28 = smov (!%p295_p13, %s294_s28), 269  ;;  %s12184_s26 = sshll.u32 %s17860_s18, 3 }
  0x67   : > { %s12182_s12 = sshll.u32 %s17862_s28, 3  ;;  %s16448_s8 = scalar_lea.vmem %s17819_s3, %s12184_s26 }
  0x68   : > { %s16453_s15 = scalar_lea.vmem %s17816_s0, %s12182_s12  ;;  %s12185_s13 = sshll.u32 %s17864_s22, 3 }
  0x69   : > { %p12186_p12 = scmp.ne.s32.totalorder %s16179_s21, 0 }
  0x6a   : > { %s16459_s27 = scalar_lea.vmem %s17841_s9, %s12185_s13  ;;  %v16201_v0 = vmov (!%p12186_p12), 0.0  }
  0x6b   : > { %315 = sbr.rel (%p12186_p12) target bundleno = 114 (0x72), region = 48  ;;  %316 = vst [vmem:[#allocation2] sm:$0xff] (!%p12186_p12), %v16201_v0 }
  0x72 PF: > { %v14961_v1 = vld [vmem:[%s16429_s5 + $0x40] sm:$0xff]   ;;  %v14965_v5 = vld [vmem:[%s16429_s5 + $0x48] sm:$0xff]   ;;  %v14969_v9 = vld [vmem:[%s16429_s5 + $0x50] sm:$0xff]   ;;  %vm16203_vm0 = vmmov 0   ;;  %p13267_p8 = scmp.ne.s32.totalorder %s16179_s21, 1 }
  0x73   : > { %v14962_v2 = vld [vmem:[%s16429_s5 + $0xc0] sm:$0xff]   ;;  %13271 = vmatprep.subr.bf16.mxu0 %v14961_v1  ;;  %v14966_v6 = vld [vmem:[%s16429_s5 + $0xc8] sm:$0xff]   ;;  %v14970_v10 = vld [vmem:[%s16429_s5 + $0xd0] sm:$0xff]   ;;  %vm16205_vm1 = vmmov (!%p13267_p8), 0   ;;  %vm12050_vm2 = vcmask (!%p13267_p8), 261120  }
  0x74   : > { %v14963_v3 = vld [vmem:[%s16429_s5] sm:$0xff]   ;;  %13293 = vmatprep.subr.bf16.mxu1 %v14962_v2  ;;  %v14967_v7 = vld [vmem:[%s16429_s5 + $0x8] sm:$0xff]   ;;  %v14971_v11 = vld [vmem:[%s16429_s5 + $0x10] sm:$0xff]  }
  0x75   : > { %v14964_v4 = vld [vmem:[%s16429_s5 + $0x80] sm:$0xff]   ;;  %13272 = vmatpush3.bf16.msra.mxu0 %v14963_v3  ;;  %v14968_v8 = vld [vmem:[%s16429_s5 + $0x88] sm:$0xff]   ;;  %v14972_v12 = vld [vmem:[%s16429_s5 + $0x90] sm:$0xff]  }
  0x76   : > { %13294 = vmatpush3.bf16.msra.mxu1 %v14964_v4  ;;  %13273 = vmatprep.subr.bf16.mxu0 %v14965_v5  ;;  %v14973_v13 = vld [vmem:[%s16429_s5 + $0x58] sm:$0xff]   ;;  %v14977_v17 = vld [vmem:[%s16429_s5 + $0x60] sm:$0xff]   ;;  %v14981_v21 = vld [vmem:[%s16429_s5 + $0x68] sm:$0xff]  }
  0x77   : > { %13295 = vmatprep.subr.bf16.mxu1 %v14966_v6  ;;  %v14974_v14 = vld [vmem:[%s16429_s5 + $0xd8] sm:$0xff]   ;;  %v14978_v18 = vld [vmem:[%s16429_s5 + $0xe0] sm:$0xff]   ;;  %v14982_v22 = vld [vmem:[%s16429_s5 + $0xe8] sm:$0xff]  }
  0x78   : > { %v14975_v15 = vld [vmem:[%s16429_s5 + $0x18] sm:$0xff]   ;;  %v14979_v19 = vld [vmem:[%s16429_s5 + $0x20] sm:$0xff]   ;;  %v14983_v23 = vld [vmem:[%s16429_s5 + $0x28] sm:$0xff]  }
  0x79   : > { %13274 = vmatpush3.bf16.msra.mxu0 %v14967_v7  ;;  %v14976_v16 = vld [vmem:[%s16429_s5 + $0x98] sm:$0xff]   ;;  %v14980_v20 = vld [vmem:[%s16429_s5 + $0xa0] sm:$0xff]   ;;  %v14984_v24 = vld [vmem:[%s16429_s5 + $0xa8] sm:$0xff]  }
  0x7a   : > { %13296 = vmatpush3.bf16.msra.mxu1 %v14968_v8  ;;  %13275 = vmatprep.subr.bf16.mxu0 %v14969_v9  ;;  %v14985_v25 = vld [vmem:[%s16429_s5 + $0x70] sm:$0xff]   ;;  %v14989_v29 = vld [vmem:[%s16429_s5 + $0x78] sm:$0xff]   ;;  %v319_v33 = vld [vmem:[%s16453_s15 + $0x8] sm:$0xff] }
  0x7b   : > { %13297 = vmatprep.subr.bf16.mxu1 %v14970_v10  ;;  %v14986_v26 = vld [vmem:[%s16429_s5 + $0xf0] sm:$0xff]   ;;  %v14990_v30 = vld [vmem:[%s16429_s5 + $0xf8] sm:$0xff]   ;;  %v454_v36 = vpack.c.bf16 %v319_v33, %v319_v33  ;;  %v320_v39 = vld [vmem:[%s16453_s15 + $0x10] sm:$0xff] }
  0x7c   : > { %v14987_v27 = vld [vmem:[%s16429_s5 + $0x30] sm:$0xff]   ;;  %v14991_v31 = vld [vmem:[%s16429_s5 + $0x38] sm:$0xff]   ;;  %v455_v40 = vpack.c.bf16 %v320_v39, %v320_v39  ;;  %v14993_v41 = vld [vmem:[%s16429_s5 + $0x140] sm:$0xff]  }
  0x7d   : > { %13276 = vmatpush3.bf16.msra.mxu0 %v14971_v11  ;;  %v14988_v28 = vld [vmem:[%s16429_s5 + $0xb0] sm:$0xff]   ;;  %v14992_v32 = vld [vmem:[%s16429_s5 + $0xb8] sm:$0xff]   ;;  %9260 = vmatprep.mubr.bf16.mxu0 %v454_v36  ;;  %v14994_v42 = vld [vmem:[%s16429_s5 + $0x100] sm:$0xff]  }
  0x7e   : > { %13298 = vmatpush3.bf16.msra.mxu1 %v14972_v12  ;;  %13277 = vmatprep.subr.bf16.mxu0 %v14973_v13  ;;  %v321_v34 = vld [vmem:[%s16453_s15 + $0x18] sm:$0xff]  ;;  %v318_v35 = vld [vmem:[%s16453_s15] sm:$0xff]  ;;  %v14995_v43 = vld [vmem:[%s16429_s5 + $0x1c0] sm:$0xff]  }
  0x7f   : > { %13299 = vmatprep.subr.bf16.mxu1 %v14974_v14  ;;  %v456_v37 = vpack.c.bf16 %v321_v34, %v321_v34  ;;  %v453_v38 = vpack.c.bf16 %v318_v35, %v318_v35  ;;  %v14996_v44 = vld [vmem:[%s16429_s5 + $0x180] sm:$0xff]   ;;  %v14997_v45 = vld [vmem:[%s16429_s5 + $0x148] sm:$0xff]   ;;  %v15001_v49 = vld [vmem:[%s16429_s5 + $0x150] sm:$0xff]  }
  0x80   : > { %v14998_v46 = vld [vmem:[%s16429_s5 + $0x108] sm:$0xff]   ;;  %v15002_v50 = vld [vmem:[%s16429_s5 + $0x110] sm:$0xff]   ;;  %v15005_v53 = vld [vmem:[%s16429_s5 + $0x158] sm:$0xff]  }
  0x81   : > { %13278 = vmatpush3.bf16.msra.mxu0 %v14975_v15  ;;  %9300 = vmatprep.mubr.bf16.mxu1 %v456_v37  ;;  %v14999_v47 = vld [vmem:[%s16429_s5 + $0x1c8] sm:$0xff]   ;;  %v15003_v51 = vld [vmem:[%s16429_s5 + $0x1d0] sm:$0xff]   ;;  %v15006_v54 = vld [vmem:[%s16429_s5 + $0x118] sm:$0xff]  }
  0x82   : > { %13300 = vmatpush3.bf16.msra.mxu1 %v14976_v16  ;;  %13279 = vmatprep.subr.bf16.mxu0 %v14977_v17  ;;  %v15000_v48 = vld [vmem:[%s16429_s5 + $0x188] sm:$0xff]   ;;  %v15004_v52 = vld [vmem:[%s16429_s5 + $0x190] sm:$0xff]   ;;  %v15007_v55 = vld [vmem:[%s16429_s5 + $0x1d8] sm:$0xff]  }
  0x83   : > { %13301 = vmatprep.subr.bf16.mxu1 %v14978_v18  ;;  %v15008_v56 = vld [vmem:[%s16429_s5 + $0x198] sm:$0xff]   ;;  %v15009_v57 = vld [vmem:[%s16429_s5 + $0x160] sm:$0xff]   ;;  %v15013_v61 = vld [vmem:[%s16429_s5 + $0x168] sm:$0xff]  }
  0x84   : > { %v15010_v58 = vld [vmem:[%s16429_s5 + $0x120] sm:$0xff]   ;;  %v15014_v62 = vld [vmem:[%s16429_s5 + $0x128] sm:$0xff]   ;;  %v15017_v1 = vld [vmem:[%s16429_s5 + $0x170] sm:$0xff]  }
  0x85   : > { %13280 = vmatpush3.bf16.msra.mxu0 %v14979_v19  ;;  %v15011_v59 = vld [vmem:[%s16429_s5 + $0x1e0] sm:$0xff]   ;;  %v15015_v63 = vld [vmem:[%s16429_s5 + $0x1e8] sm:$0xff]   ;;  %v15018_v2 = vld [vmem:[%s16429_s5 + $0x130] sm:$0xff]  }
  0x86   : > { %13302 = vmatpush3.bf16.msra.mxu1 %v14980_v20  ;;  %13281 = vmatprep.subr.bf16.mxu0 %v14981_v21  ;;  %v15012_v60 = vld [vmem:[%s16429_s5 + $0x1a0] sm:$0xff]   ;;  %v15016_v0 = vld [vmem:[%s16429_s5 + $0x1a8] sm:$0xff]   ;;  %v15019_v3 = vld [vmem:[%s16429_s5 + $0x1f0] sm:$0xff]  }
  0x87   : > { %13303 = vmatprep.subr.bf16.mxu1 %v14982_v22  ;;  %v15020_v4 = vld [vmem:[%s16429_s5 + $0x1b0] sm:$0xff]   ;;  %v15021_v5 = vld [vmem:[%s16429_s5 + $0x178] sm:$0xff]   ;;  %v323_v8 = vld [vmem:[%s16453_s15 + $0x28] sm:$0xff] }
  0x88   : > { %v15022_v6 = vld [vmem:[%s16429_s5 + $0x138] sm:$0xff]   ;;  %v458_v9 = vpack.c.bf16 %v323_v8, %v323_v8  ;;  %v15025_v13 = vld [vmem:[%s16429_s5 + $0x240] sm:$0xff]   ;;  %v325_v14 = vld [vmem:[%s16453_s15 + $0x38] sm:$0xff] }
  0x89   : > { %13282 = vmatpush3.bf16.msra.mxu0 %v14983_v23  ;;  %v15023_v7 = vld [vmem:[%s16429_s5 + $0x1f8] sm:$0xff]   ;;  %v460_v15 = vpack.c.bf16 %v325_v14, %v325_v14  ;;  %v15026_v16 = vld [vmem:[%s16429_s5 + $0x200] sm:$0xff]   ;;  %v324_v17 = vld [vmem:[%s16453_s15 + $0x30] sm:$0xff] }
  0x8a   : > { %13304 = vmatpush3.bf16.msra.mxu1 %v14984_v24  ;;  %13283 = vmatprep.subr.bf16.mxu0 %v14985_v25  ;;  %v15024_v10 = vld [vmem:[%s16429_s5 + $0x1b8] sm:$0xff]   ;;  %v459_v18 = vpack.c.bf16 %v324_v17, %v324_v17  ;;  %v15027_v19 = vld [vmem:[%s16429_s5 + $0x2c0] sm:$0xff]   ;;  %v15029_v21 = vld [vmem:[%s16429_s5 + $0x248] sm:$0xff]  }
  0x8b   : > { %13305 = vmatprep.subr.bf16.mxu1 %v14986_v26  ;;  %v322_v11 = vld [vmem:[%s16453_s15 + $0x20] sm:$0xff]  ;;  %v15028_v20 = vld [vmem:[%s16429_s5 + $0x280] sm:$0xff]   ;;  %v15030_v22 = vld [vmem:[%s16429_s5 + $0x208] sm:$0xff]  }
  0x8c   : > { %v457_v12 = vpack.c.bf16 %v322_v11, %v322_v11  ;;  %v15031_v23 = vld [vmem:[%s16429_s5 + $0x2c8] sm:$0xff]   ;;  %v15033_v25 = vld [vmem:[%s16429_s5 + $0x250] sm:$0xff]   ;;  %v15041_v33 = vld [vmem:[%s16429_s5 + $0x260] sm:$0xff]  }
  0x8d   : > { %13284 = vmatpush3.bf16.msra.mxu0 %v14987_v27  ;;  %v15032_v24 = vld [vmem:[%s16429_s5 + $0x288] sm:$0xff]   ;;  %v15034_v26 = vld [vmem:[%s16429_s5 + $0x210] sm:$0xff]   ;;  %v15042_v34 = vld [vmem:[%s16429_s5 + $0x220] sm:$0xff]  }
  0x8e   : > { %13306 = vmatpush3.bf16.msra.mxu1 %v14988_v28  ;;  %13285 = vmatprep.subr.bf16.mxu0 %v14989_v29  ;;  %v15035_v27 = vld [vmem:[%s16429_s5 + $0x2d0] sm:$0xff]   ;;  %v15037_v29 = vld [vmem:[%s16429_s5 + $0x258] sm:$0xff]   ;;  %v15043_v35 = vld [vmem:[%s16429_s5 + $0x2e0] sm:$0xff]  }
  0x8f   : > { %13307 = vmatprep.subr.bf16.mxu1 %v14990_v30  ;;  %v15036_v28 = vld [vmem:[%s16429_s5 + $0x290] sm:$0xff]   ;;  %v15038_v30 = vld [vmem:[%s16429_s5 + $0x218] sm:$0xff]   ;;  %v15044_v36 = vld [vmem:[%s16429_s5 + $0x2a0] sm:$0xff]  }
  0x90   : > { %v15045_v37 = vld [vmem:[%s16429_s5 + $0x268] sm:$0xff]   ;;  %v15072_v8 = vld [vmem:[%s16429_s5 + $0x398] sm:$0xff]   ;;  %v15075_v11 = vld [vmem:[%s16429_s5 + $0x3e0] sm:$0xff]  }
  0x91   : > { %13286 = vmatpush3.bf16.msra.mxu0 %v14991_v31  ;;  %v15039_v31 = vld [vmem:[%s16429_s5 + $0x2d8] sm:$0xff]   ;;  %v15047_v39 = vld [vmem:[%s16429_s5 + $0x2e8] sm:$0xff]   ;;  %v15081_v17 = vld [vmem:[%s16429_s5 + $0x370] sm:$0xff]  }
  0x92   : > { %13308 = vmatpush3.bf16.msra.mxu1 %v14992_v32  ;;  %13315 = vmatprep.subr.bf16.mxu0 %v14993_v41  ;;  %v15040_v32 = vld [vmem:[%s16429_s5 + $0x298] sm:$0xff]   ;;  %v15049_v41 = vld [vmem:[%s16429_s5 + $0x270] sm:$0xff]   ;;  %v15078_v14 = vld [vmem:[%s16429_s5 + $0x328] sm:$0xff]  }
  0x93   : > { %13337 = vmatprep.subr.bf16.mxu1 %v14995_v43  ;;  %v15051_v43 = vld [vmem:[%s16429_s5 + $0x2f0] sm:$0xff]  }
  0x94   : > { %9261 = vmatmul.mubr.bf16.vlgmr.msra.gmra.mrb[0].mxu0 %v453_v38  ;;  %v15046_v38 = vld [vmem:[%s16429_s5 + $0x228] sm:$0xff]  }
  0x95   : > { %9301 = vmatmul.mubr.bf16.vlgmr.msra.gmra.mrb[0].mxu1 %v455_v40  ;;  %13316 = vmatpush3.bf16.msra.mxu0 %v14994_v42  ;;  %v15048_v40 = vld [vmem:[%s16429_s5 + $0x2a8] sm:$0xff]   ;;  %v15050_v42 = vld [vmem:[%s16429_s5 + $0x230] sm:$0xff]  }
  0x96   : > { %13338 = vmatpush3.bf16.msra.mxu1 %v14996_v44  ;;  %13317 = vmatprep.subr.bf16.mxu0 %v14997_v45  ;;  %v15052_v44 = vld [vmem:[%s16429_s5 + $0x2b0] sm:$0xff]   ;;  %v15053_v45 = vld [vmem:[%s16429_s5 + $0x278] sm:$0xff]  }
  0x97   : > { %13339 = vmatprep.subr.bf16.mxu1 %v14999_v47  ;;  %9340 = vmatprep.mubr.bf16.mxu0 %v458_v9  ;;  %v15055_v47 = vld [vmem:[%s16429_s5 + $0x2f8] sm:$0xff]   ;;  %v15073_v9 = vld [vmem:[%s16429_s5 + $0x360] sm:$0xff]  }
  0x98   : > { %9380 = vmatprep.mubr.bf16.mxu1 %v460_v15  ;;  %v15079_v15 = vld [vmem:[%s16429_s5 + $0x3e8] sm:$0xff]  }
  0x99   : > { %13318 = vmatpush3.bf16.msra.mxu0 %v14998_v46  ;;  %v15054_v46 = vld [vmem:[%s16429_s5 + $0x238] sm:$0xff]  }
  0x9a   : > { %13340 = vmatpush3.bf16.msra.mxu1 %v15000_v48  ;;  %13319 = vmatprep.subr.bf16.mxu0 %v15001_v49  ;;  %v327_v48 = vld [vmem:[%s16453_s15 + $0x48] sm:$0xff] }
  0x9b   : > { %13341 = vmatprep.subr.bf16.mxu1 %v15003_v51  ;;  %v462_v49 = vpack.c.bf16 %v327_v48, %v327_v48  ;;  %v326_v51 = vld [vmem:[%s16453_s15 + $0x40] sm:$0xff] }
  0x9c   : > { %v15104_v48 = vld [vmem:[%s16429_s5 + $0x498] sm:$0xff]  }
  0x9d   : > { %13320 = vmatpush3.bf16.msra.mxu0 %v15002_v50  ;;  %v15056_v50 = vld [vmem:[%s16429_s5 + $0x2b8] sm:$0xff]  }
  0x9e   : > { %13342 = vmatpush3.bf16.msra.mxu1 %v15004_v52  ;;  %13321 = vmatprep.subr.bf16.mxu0 %v15005_v53  ;;  %v461_v52 = vpack.c.bf16 %v326_v51, %v326_v51  ;;  %v15057_v53 = vld [vmem:[%s16429_s5 + $0x340] sm:$0xff]  }
  0x9f   : > { %13343 = vmatprep.subr.bf16.mxu1 %v15007_v55  ;;  %v15107_v51 = vld [vmem:[%s16429_s5 + $0x4e0] sm:$0xff]  }
  0xa1   : > { %13322 = vmatpush3.bf16.msra.mxu0 %v15006_v54  ;;  %v329_v54 = vld [vmem:[%s16453_s15 + $0x58] sm:$0xff] }
  0xa2   : > { %13344 = vmatpush3.bf16.msra.mxu1 %v15008_v56  ;;  %13323 = vmatprep.subr.bf16.mxu0 %v15009_v57  ;;  %v464_v55 = vpack.c.bf16 %v329_v54, %v329_v54  ;;  %v15058_v56 = vld [vmem:[%s16429_s5 + $0x300] sm:$0xff]   ;;  %v328_v57 = vld [vmem:[%s16453_s15 + $0x50] sm:$0xff] }
  0xa3   : > { %13345 = vmatprep.subr.bf16.mxu1 %v15011_v59  ;;  %v15059_v59 = vld [vmem:[%s16429_s5 + $0x3c0] sm:$0xff]   ;;  %v15110_v54 = vld [vmem:[%s16429_s5 + $0x428] sm:$0xff]  }
  0xa5   : > { %13324 = vmatpush3.bf16.msra.mxu0 %v15010_v58  ;;  %v463_v58 = vpack.c.bf16 %v328_v57, %v328_v57  ;;  %v15113_v57 = vld [vmem:[%s16429_s5 + $0x470] sm:$0xff]  }
  0xa6   : > { %13346 = vmatpush3.bf16.msra.mxu1 %v15012_v60  ;;  %13325 = vmatprep.subr.bf16.mxu0 %v15013_v61  ;;  %v15060_v60 = vld [vmem:[%s16429_s5 + $0x380] sm:$0xff]   ;;  %v15061_v61 = vld [vmem:[%s16429_s5 + $0x348] sm:$0xff]  }
  0xa7   : > { %13347 = vmatprep.subr.bf16.mxu1 %v15015_v63  ;;  %v15063_v63 = vld [vmem:[%s16429_s5 + $0x3c8] sm:$0xff]  }
  0xa9   : > { %13326 = vmatpush3.bf16.msra.mxu0 %v15014_v62  ;;  %v15062_v62 = vld [vmem:[%s16429_s5 + $0x308] sm:$0xff]  }
  0xaa   : > { %13348 = vmatpush3.bf16.msra.mxu1 %v15016_v0  ;;  %13327 = vmatprep.subr.bf16.mxu0 %v15017_v1  ;;  %v15064_v0 = vld [vmem:[%s16429_s5 + $0x388] sm:$0xff]   ;;  %v15065_v1 = vld [vmem:[%s16429_s5 + $0x350] sm:$0xff]  }
  0xab   : > { %13349 = vmatprep.subr.bf16.mxu1 %v15019_v3  ;;  %v15067_v3 = vld [vmem:[%s16429_s5 + $0x3d0] sm:$0xff]  }
  0xad   : > { %13328 = vmatpush3.bf16.msra.mxu0 %v15018_v2  ;;  %v15066_v2 = vld [vmem:[%s16429_s5 + $0x310] sm:$0xff]  }
  0xae   : > { %13350 = vmatpush3.bf16.msra.mxu1 %v15020_v4  ;;  %13329 = vmatprep.subr.bf16.mxu0 %v15021_v5  ;;  %v15068_v4 = vld [vmem:[%s16429_s5 + $0x390] sm:$0xff]   ;;  %v15069_v5 = vld [vmem:[%s16429_s5 + $0x358] sm:$0xff]  }
  0xaf   : > { %13351 = vmatprep.subr.bf16.mxu1 %v15023_v7  ;;  %v15071_v7 = vld [vmem:[%s16429_s5 + $0x3d8] sm:$0xff]  }
  0xb1   : > { %13330 = vmatpush3.bf16.msra.mxu0 %v15022_v6  ;;  %v15070_v6 = vld [vmem:[%s16429_s5 + $0x318] sm:$0xff]  }
  0xb2   : > { %13352 = vmatpush3.bf16.msra.mxu1 %v15024_v10  ;;  %13359 = vmatprep.subr.bf16.mxu0 %v15025_v13  ;;  %v15074_v10 = vld [vmem:[%s16429_s5 + $0x320] sm:$0xff]   ;;  %v15077_v13 = vld [vmem:[%s16429_s5 + $0x368] sm:$0xff]  }
  0xb3   : > { %13381 = vmatprep.subr.bf16.mxu1 %v15027_v19  ;;  %v15083_v19 = vld [vmem:[%s16429_s5 + $0x3f0] sm:$0xff]  }
  0xb4   : > { %9341 = vmatmul.mubr.bf16.vlgmr.msra.gmra.mrb[4].mxu0 %v457_v12  ;;  %v15076_v12 = vld [vmem:[%s16429_s5 + $0x3a0] sm:$0xff]  }
  0xb5   : > { %13360 = vmatpush3.bf16.msra.mxu0 %v15026_v16  ;;  %9381 = vmatmul.mubr.bf16.vlgmr.msra.gmra.mrb[4].mxu1 %v459_v18  ;;  %v15080_v16 = vld [vmem:[%s16429_s5 + $0x3a8] sm:$0xff]   ;;  %v15082_v18 = vld [vmem:[%s16429_s5 + $0x330] sm:$0xff]  }
  0xb6   : > { %13382 = vmatpush3.bf16.msra.mxu1 %v15028_v20  ;;  %13361 = vmatprep.subr.bf16.mxu0 %v15029_v21  ;;  %v15084_v20 = vld [vmem:[%s16429_s5 + $0x3b0] sm:$0xff]   ;;  %v15085_v21 = vld [vmem:[%s16429_s5 + $0x378] sm:$0xff]  }
  0xb7   : > { %13383 = vmatprep.subr.bf16.mxu1 %v15031_v23  ;;  %9420 = vmatprep.mubr.bf16.mxu0 %v462_v49  ;;  %v15087_v23 = vld [vmem:[%s16429_s5 + $0x3f8] sm:$0xff]   ;;  %v15105_v49 = vld [vmem:[%s16429_s5 + $0x460] sm:$0xff]  }
  0xb8   : > { %9460 = vmatprep.mubr.bf16.mxu1 %v464_v55  ;;  %v15111_v55 = vld [vmem:[%s16429_s5 + $0x4e8] sm:$0xff]  }
  0xb9   : > { %13362 = vmatpush3.bf16.msra.mxu0 %v15030_v22  ;;  %v15086_v22 = vld [vmem:[%s16429_s5 + $0x338] sm:$0xff]  }
  0xba   : > { %13384 = vmatpush3.bf16.msra.mxu1 %v15032_v24  ;;  %13363 = vmatprep.subr.bf16.mxu0 %v15033_v25  ;;  %v331_v24 = vld [vmem:[%s16453_s15 + $0x68] sm:$0xff] }
  0xbb   : > { %13385 = vmatprep.subr.bf16.mxu1 %v15035_v27  ;;  %v466_v25 = vpack.c.bf16 %v331_v24, %v331_v24  ;;  %v330_v27 = vld [vmem:[%s16453_s15 + $0x60] sm:$0xff] }
  0xbc   : > { %v15136_v24 = vld [vmem:[%s16429_s5 + $0x598] sm:$0xff]  }
  0xbd   : > { %13364 = vmatpush3.bf16.msra.mxu0 %v15034_v26  ;;  %v15088_v26 = vld [vmem:[%s16429_s5 + $0x3b8] sm:$0xff]  }
  0xbe   : > { %13386 = vmatpush3.bf16.msra.mxu1 %v15036_v28  ;;  %13365 = vmatprep.subr.bf16.mxu0 %v15037_v29  ;;  %v465_v28 = vpack.c.bf16 %v330_v27, %v330_v27  ;;  %v15089_v29 = vld [vmem:[%s16429_s5 + $0x440] sm:$0xff]  }
  0xbf   : > { %13387 = vmatprep.subr.bf16.mxu1 %v15039_v31  ;;  %v15139_v27 = vld [vmem:[%s16429_s5 + $0x5e0] sm:$0xff]  }
  0xc1   : > { %13366 = vmatpush3.bf16.msra.mxu0 %v15038_v30  ;;  %v333_v30 = vld [vmem:[%s16453_s15 + $0x78] sm:$0xff] }
  0xc2   : > { %13388 = vmatpush3.bf16.msra.mxu1 %v15040_v32  ;;  %13367 = vmatprep.subr.bf16.mxu0 %v15041_v33  ;;  %v468_v31 = vpack.c.bf16 %v333_v30, %v333_v30  ;;  %v15090_v32 = vld [vmem:[%s16429_s5 + $0x400] sm:$0xff]   ;;  %v332_v33 = vld [vmem:[%s16453_s15 + $0x70] sm:$0xff] }
  0xc3   : > { %13389 = vmatprep.subr.bf16.mxu1 %v15043_v35  ;;  %v15091_v35 = vld [vmem:[%s16429_s5 + $0x4c0] sm:$0xff]   ;;  %v15142_v30 = vld [vmem:[%s16429_s5 + $0x528] sm:$0xff]  }
  0xc5   : > { %13368 = vmatpush3.bf16.msra.mxu0 %v15042_v34  ;;  %v467_v34 = vpack.c.bf16 %v332_v33, %v332_v33  ;;  %v15145_v33 = vld [vmem:[%s16429_s5 + $0x570] sm:$0xff]  }
  0xc6   : > { %13390 = vmatpush3.bf16.msra.mxu1 %v15044_v36  ;;  %13369 = vmatprep.subr.bf16.mxu0 %v15045_v37  ;;  %v15092_v36 = vld [vmem:[%s16429_s5 + $0x480] sm:$0xff]   ;;  %v15093_v37 = vld [vmem:[%s16429_s5 + $0x448] sm:$0xff]  }
  0xc7   : > { %13391 = vmatprep.subr.bf16.mxu1 %v15047_v39  ;;  %v15095_v39 = vld [vmem:[%s16429_s5 + $0x4c8] sm:$0xff]  }
  0xc9   : > { %13370 = vmatpush3.bf16.msra.mxu0 %v15046_v38  ;;  %v15094_v38 = vld [vmem:[%s16429_s5 + $0x408] sm:$0xff]  }
  0xca   : > { %13392 = vmatpush3.bf16.msra.mxu1 %v15048_v40  ;;  %13371 = vmatprep.subr.bf16.mxu0 %v15049_v41  ;;  %v15096_v40 = vld [vmem:[%s16429_s5 + $0x488] sm:$0xff]   ;;  %v15097_v41 = vld [vmem:[%s16429_s5 + $0x450] sm:$0xff]  }
  0xcb   : > { %13393 = vmatprep.subr.bf16.mxu1 %v15051_v43  ;;  %v15099_v43 = vld [vmem:[%s16429_s5 + $0x4d0] sm:$0xff]  }
  0xcd   : > { %13372 = vmatpush3.bf16.msra.mxu0 %v15050_v42  ;;  %v15098_v42 = vld [vmem:[%s16429_s5 + $0x410] sm:$0xff]  }
  0xce   : > { %13394 = vmatpush3.bf16.msra.mxu1 %v15052_v44  ;;  %13373 = vmatprep.subr.bf16.mxu0 %v15053_v45  ;;  %v15100_v44 = vld [vmem:[%s16429_s5 + $0x490] sm:$0xff]   ;;  %v15101_v45 = vld [vmem:[%s16429_s5 + $0x458] sm:$0xff]  }
  0xcf   : > { %13395 = vmatprep.subr.bf16.mxu1 %v15055_v47  ;;  %v15103_v47 = vld [vmem:[%s16429_s5 + $0x4d8] sm:$0xff]  }
  0xd1   : > { %13374 = vmatpush3.bf16.msra.mxu0 %v15054_v46  ;;  %v15102_v46 = vld [vmem:[%s16429_s5 + $0x418] sm:$0xff]  }
  0xd2   : > { %13396 = vmatpush3.bf16.msra.mxu1 %v15056_v50  ;;  %13403 = vmatprep.subr.bf16.mxu0 %v15057_v53  ;;  %v15106_v50 = vld [vmem:[%s16429_s5 + $0x420] sm:$0xff]   ;;  %v15109_v53 = vld [vmem:[%s16429_s5 + $0x468] sm:$0xff]  }
  0xd3   : > { %13425 = vmatprep.subr.bf16.mxu1 %v15059_v59  ;;  %v15115_v59 = vld [vmem:[%s16429_s5 + $0x4f0] sm:$0xff]  }
  0xd4   : > { %9421 = vmatmul.mubr.bf16.vlgmr.msra.gmra.mrb[8].mxu0 %v461_v52  ;;  %v15108_v52 = vld [vmem:[%s16429_s5 + $0x4a0] sm:$0xff]  }
  0xd5   : > { %13404 = vmatpush3.bf16.msra.mxu0 %v15058_v56  ;;  %9461 = vmatmul.mubr.bf16.vlgmr.msra.gmra.mrb[8].mxu1 %v463_v58  ;;  %v15112_v56 = vld [vmem:[%s16429_s5 + $0x4a8] sm:$0xff]   ;;  %v15114_v58 = vld [vmem:[%s16429_s5 + $0x430] sm:$0xff]  }
  0xd6   : > { %13426 = vmatpush3.bf16.msra.mxu1 %v15060_v60  ;;  %13405 = vmatprep.subr.bf16.mxu0 %v15061_v61  ;;  %v15116_v60 = vld [vmem:[%s16429_s5 + $0x4b0] sm:$0xff]   ;;  %v15117_v61 = vld [vmem:[%s16429_s5 + $0x478] sm:$0xff]  }
  0xd7   : > { %13427 = vmatprep.subr.bf16.mxu1 %v15063_v63  ;;  %9500 = vmatprep.mubr.bf16.mxu0 %v466_v25  ;;  %v15119_v63 = vld [vmem:[%s16429_s5 + $0x4f8] sm:$0xff]   ;;  %v15137_v25 = vld [vmem:[%s16429_s5 + $0x560] sm:$0xff]  }
  0xd8   : > { %9540 = vmatprep.mubr.bf16.mxu1 %v468_v31  ;;  %v15143_v31 = vld [vmem:[%s16429_s5 + $0x5e8] sm:$0xff]  }
  0xd9   : > { %13406 = vmatpush3.bf16.msra.mxu0 %v15062_v62  ;;  %v15118_v62 = vld [vmem:[%s16429_s5 + $0x438] sm:$0xff]  }
  0xda   : > { %13428 = vmatpush3.bf16.msra.mxu1 %v15064_v0  ;;  %13407 = vmatprep.subr.bf16.mxu0 %v15065_v1  ;;  %v335_v0 = vld [vmem:[%s16453_s15 + $0x88] sm:$0xff] }
  0xdb   : > { %13429 = vmatprep.subr.bf16.mxu1 %v15067_v3  ;;  %v470_v1 = vpack.c.bf16 %v335_v0, %v335_v0  ;;  %v334_v3 = vld [vmem:[%s16453_s15 + $0x80] sm:$0xff] }
  0xdc   : > { %v15168_v0 = vld [vmem:[%s16429_s5 + $0x698] sm:$0xff]  }
  0xdd   : > { %13408 = vmatpush3.bf16.msra.mxu0 %v15066_v2  ;;  %v15120_v2 = vld [vmem:[%s16429_s5 + $0x4b8] sm:$0xff]  }
  0xde   : > { %13430 = vmatpush3.bf16.msra.mxu1 %v15068_v4  ;;  %13409 = vmatprep.subr.bf16.mxu0 %v15069_v5  ;;  %v469_v4 = vpack.c.bf16 %v334_v3, %v334_v3  ;;  %v15121_v5 = vld [vmem:[%s16429_s5 + $0x540] sm:$0xff]  }
  0xdf   : > { %13431 = vmatprep.subr.bf16.mxu1 %v15071_v7  ;;  %v15171_v3 = vld [vmem:[%s16429_s5 + $0x6e0] sm:$0xff]  }
  0xe1   : > { %13410 = vmatpush3.bf16.msra.mxu0 %v15070_v6  ;;  %v337_v6 = vld [vmem:[%s16453_s15 + $0x98] sm:$0xff] }
  0xe2   : > { %13432 = vmatpush3.bf16.msra.mxu1 %v15072_v8  ;;  %13411 = vmatprep.subr.bf16.mxu0 %v15073_v9  ;;  %v472_v7 = vpack.c.bf16 %v337_v6, %v337_v6  ;;  %v15122_v8 = vld [vmem:[%s16429_s5 + $0x500] sm:$0xff]   ;;  %v336_v9 = vld [vmem:[%s16453_s15 + $0x90] sm:$0xff] }
  0xe3   : > { %13433 = vmatprep.subr.bf16.mxu1 %v15075_v11  ;;  %v15123_v11 = vld [vmem:[%s16429_s5 + $0x5c0] sm:$0xff]   ;;  %v15174_v6 = vld [vmem:[%s16429_s5 + $0x628] sm:$0xff]  }
  0xe5   : > { %13412 = vmatpush3.bf16.msra.mxu0 %v15074_v10  ;;  %v471_v10 = vpack.c.bf16 %v336_v9, %v336_v9  ;;  %v15177_v9 = vld [vmem:[%s16429_s5 + $0x670] sm:$0xff]  }
  0xe6   : > { %13434 = vmatpush3.bf16.msra.mxu1 %v15076_v12  ;;  %13413 = vmatprep.subr.bf16.mxu0 %v15077_v13  ;;  %v15124_v12 = vld [vmem:[%s16429_s5 + $0x580] sm:$0xff]   ;;  %v15125_v13 = vld [vmem:[%s16429_s5 + $0x548] sm:$0xff]  }
  0xe7   : > { %13435 = vmatprep.subr.bf16.mxu1 %v15079_v15  ;;  %v15127_v15 = vld [vmem:[%s16429_s5 + $0x5c8] sm:$0xff]  }
  0xe9   : > { %13414 = vmatpush3.bf16.msra.mxu0 %v15078_v14  ;;  %v15126_v14 = vld [vmem:[%s16429_s5 + $0x508] sm:$0xff]  }
  0xea   : > { %13436 = vmatpush3.bf16.msra.mxu1 %v15080_v16  ;;  %13415 = vmatprep.subr.bf16.mxu0 %v15081_v17  ;;  %v15128_v16 = vld [vmem:[%s16429_s5 + $0x588] sm:$0xff]   ;;  %v15129_v17 = vld [vmem:[%s16429_s5 + $0x550] sm:$0xff]  }
  0xeb   : > { %13437 = vmatprep.subr.bf16.mxu1 %v15083_v19  ;;  %v15131_v19 = vld [vmem:[%s16429_s5 + $0x5d0] sm:$0xff]  }
  0xed   : > { %13416 = vmatpush3.bf16.msra.mxu0 %v15082_v18  ;;  %v15130_v18 = vld [vmem:[%s16429_s5 + $0x510] sm:$0xff]  }
  0xee   : > { %13438 = vmatpush3.bf16.msra.mxu1 %v15084_v20  ;;  %13417 = vmatprep.subr.bf16.mxu0 %v15085_v21  ;;  %v15132_v20 = vld [vmem:[%s16429_s5 + $0x590] sm:$0xff]   ;;  %v15133_v21 = vld [vmem:[%s16429_s5 + $0x558] sm:$0xff]  }
  0xef   : > { %13439 = vmatprep.subr.bf16.mxu1 %v15087_v23  ;;  %v15135_v23 = vld [vmem:[%s16429_s5 + $0x5d8] sm:$0xff]  }
  0xf1   : > { %13418 = vmatpush3.bf16.msra.mxu0 %v15086_v22  ;;  %v15134_v22 = vld [vmem:[%s16429_s5 + $0x518] sm:$0xff]  }
  0xf2   : > { %13440 = vmatpush3.bf16.msra.mxu1 %v15088_v26  ;;  %13447 = vmatprep.subr.bf16.mxu0 %v15089_v29  ;;  %v15138_v26 = vld [vmem:[%s16429_s5 + $0x520] sm:$0xff]   ;;  %v15141_v29 = vld [vmem:[%s16429_s5 + $0x568] sm:$0xff]  }
  0xf3   : > { %13469 = vmatprep.subr.bf16.mxu1 %v15091_v35  ;;  %v15147_v35 = vld [vmem:[%s16429_s5 + $0x5f0] sm:$0xff]  }
  0xf4   : > { %9501 = vmatmul.mubr.bf16.vlgmr.msra.gmra.mrb[12].mxu0 %v465_v28  ;;  %v15140_v28 = vld [vmem:[%s16429_s5 + $0x5a0] sm:$0xff]  }
  0xf5   : > { %13448 = vmatpush3.bf16.msra.mxu0 %v15090_v32  ;;  %9541 = vmatmul.mubr.bf16.vlgmr.msra.gmra.mrb[12].mxu1 %v467_v34  ;;  %v15144_v32 = vld [vmem:[%s16429_s5 + $0x5a8] sm:$0xff]   ;;  %v15146_v34 = vld [vmem:[%s16429_s5 + $0x530] sm:$0xff]  }
  0xf6   : > { %13470 = vmatpush3.bf16.msra.mxu1 %v15092_v36  ;;  %13449 = vmatprep.subr.bf16.mxu0 %v15093_v37  ;;  %v15148_v36 = vld [vmem:[%s16429_s5 + $0x5b0] sm:$0xff]   ;;  %v15149_v37 = vld [vmem:[%s16429_s5 + $0x578] sm:$0xff]  }
  0xf7   : > { %13471 = vmatprep.subr.bf16.mxu1 %v15095_v39  ;;  %9580 = vmatprep.mubr.bf16.mxu0 %v470_v1  ;;  %v15151_v39 = vld [vmem:[%s16429_s5 + $0x5f8] sm:$0xff]   ;;  %v15169_v1 = vld [vmem:[%s16429_s5 + $0x660] sm:$0xff]  }
  0xf8   : > { %9620 = vmatprep.mubr.bf16.mxu1 %v472_v7  ;;  %v15175_v7 = vld [vmem:[%s16429_s5 + $0x6e8] sm:$0xff]  }
  0xf9   : > { %13450 = vmatpush3.bf16.msra.mxu0 %v15094_v38  ;;  %v15150_v38 = vld [vmem:[%s16429_s5 + $0x538] sm:$0xff]  }
  0xfa   : > { %13472 = vmatpush3.bf16.msra.mxu1 %v15096_v40  ;;  %13451 = vmatprep.subr.bf16.mxu0 %v15097_v41  ;;  %v339_v40 = vld [vmem:[%s16453_s15 + $0xa8] sm:$0xff] }
  0xfb   : > { %13473 = vmatprep.subr.bf16.mxu1 %v15099_v43  ;;  %v474_v41 = vpack.c.bf16 %v339_v40, %v339_v40  ;;  %v338_v43 = vld [vmem:[%s16453_s15 + $0xa0] sm:$0xff] }
  0xfc   : > { %v15199_v40 = vld [vmem:[%s16429_s5 + $0x7d8] sm:$0xff]  }
  0xfd   : > { %13452 = vmatpush3.bf16.msra.mxu0 %v15098_v42  ;;  %v15152_v42 = vld [vmem:[%s16429_s5 + $0x5b8] sm:$0xff]  }
  0xfe   : > { %13474 = vmatpush3.bf16.msra.mxu1 %v15100_v44  ;;  %13453 = vmatprep.subr.bf16.mxu0 %v15101_v45  ;;  %v473_v44 = vpack.c.bf16 %v338_v43, %v338_v43  ;;  %v15153_v45 = vld [vmem:[%s16429_s5 + $0x640] sm:$0xff]  }
  0xff   : > { %13475 = vmatprep.subr.bf16.mxu1 %v15103_v47 }
 0x101   : > { %13454 = vmatpush3.bf16.msra.mxu0 %v15102_v46  ;;  %v341_v46 = vld [vmem:[%s16453_s15 + $0xb8] sm:$0xff] }
 0x102   : > { %13476 = vmatpush3.bf16.msra.mxu1 %v15104_v48  ;;  %13455 = vmatprep.subr.bf16.mxu0 %v15105_v49  ;;  %v476_v47 = vpack.c.bf16 %v341_v46, %v341_v46  ;;  %v15154_v48 = vld [vmem:[%s16429_s5 + $0x600] sm:$0xff]   ;;  %v340_v49 = vld [vmem:[%s16453_s15 + $0xb0] sm:$0xff] }
 0x103   : > { %13477 = vmatprep.subr.bf16.mxu1 %v15107_v51  ;;  %v15155_v51 = vld [vmem:[%s16429_s5 + $0x6c0] sm:$0xff]  }
 0x105   : > { %13456 = vmatpush3.bf16.msra.mxu0 %v15106_v50  ;;  %v475_v50 = vpack.c.bf16 %v340_v49, %v340_v49 }
 0x106   : > { %13478 = vmatpush3.bf16.msra.mxu1 %v15108_v52  ;;  %13457 = vmatprep.subr.bf16.mxu0 %v15109_v53  ;;  %v15156_v52 = vld [vmem:[%s16429_s5 + $0x680] sm:$0xff]   ;;  %v15157_v53 = vld [vmem:[%s16429_s5 + $0x648] sm:$0xff]  }
 0x107   : > { %13479 = vmatprep.subr.bf16.mxu1 %v15111_v55  ;;  %v15159_v55 = vld [vmem:[%s16429_s5 + $0x6c8] sm:$0xff]  }
 0x109   : > { %13458 = vmatpush3.bf16.msra.mxu0 %v15110_v54  ;;  %v15158_v54 = vld [vmem:[%s16429_s5 + $0x608] sm:$0xff]  }
 0x10a   : > { %13480 = vmatpush3.bf16.msra.mxu1 %v15112_v56  ;;  %13459 = vmatprep.subr.bf16.mxu0 %v15113_v57  ;;  %v15160_v56 = vld [vmem:[%s16429_s5 + $0x688] sm:$0xff]   ;;  %v15161_v57 = vld [vmem:[%s16429_s5 + $0x650] sm:$0xff]  }
 0x10b   : > { %13481 = vmatprep.subr.bf16.mxu1 %v15115_v59  ;;  %v15163_v59 = vld [vmem:[%s16429_s5 + $0x6d0] sm:$0xff]  }
 0x10d   : > { %13460 = vmatpush3.bf16.msra.mxu0 %v15114_v58  ;;  %v15162_v58 = vld [vmem:[%s16429_s5 + $0x610] sm:$0xff]  }
 0x10e   : > { %13482 = vmatpush3.bf16.msra.mxu1 %v15116_v60  ;;  %13461 = vmatprep.subr.bf16.mxu0 %v15117_v61  ;;  %v15164_v60 = vld [vmem:[%s16429_s5 + $0x690] sm:$0xff]   ;;  %v15165_v61 = vld [vmem:[%s16429_s5 + $0x658] sm:$0xff]  }
 0x10f   : > { %13483 = vmatprep.subr.bf16.mxu1 %v15119_v63  ;;  %v15167_v63 = vld [vmem:[%s16429_s5 + $0x6d8] sm:$0xff]  }
 0x111   : > { %13462 = vmatpush3.bf16.msra.mxu0 %v15118_v62  ;;  %v15166_v62 = vld [vmem:[%s16429_s5 + $0x618] sm:$0xff]  }
 0x112   : > { %13484 = vmatpush3.bf16.msra.mxu1 %v15120_v2  ;;  %13491 = vmatprep.subr.bf16.mxu0 %v15121_v5  ;;  %v15170_v2 = vld [vmem:[%s16429_s5 + $0x620] sm:$0xff]   ;;  %v15173_v5 = vld [vmem:[%s16429_s5 + $0x668] sm:$0xff]  }
 0x113   : > { %13513 = vmatprep.subr.bf16.mxu1 %v15123_v11  ;;  %v15179_v11 = vld [vmem:[%s16429_s5 + $0x6f0] sm:$0xff]  }
 0x114   : > { %9581 = vmatmul.mubr.bf16.vlgmr.msra.gmra.mrb[16].mxu0 %v469_v4  ;;  %v15172_v4 = vld [vmem:[%s16429_s5 + $0x6a0] sm:$0xff]  }
 0x115   : > { %13492 = vmatpush3.bf16.msra.mxu0 %v15122_v8  ;;  %9621 = vmatmul.mubr.bf16.vlgmr.msra.gmra.mrb[16].mxu1 %v471_v10  ;;  %v15176_v8 = vld [vmem:[%s16429_s5 + $0x6a8] sm:$0xff]   ;;  %v15178_v10 = vld [vmem:[%s16429_s5 + $0x630] sm:$0xff]  }
 0x116   : > { %13514 = vmatpush3.bf16.msra.mxu1 %v15124_v12  ;;  %13493 = vmatprep.subr.bf16.mxu0 %v15125_v13  ;;  %v15180_v12 = vld [vmem:[%s16429_s5 + $0x6b0] sm:$0xff]   ;;  %v15181_v13 = vld [vmem:[%s16429_s5 + $0x678] sm:$0xff]  }
 0x117   : > { %13515 = vmatprep.subr.bf16.mxu1 %v15127_v15  ;;  %9660 = vmatprep.mubr.bf16.mxu0 %v474_v41  ;;  %v15183_v15 = vld [vmem:[%s16429_s5 + $0x6f8] sm:$0xff]  }
 0x118   : > { %9700 = vmatprep.mubr.bf16.mxu1 %v476_v47  ;;  %v15202_v47 = vld [vmem:[%s16429_s5 + $0x720] sm:$0xff]  }
 0x119   : > { %13494 = vmatpush3.bf16.msra.mxu0 %v15126_v14  ;;  %v15182_v14 = vld [vmem:[%s16429_s5 + $0x638] sm:$0xff]  }
 0x11a   : > { %13516 = vmatpush3.bf16.msra.mxu1 %v15128_v16  ;;  %13495 = vmatprep.subr.bf16.mxu0 %v15129_v17  ;;  %v343_v16 = vld [vmem:[%s16453_s15 + $0xc8] sm:$0xff] }
 0x11b   : > { %13517 = vmatprep.subr.bf16.mxu1 %v15131_v19  ;;  %v478_v17 = vpack.c.bf16 %v343_v16, %v343_v16  ;;  %v342_v19 = vld [vmem:[%s16453_s15 + $0xc0] sm:$0xff]  ;;  %v15221_v16 = vld [vmem:[%s16429_s5 + $0x848] sm:$0xff]  }
 0x11d   : > { %13496 = vmatpush3.bf16.msra.mxu0 %v15130_v18  ;;  %v15184_v18 = vld [vmem:[%s16429_s5 + $0x6b8] sm:$0xff]  }
 0x11e   : > { %13518 = vmatpush3.bf16.msra.mxu1 %v15132_v20  ;;  %13497 = vmatprep.subr.bf16.mxu0 %v15133_v21  ;;  %v477_v20 = vpack.c.bf16 %v342_v19, %v342_v19  ;;  %v15185_v21 = vld [vmem:[%s16429_s5 + $0x740] sm:$0xff]   ;;  %v15224_v19 = vld [vmem:[%s16429_s5 + $0x888] sm:$0xff]  }
 0x11f   : > { %13519 = vmatprep.subr.bf16.mxu1 %v15135_v23 }
 0x121   : > { %13498 = vmatpush3.bf16.msra.mxu0 %v15134_v22  ;;  %v345_v22 = vld [vmem:[%s16453_s15 + $0xd8] sm:$0xff] }
 0x122   : > { %13520 = vmatpush3.bf16.msra.mxu1 %v15136_v24  ;;  %13499 = vmatprep.subr.bf16.mxu0 %v15137_v25  ;;  %v480_v23 = vpack.c.bf16 %v345_v22, %v345_v22  ;;  %v15186_v24 = vld [vmem:[%s16429_s5 + $0x700] sm:$0xff]   ;;  %v344_v25 = vld [vmem:[%s16453_s15 + $0xd0] sm:$0xff]  ;;  %v15227_v22 = vld [vmem:[%s16429_s5 + $0x8d0] sm:$0xff]  }
 0x123   : > { %13521 = vmatprep.subr.bf16.mxu1 %v15139_v27  ;;  %v15187_v27 = vld [vmem:[%s16429_s5 + $0x7c0] sm:$0xff]  }
 0x125   : > { %13500 = vmatpush3.bf16.msra.mxu0 %v15138_v26  ;;  %v479_v26 = vpack.c.bf16 %v344_v25, %v344_v25  ;;  %v15230_v25 = vld [vmem:[%s16429_s5 + $0x818] sm:$0xff]  }
 0x126   : > { %13522 = vmatpush3.bf16.msra.mxu1 %v15140_v28  ;;  %13501 = vmatprep.subr.bf16.mxu0 %v15141_v29  ;;  %v15188_v28 = vld [vmem:[%s16429_s5 + $0x780] sm:$0xff]   ;;  %v15189_v29 = vld [vmem:[%s16429_s5 + $0x748] sm:$0xff]  }
 0x127   : > { %13523 = vmatprep.subr.bf16.mxu1 %v15143_v31  ;;  %v15191_v31 = vld [vmem:[%s16429_s5 + $0x7c8] sm:$0xff]  }
 0x129   : > { %13502 = vmatpush3.bf16.msra.mxu0 %v15142_v30  ;;  %v15190_v30 = vld [vmem:[%s16429_s5 + $0x708] sm:$0xff]  }
 0x12a   : > { %13524 = vmatpush3.bf16.msra.mxu1 %v15144_v32  ;;  %13503 = vmatprep.subr.bf16.mxu0 %v15145_v33  ;;  %v15192_v32 = vld [vmem:[%s16429_s5 + $0x788] sm:$0xff]   ;;  %v15193_v33 = vld [vmem:[%s16429_s5 + $0x750] sm:$0xff]  }
 0x12b   : > { %13525 = vmatprep.subr.bf16.mxu1 %v15147_v35  ;;  %v15195_v35 = vld [vmem:[%s16429_s5 + $0x7d0] sm:$0xff]  }
 0x12d   : > { %13504 = vmatpush3.bf16.msra.mxu0 %v15146_v34  ;;  %v15194_v34 = vld [vmem:[%s16429_s5 + $0x710] sm:$0xff]  }
 0x12e   : > { %13526 = vmatpush3.bf16.msra.mxu1 %v15148_v36  ;;  %13505 = vmatprep.subr.bf16.mxu0 %v15149_v37  ;;  %v15196_v36 = vld [vmem:[%s16429_s5 + $0x790] sm:$0xff]   ;;  %v15197_v37 = vld [vmem:[%s16429_s5 + $0x758] sm:$0xff]  }
 0x12f   : > { %13527 = vmatprep.subr.bf16.mxu1 %v15151_v39 }
 0x131   : > { %13506 = vmatpush3.bf16.msra.mxu0 %v15150_v38  ;;  %v15198_v38 = vld [vmem:[%s16429_s5 + $0x718] sm:$0xff]  }
 0x132   : > { %13528 = vmatpush3.bf16.msra.mxu1 %v15152_v42  ;;  %13535 = vmatprep.subr.bf16.mxu0 %v15153_v45  ;;  %v15200_v42 = vld [vmem:[%s16429_s5 + $0x798] sm:$0xff]  }
 0x133   : > { %13557 = vmatprep.subr.bf16.mxu1 %v15155_v51 }
 0x134   : > { %9661 = vmatmul.mubr.bf16.vlgmr.msra.gmra.mrb[20].mxu0 %v473_v44  ;;  %v15201_v44 = vld [vmem:[%s16429_s5 + $0x760] sm:$0xff]  }
 0x135   : > { %13536 = vmatpush3.bf16.msra.mxu0 %v15154_v48  ;;  %9701 = vmatmul.mubr.bf16.vlgmr.msra.gmra.mrb[20].mxu1 %v475_v50  ;;  %v15203_v50 = vld [vmem:[%s16429_s5 + $0x7e0] sm:$0xff]  }
 0x136   : > { %13558 = vmatpush3.bf16.msra.mxu1 %v15156_v52  ;;  %13537 = vmatprep.subr.bf16.mxu0 %v15157_v53  ;;  %v15204_v52 = vld [vmem:[%s16429_s5 + $0x7a0] sm:$0xff]  }
 0x137   : > { %13559 = vmatprep.subr.bf16.mxu1 %v15159_v55  ;;  %9740 = vmatprep.mubr.bf16.mxu0 %v478_v17  ;;  %v15205_v55 = vld [vmem:[%s16429_s5 + $0x768] sm:$0xff]  }
 0x138   : > { %9780 = vmatprep.mubr.bf16.mxu1 %v480_v23  ;;  %v15222_v17 = vld [vmem:[%s16429_s5 + $0x808] sm:$0xff]   ;;  %v15228_v23 = vld [vmem:[%s16429_s5 + $0x890] sm:$0xff]  }
 0x139   : > { %13538 = vmatpush3.bf16.msra.mxu0 %v15158_v54 }
 0x13a   : > { %13560 = vmatpush3.bf16.msra.mxu1 %v15160_v56  ;;  %13539 = vmatprep.subr.bf16.mxu0 %v15161_v57  ;;  %v15206_v57 = vld [vmem:[%s16429_s5 + $0x728] sm:$0xff]  }
 0x13b   : > { %13561 = vmatprep.subr.bf16.mxu1 %v15163_v59  ;;  %v15208_v59 = vld [vmem:[%s16429_s5 + $0x7a8] sm:$0xff]  }
 0x13d   : > { %13540 = vmatpush3.bf16.msra.mxu0 %v15162_v58  ;;  %v15207_v58 = vld [vmem:[%s16429_s5 + $0x7e8] sm:$0xff]  }
 0x13e   : > { %13562 = vmatpush3.bf16.msra.mxu1 %v15164_v60  ;;  %13541 = vmatprep.subr.bf16.mxu0 %v15165_v61  ;;  %v15209_v60 = vld [vmem:[%s16429_s5 + $0x770] sm:$0xff]  }
 0x13f   : > { %13563 = vmatprep.subr.bf16.mxu1 %v15167_v63  ;;  %v15210_v61 = vld [vmem:[%s16429_s5 + $0x730] sm:$0xff]  }
 0x140   : > { %v15212_v63 = vld [vmem:[%s16429_s5 + $0x7b0] sm:$0xff]  }
 0x141   : > { %13542 = vmatpush3.bf16.msra.mxu0 %v15166_v62  ;;  %v15211_v62 = vld [vmem:[%s16429_s5 + $0x7f0] sm:$0xff]  }
 0x142   : > { %13564 = vmatpush3.bf16.msra.mxu1 %v15168_v0  ;;  %13543 = vmatprep.subr.bf16.mxu0 %v15169_v1  ;;  %v15213_v0 = vld [vmem:[%s16429_s5 + $0x778] sm:$0xff]  }
 0x143   : > { %13565 = vmatprep.subr.bf16.mxu1 %v15171_v3  ;;  %v15214_v1 = vld [vmem:[%s16429_s5 + $0x738] sm:$0xff]   ;;  %v347_v3 = vld [vmem:[%s16453_s15 + $0xe8] sm:$0xff] }
 0x145   : > { %13544 = vmatpush3.bf16.msra.mxu0 %v15170_v2  ;;  %v15215_v2 = vld [vmem:[%s16429_s5 + $0x7f8] sm:$0xff]  }
 0x146   : > { %13566 = vmatpush3.bf16.msra.mxu1 %v15172_v4  ;;  %13545 = vmatprep.subr.bf16.mxu0 %v15173_v5  ;;  %v482_v4 = vpack.c.bf16 %v347_v3, %v347_v3  ;;  %v15216_v5 = vld [vmem:[%s16429_s5 + $0x7b8] sm:$0xff]   ;;  %v15252_v3 = vld [vmem:[%s16429_s5 + $0x980] sm:$0xff]  }
 0x147   : > { %13567 = vmatprep.subr.bf16.mxu1 %v15175_v7 }
 0x149   : > { %13546 = vmatpush3.bf16.msra.mxu0 %v15174_v6  ;;  %v346_v6 = vld [vmem:[%s16453_s15 + $0xe0] sm:$0xff] }
 0x14a   : > { %13568 = vmatpush3.bf16.msra.mxu1 %v15176_v8  ;;  %13547 = vmatprep.subr.bf16.mxu0 %v15177_v9  ;;  %v481_v7 = vpack.c.bf16 %v346_v6, %v346_v6  ;;  %v15217_v8 = vld [vmem:[%s16429_s5 + $0x840] sm:$0xff]   ;;  %v349_v9 = vld [vmem:[%s16453_s15 + $0xf8] sm:$0xff]  ;;  %v15255_v6 = vld [vmem:[%s16429_s5 + $0x9c8] sm:$0xff]  }
 0x14b   : > { %13569 = vmatprep.subr.bf16.mxu1 %v15179_v11  ;;  %v15218_v11 = vld [vmem:[%s16429_s5 + $0x800] sm:$0xff]  }
 0x14d   : > { %13548 = vmatpush3.bf16.msra.mxu0 %v15178_v10  ;;  %v484_v10 = vpack.c.bf16 %v349_v9, %v349_v9  ;;  %v15258_v9 = vld [vmem:[%s16429_s5 + $0x910] sm:$0xff]  }
 0x14e   : > { %13570 = vmatpush3.bf16.msra.mxu1 %v15180_v12  ;;  %13549 = vmatprep.subr.bf16.mxu0 %v15181_v13  ;;  %v348_v12 = vld [vmem:[%s16453_s15 + $0xf0] sm:$0xff] }
 0x14f   : > { %13571 = vmatprep.subr.bf16.mxu1 %v15183_v15  ;;  %v483_v13 = vpack.c.bf16 %v348_v12, %v348_v12  ;;  %v15220_v15 = vld [vmem:[%s16429_s5 + $0x880] sm:$0xff]   ;;  %v15261_v12 = vld [vmem:[%s16429_s5 + $0x958] sm:$0xff]  }
 0x151   : > { %13550 = vmatpush3.bf16.msra.mxu0 %v15182_v14  ;;  %v15219_v14 = vld [vmem:[%s16429_s5 + $0x8c0] sm:$0xff]  }
 0x152   : > { %13572 = vmatpush3.bf16.msra.mxu1 %v15184_v18  ;;  %13579 = vmatprep.subr.bf16.mxu0 %v15185_v21  ;;  %v15223_v18 = vld [vmem:[%s16429_s5 + $0x8c8] sm:$0xff]   ;;  %v15226_v21 = vld [vmem:[%s16429_s5 + $0x810] sm:$0xff]  }
 0x153   : > { %13601 = vmatprep.subr.bf16.mxu1 %v15187_v27  ;;  %v15231_v27 = vld [vmem:[%s16429_s5 + $0x8d8] sm:$0xff]  }
 0x154   : > { %9741 = vmatmul.mubr.bf16.vlgmr.msra.gmra.mrb[24].mxu0 %v477_v20  ;;  %v15225_v20 = vld [vmem:[%s16429_s5 + $0x850] sm:$0xff]  }
 0x155   : > { %13580 = vmatpush3.bf16.msra.mxu0 %v15186_v24  ;;  %9781 = vmatmul.mubr.bf16.vlgmr.msra.gmra.mrb[24].mxu1 %v479_v26  ;;  %v15229_v24 = vld [vmem:[%s16429_s5 + $0x858] sm:$0xff]  }
 0x156   : > { %13602 = vmatpush3.bf16.msra.mxu1 %v15188_v28  ;;  %13581 = vmatprep.subr.bf16.mxu0 %v15189_v29  ;;  %v15232_v29 = vld [vmem:[%s16429_s5 + $0x898] sm:$0xff]  }
 0x157   : > { %13603 = vmatprep.subr.bf16.mxu1 %v15191_v31  ;;  %9820 = vmatprep.mubr.bf16.mxu0 %v482_v4  ;;  %v15253_v4 = vld [vmem:[%s16429_s5 + $0x948] sm:$0xff]  }
 0x158   : > { %9860 = vmatprep.mubr.bf16.mxu1 %v484_v10  ;;  %v15259_v10 = vld [vmem:[%s16429_s5 + $0x9d0] sm:$0xff]  }
 0x159   : > { %13582 = vmatpush3.bf16.msra.mxu0 %v15190_v30 }
 0x15a   : > { %13604 = vmatpush3.bf16.msra.mxu1 %v15192_v32  ;;  %13583 = vmatprep.subr.bf16.mxu0 %v15193_v33  ;;  %v15233_v32 = vld [vmem:[%s16429_s5 + $0x860] sm:$0xff]  }
 0x15b   : > { %13605 = vmatprep.subr.bf16.mxu1 %v15195_v35 }
 0x15d   : > { %13584 = vmatpush3.bf16.msra.mxu0 %v15194_v34  ;;  %v15234_v34 = vld [vmem:[%s16429_s5 + $0x820] sm:$0xff]  }
 0x15e   : > { %13606 = vmatpush3.bf16.msra.mxu1 %v15196_v36  ;;  %13585 = vmatprep.subr.bf16.mxu0 %v15197_v37  ;;  %v15235_v37 = vld [vmem:[%s16429_s5 + $0x8e0] sm:$0xff]  }
 0x15f   : > { %13607 = vmatprep.subr.bf16.mxu1 %v15199_v40 }
 0x161   : > { %13586 = vmatpush3.bf16.msra.mxu0 %v15198_v38 }
 0x162   : > { %13608 = vmatpush3.bf16.msra.mxu1 %v15200_v42  ;;  %13587 = vmatprep.subr.bf16.mxu0 %v15201_v44  ;;  %v15237_v42 = vld [vmem:[%s16429_s5 + $0x868] sm:$0xff]  }
 0x163   : > { %13609 = vmatprep.subr.bf16.mxu1 %v15203_v50  ;;  %v15238_v44 = vld [vmem:[%s16429_s5 + $0x828] sm:$0xff]   ;;  %v15243_v50 = vld [vmem:[%s16429_s5 + $0x8f0] sm:$0xff]  }
 0x165   : > { %13588 = vmatpush3.bf16.msra.mxu0 %v15202_v47  ;;  %v15240_v47 = vld [vmem:[%s16429_s5 + $0x8a8] sm:$0xff]  }
 0x166   : > { %13610 = vmatpush3.bf16.msra.mxu1 %v15204_v52  ;;  %13589 = vmatprep.subr.bf16.mxu0 %v15205_v55  ;;  %v15245_v52 = vld [vmem:[%s16429_s5 + $0x878] sm:$0xff]   ;;  %v351_v55 = vld [vmem:[%s16453_s15 + $0x108] sm:$0xff] }
 0x167   : > { %v13287_v39 = vpop.f32.mrb[0].mxu0  ;;  %13611 = vmatprep.subr.bf16.mxu1 %v15207_v58  ;;  %v350_v58 = vld [vmem:[%s16453_s15 + $0x100] sm:$0xff] }
 0x168   : > { %v13309_v41 = vpop.f32.mrb[0].mxu1  ;;  %v13288_v43 = vpop.f32.mrb[1].mxu0 }
 0x169   : > { %v13289_v45 = vadd.f32 %v13288_v43, %v13287_v39  ;;  %v13310_v46 = vpop.f32.mrb[1].mxu1  ;;  %v13290_v49 = vpop.f32.mrb[2].mxu0  ;;  %13590 = vmatpush3.bf16.msra.mxu0 %v15206_v57  ;;  %v15236_v39 = vld [vmem:[%s16429_s5 + $0x8a0] sm:$0xff]   ;;  %v15248_v57 = vld [vmem:[%s16429_s5 + $0x8b8] sm:$0xff]  }
 0x16a   : > { %v13311_v48 = vadd.f32 %v13310_v46, %v13309_v41  ;;  %v13291_v51 = vpop.f32.mrb[3].mxu0  ;;  %v13312_v54 = vpop.f32.mrb[2].mxu1  ;;  %13612 = vmatpush3.bf16.msra.mxu1 %v15208_v59  ;;  %13591 = vmatprep.subr.bf16.mxu0 %v15209_v60  ;;  %v15239_v46 = vld [vmem:[%s16429_s5 + $0x8e8] sm:$0xff]   ;;  %v15242_v49 = vld [vmem:[%s16429_s5 + $0x830] sm:$0xff]   ;;  %v485_v59 = vpack.c.bf16 %v350_v58, %v350_v58  ;;  %v15249_v60 = vld [vmem:[%s16429_s5 + $0x940] sm:$0xff]  }
 0x16b   : > { %v13313_v56 = vpop.f32.mrb[3].mxu1  ;;  %13613 = vmatprep.subr.bf16.mxu1 %v15211_v62  ;;  %v15244_v51 = vld [vmem:[%s16429_s5 + $0x8b0] sm:$0xff]   ;;  %v15247_v54 = vld [vmem:[%s16429_s5 + $0x8f8] sm:$0xff]   ;;  %v15287_v58 = vld [vmem:[%s16429_s5 + $0xac8] sm:$0xff]  }
 0x16c   : > { %v16734_v53 = vadd.f32 %v13311_v48, %v13289_v45  ;;  %v15241_v48 = vld [vmem:[%s16429_s5 + $0x870] sm:$0xff]   ;;  %v486_v56 = vpack.c.bf16 %v351_v55, %v351_v55  ;;  %v15284_v55 = vld [vmem:[%s16429_s5 + $0xa80] sm:$0xff]  }
 0x16d   : > { %13592 = vmatpush3.bf16.msra.mxu0 %v15210_v61  ;;  %v353_v61 = vld [vmem:[%s16453_s15 + $0x118] sm:$0xff] }
 0x16e   : > { %13614 = vmatpush3.bf16.msra.mxu1 %v15212_v63  ;;  %13593 = vmatprep.subr.bf16.mxu0 %v15213_v0  ;;  %v488_v62 = vpack.c.bf16 %v353_v61, %v353_v61  ;;  %v15250_v63 = vld [vmem:[%s16429_s5 + $0x900] sm:$0xff]   ;;  %v352_v0 = vld [vmem:[%s16453_s15 + $0x110] sm:$0xff]  ;;  %v15290_v61 = vld [vmem:[%s16429_s5 + $0xa10] sm:$0xff]  }
 0x16f   : > { %13615 = vmatprep.subr.bf16.mxu1 %v15215_v2  ;;  %v15251_v2 = vld [vmem:[%s16429_s5 + $0x9c0] sm:$0xff]  }
 0x171   : > { %13594 = vmatpush3.bf16.msra.mxu0 %v15214_v1  ;;  %v487_v1 = vpack.c.bf16 %v352_v0, %v352_v0  ;;  %v15293_v0 = vld [vmem:[%s16429_s5 + $0xa58] sm:$0xff]  }
 0x172   : > { %13616 = vmatpush3.bf16.msra.mxu1 %v15216_v5  ;;  %13623 = vmatprep.subr.bf16.mxu0 %v15217_v8  ;;  %v15254_v5 = vld [vmem:[%s16429_s5 + $0x908] sm:$0xff]   ;;  %v15257_v8 = vld [vmem:[%s16429_s5 + $0x950] sm:$0xff]  }
 0x173   : > { %13645 = vmatprep.subr.bf16.mxu1 %v15219_v14 }
 0x174   : > { %9821 = vmatmul.mubr.bf16.vlgmr.msra.gmra.mrb[28].mxu0 %v481_v7  ;;  %v15256_v7 = vld [vmem:[%s16429_s5 + $0x988] sm:$0xff]  }
 0x175   : > { %13624 = vmatpush3.bf16.msra.mxu0 %v15218_v11  ;;  %9861 = vmatmul.mubr.bf16.vlgmr.msra.gmra.mrb[28].mxu1 %v483_v13  ;;  %v15260_v11 = vld [vmem:[%s16429_s5 + $0x990] sm:$0xff]   ;;  %v15262_v13 = vld [vmem:[%s16429_s5 + $0x918] sm:$0xff]  }
 0x176   : > { %13646 = vmatpush3.bf16.msra.mxu1 %v15220_v15  ;;  %13625 = vmatprep.subr.bf16.mxu0 %v15221_v16  ;;  %v15263_v15 = vld [vmem:[%s16429_s5 + $0x9d8] sm:$0xff]  }
 0x177   : > { %13647 = vmatprep.subr.bf16.mxu1 %v15223_v18  ;;  %9900 = vmatprep.mubr.bf16.mxu0 %v486_v56  ;;  %v15285_v56 = vld [vmem:[%s16429_s5 + $0xa48] sm:$0xff]  }
 0x178   : > { %9940 = vmatprep.mubr.bf16.mxu1 %v488_v62  ;;  %v15291_v62 = vld [vmem:[%s16429_s5 + $0xad0] sm:$0xff]  }
 0x179   : > { %13626 = vmatpush3.bf16.msra.mxu0 %v15222_v17  ;;  %v15264_v17 = vld [vmem:[%s16429_s5 + $0x998] sm:$0xff]  }
 0x17a   : > { %13648 = vmatpush3.bf16.msra.mxu1 %v15224_v19  ;;  %13627 = vmatprep.subr.bf16.mxu0 %v15225_v20  ;;  %v15265_v20 = vld [vmem:[%s16429_s5 + $0x960] sm:$0xff]  }
 0x17b   : > { %13649 = vmatprep.subr.bf16.mxu1 %v15227_v22  ;;  %v15266_v22 = vld [vmem:[%s16429_s5 + $0x920] sm:$0xff]  }
 0x17d   : > { %13628 = vmatpush3.bf16.msra.mxu0 %v15226_v21 }
 0x17e   : > { %13650 = vmatpush3.bf16.msra.mxu1 %v15228_v23  ;;  %13629 = vmatprep.subr.bf16.mxu0 %v15229_v24 }
 0x17f   : > { %13651 = vmatprep.subr.bf16.mxu1 %v15231_v27  ;;  %v15268_v27 = vld [vmem:[%s16429_s5 + $0x9a0] sm:$0xff]  }
 0x181   : > { %13630 = vmatpush3.bf16.msra.mxu0 %v15230_v25  ;;  %v15267_v25 = vld [vmem:[%s16429_s5 + $0x9e0] sm:$0xff]  }
 0x182   : > { %13652 = vmatpush3.bf16.msra.mxu1 %v15232_v29  ;;  %13631 = vmatprep.subr.bf16.mxu0 %v15233_v32  ;;  %v15270_v32 = vld [vmem:[%s16429_s5 + $0x928] sm:$0xff]  }
 0x183   : > { %13653 = vmatprep.subr.bf16.mxu1 %v15235_v37  ;;  %v15274_v37 = vld [vmem:[%s16429_s5 + $0x930] sm:$0xff]  }
 0x185   : > { %13632 = vmatpush3.bf16.msra.mxu0 %v15234_v34  ;;  %v15271_v34 = vld [vmem:[%s16429_s5 + $0x9e8] sm:$0xff]  }
 0x186   : > { %13654 = vmatpush3.bf16.msra.mxu1 %v15236_v39  ;;  %13633 = vmatprep.subr.bf16.mxu0 %v15237_v42  ;;  %v15276_v39 = vld [vmem:[%s16429_s5 + $0x9b0] sm:$0xff]   ;;  %v15279_v42 = vld [vmem:[%s16429_s5 + $0x9f8] sm:$0xff]  }
 0x187   : > { %v13331_v26 = vpop.f32.mrb[4].mxu0  ;;  %13655 = vmatprep.subr.bf16.mxu1 %v15239_v46  ;;  %v354_v46 = vld [vmem:[%s16453_s15 + $0x120] sm:$0xff] }
 0x188   : > { %v13332_v28 = vpop.f32.mrb[5].mxu0  ;;  %v13353_v33 = vpop.f32.mrb[4].mxu1 }
 0x189   : > { %v13333_v30 = vadd.f32 %v13332_v28, %v13331_v26  ;;  %v13334_v31 = vpop.f32.mrb[6].mxu0  ;;  %v13354_v38 = vpop.f32.mrb[5].mxu1  ;;  %13634 = vmatpush3.bf16.msra.mxu0 %v15238_v44 }
 0x18a   : > { %v13335_v36 = vpop.f32.mrb[7].mxu0  ;;  %v13355_v40 = vadd.f32 %v13354_v38, %v13353_v33  ;;  %v13356_v41 = vpop.f32.mrb[6].mxu1  ;;  %13656 = vmatpush3.bf16.msra.mxu1 %v15240_v47  ;;  %13635 = vmatprep.subr.bf16.mxu0 %v15241_v48  ;;  %v15275_v38 = vld [vmem:[%s16429_s5 + $0x9f0] sm:$0xff]   ;;  %v489_v47 = vpack.c.bf16 %v354_v46, %v354_v46  ;;  %v15281_v48 = vld [vmem:[%s16429_s5 + $0xa40] sm:$0xff]   ;;  %v15319_v46 = vld [vmem:[%s16429_s5 + $0xbc8] sm:$0xff]  }
 0x18b   : > { %v9343_v35 = vadd.f32 %v13333_v30, %v16734_v53  ;;  %v13357_v43 = vpop.f32.mrb[7].mxu1  ;;  %13657 = vmatprep.subr.bf16.mxu1 %v15243_v50  ;;  %v15246_v53 = vld [vmem:[%s16429_s5 + $0x838] sm:$0xff]   ;;  %v15269_v30 = vld [vmem:[%s16429_s5 + $0x968] sm:$0xff]   ;;  %v15273_v36 = vld [vmem:[%s16429_s5 + $0x970] sm:$0xff]  }
 0x18c   : > { %v15278_v41 = vld [vmem:[%s16429_s5 + $0x938] sm:$0xff]   ;;  %v355_v43 = vld [vmem:[%s16453_s15 + $0x128] sm:$0xff] }
 0x18d   : > { %v16775_v45 = vadd.f32 %v13355_v40, %v9343_v35  ;;  %13636 = vmatpush3.bf16.msra.mxu0 %v15242_v49  ;;  %v15272_v35 = vld [vmem:[%s16429_s5 + $0x9a8] sm:$0xff]   ;;  %v15277_v40 = vld [vmem:[%s16429_s5 + $0x978] sm:$0xff]   ;;  %v490_v44 = vpack.c.bf16 %v355_v43, %v355_v43  ;;  %v357_v49 = vld [vmem:[%s16453_s15 + $0x138] sm:$0xff] }
 0x18e   : > { %13658 = vmatpush3.bf16.msra.mxu1 %v15244_v51  ;;  %13637 = vmatprep.subr.bf16.mxu0 %v15245_v52  ;;  %v492_v50 = vpack.c.bf16 %v357_v49, %v357_v49  ;;  %v15282_v51 = vld [vmem:[%s16429_s5 + $0xa00] sm:$0xff]   ;;  %v356_v52 = vld [vmem:[%s16453_s15 + $0x130] sm:$0xff]  ;;  %v15322_v49 = vld [vmem:[%s16429_s5 + $0xb10] sm:$0xff]  }
 0x18f   : > { %13659 = vmatprep.subr.bf16.mxu1 %v15247_v54  ;;  %v15283_v54 = vld [vmem:[%s16429_s5 + $0xac0] sm:$0xff]  }
 0x190   : > { %v15316_v43 = vld [vmem:[%s16429_s5 + $0xb80] sm:$0xff]  }
 0x191   : > { %13638 = vmatpush3.bf16.msra.mxu0 %v15246_v53  ;;  %v491_v53 = vpack.c.bf16 %v356_v52, %v356_v52  ;;  %v15325_v52 = vld [vmem:[%s16429_s5 + $0xb58] sm:$0xff]  }
 0x192   : > { %13660 = vmatpush3.bf16.msra.mxu1 %v15248_v57  ;;  %13667 = vmatprep.subr.bf16.mxu0 %v15249_v60  ;;  %v15286_v57 = vld [vmem:[%s16429_s5 + $0xa08] sm:$0xff]   ;;  %v15289_v60 = vld [vmem:[%s16429_s5 + $0xa50] sm:$0xff]  }
 0x193   : > { %13689 = vmatprep.subr.bf16.mxu1 %v15251_v2  ;;  %v15294_v2 = vld [vmem:[%s16429_s5 + $0xa18] sm:$0xff]  }
 0x194   : > { %9901 = vmatmul.mubr.bf16.vlgmr.msra.gmra.mrb[32].mxu0 %v485_v59  ;;  %v15288_v59 = vld [vmem:[%s16429_s5 + $0xa88] sm:$0xff]  }
 0x195   : > { %13668 = vmatpush3.bf16.msra.mxu0 %v15250_v63  ;;  %9941 = vmatmul.mubr.bf16.vlgmr.msra.gmra.mrb[32].mxu1 %v487_v1  ;;  %v15292_v63 = vld [vmem:[%s16429_s5 + $0xa90] sm:$0xff]  }
 0x196   : > { %13690 = vmatpush3.bf16.msra.mxu1 %v15252_v3  ;;  %13669 = vmatprep.subr.bf16.mxu0 %v15253_v4  ;;  %v15295_v4 = vld [vmem:[%s16429_s5 + $0xad8] sm:$0xff]  }
 0x197   : > { %13691 = vmatprep.subr.bf16.mxu1 %v15255_v6  ;;  %9980 = vmatprep.mubr.bf16.mxu0 %v490_v44  ;;  %v15317_v44 = vld [vmem:[%s16429_s5 + $0xb48] sm:$0xff]  }
 0x198   : > { %10020 = vmatprep.mubr.bf16.mxu1 %v492_v50  ;;  %v15323_v50 = vld [vmem:[%s16429_s5 + $0xbd0] sm:$0xff]  }
 0x199   : > { %13670 = vmatpush3.bf16.msra.mxu0 %v15254_v5 }
 0x19a   : > { %13692 = vmatpush3.bf16.msra.mxu1 %v15256_v7  ;;  %13671 = vmatprep.subr.bf16.mxu0 %v15257_v8  ;;  %v15296_v7 = vld [vmem:[%s16429_s5 + $0xa98] sm:$0xff]  }
 0x19b   : > { %13693 = vmatprep.subr.bf16.mxu1 %v15259_v10 }
 0x19d   : > { %13672 = vmatpush3.bf16.msra.mxu0 %v15258_v9  ;;  %v15297_v9 = vld [vmem:[%s16429_s5 + $0xa60] sm:$0xff]  }
 0x19e   : > { %13694 = vmatpush3.bf16.msra.mxu1 %v15260_v11  ;;  %13673 = vmatprep.subr.bf16.mxu0 %v15261_v12  ;;  %v15298_v12 = vld [vmem:[%s16429_s5 + $0xa20] sm:$0xff]  }
 0x19f   : > { %13695 = vmatprep.subr.bf16.mxu1 %v15263_v15 }
 0x1a1   : > { %13674 = vmatpush3.bf16.msra.mxu0 %v15262_v13 }
 0x1a2   : > { %13696 = vmatpush3.bf16.msra.mxu1 %v15264_v17  ;;  %13675 = vmatprep.subr.bf16.mxu0 %v15265_v20  ;;  %v15300_v17 = vld [vmem:[%s16429_s5 + $0xaa0] sm:$0xff]  }
 0x1a3   : > { %13697 = vmatprep.subr.bf16.mxu1 %v15267_v25  ;;  %v15306_v25 = vld [vmem:[%s16429_s5 + $0xa30] sm:$0xff]  }
 0x1a5   : > { %13676 = vmatpush3.bf16.msra.mxu0 %v15266_v22  ;;  %v15303_v22 = vld [vmem:[%s16429_s5 + $0xae8] sm:$0xff]  }
 0x1a6   : > { %13698 = vmatpush3.bf16.msra.mxu1 %v15268_v27  ;;  %13677 = vmatprep.subr.bf16.mxu0 %v15269_v30  ;;  %v15308_v27 = vld [vmem:[%s16429_s5 + $0xab0] sm:$0xff]   ;;  %v15311_v30 = vld [vmem:[%s16429_s5 + $0xaf8] sm:$0xff]  }
 0x1a7   : > { %v13375_v14 = vpop.f32.mrb[8].mxu0  ;;  %13699 = vmatprep.subr.bf16.mxu1 %v15271_v34  ;;  %v358_v34 = vld [vmem:[%s16453_s15 + $0x140] sm:$0xff] }
 0x1a8   : > { %v13376_v16 = vpop.f32.mrb[9].mxu0  ;;  %v13397_v21 = vpop.f32.mrb[8].mxu1 }
 0x1a9   : > { %v13377_v18 = vadd.f32 %v13376_v16, %v13375_v14  ;;  %v13378_v19 = vpop.f32.mrb[10].mxu0  ;;  %v13398_v26 = vpop.f32.mrb[9].mxu1  ;;  %13678 = vmatpush3.bf16.msra.mxu0 %v15270_v32  ;;  %v15299_v14 = vld [vmem:[%s16429_s5 + $0xae0] sm:$0xff]  }
 0x1aa   : > { %v13379_v24 = vpop.f32.mrb[11].mxu0  ;;  %v13399_v28 = vadd.f32 %v13398_v26, %v13397_v21  ;;  %v13400_v29 = vpop.f32.mrb[10].mxu1  ;;  %13700 = vmatpush3.bf16.msra.mxu1 %v15272_v35  ;;  %13679 = vmatprep.subr.bf16.mxu0 %v15273_v36  ;;  %v15301_v19 = vld [vmem:[%s16429_s5 + $0xa68] sm:$0xff]   ;;  %v15307_v26 = vld [vmem:[%s16429_s5 + $0xaf0] sm:$0xff]   ;;  %v493_v35 = vpack.c.bf16 %v358_v34, %v358_v34  ;;  %v15313_v36 = vld [vmem:[%s16429_s5 + $0xb40] sm:$0xff]  }
 0x1ab   : > { %v9423_v23 = vadd.f32 %v13377_v18, %v16775_v45  ;;  %v13401_v31 = vpop.f32.mrb[11].mxu1  ;;  %13701 = vmatprep.subr.bf16.mxu1 %v15275_v38  ;;  %v15280_v45 = vld [vmem:[%s16429_s5 + $0x9b8] sm:$0xff]   ;;  %v15302_v21 = vld [vmem:[%s16429_s5 + $0xa28] sm:$0xff]   ;;  %v15305_v24 = vld [vmem:[%s16429_s5 + $0xa70] sm:$0xff]  }
 0x1ac   : > { %v15310_v29 = vld [vmem:[%s16429_s5 + $0xa38] sm:$0xff]   ;;  %v359_v31 = vld [vmem:[%s16453_s15 + $0x148] sm:$0xff]  ;;  %v15351_v34 = vld [vmem:[%s16429_s5 + $0xcc8] sm:$0xff]  }
 0x1ad   : > { %v16814_v33 = vadd.f32 %v13399_v28, %v9423_v23  ;;  %13680 = vmatpush3.bf16.msra.mxu0 %v15274_v37  ;;  %v15304_v23 = vld [vmem:[%s16429_s5 + $0xaa8] sm:$0xff]   ;;  %v15309_v28 = vld [vmem:[%s16429_s5 + $0xa78] sm:$0xff]   ;;  %v494_v32 = vpack.c.bf16 %v359_v31, %v359_v31  ;;  %v361_v37 = vld [vmem:[%s16453_s15 + $0x158] sm:$0xff] }
 0x1ae   : > { %13702 = vmatpush3.bf16.msra.mxu1 %v15276_v39  ;;  %13681 = vmatprep.subr.bf16.mxu0 %v15277_v40  ;;  %v496_v38 = vpack.c.bf16 %v361_v37, %v361_v37  ;;  %v15314_v39 = vld [vmem:[%s16429_s5 + $0xb00] sm:$0xff]   ;;  %v360_v40 = vld [vmem:[%s16453_s15 + $0x150] sm:$0xff]  ;;  %v15354_v37 = vld [vmem:[%s16429_s5 + $0xc10] sm:$0xff]  }
 0x1af   : > { %13703 = vmatprep.subr.bf16.mxu1 %v15279_v42  ;;  %v15315_v42 = vld [vmem:[%s16429_s5 + $0xbc0] sm:$0xff]  }
 0x1b0   : > { %v15348_v31 = vld [vmem:[%s16429_s5 + $0xc80] sm:$0xff]  }
 0x1b1   : > { %13682 = vmatpush3.bf16.msra.mxu0 %v15278_v41  ;;  %v495_v41 = vpack.c.bf16 %v360_v40, %v360_v40  ;;  %v15357_v40 = vld [vmem:[%s16429_s5 + $0xc58] sm:$0xff]  }
 0x1b2   : > { %13704 = vmatpush3.bf16.msra.mxu1 %v15280_v45  ;;  %13711 = vmatprep.subr.bf16.mxu0 %v15281_v48  ;;  %v15318_v45 = vld [vmem:[%s16429_s5 + $0xb08] sm:$0xff]   ;;  %v15321_v48 = vld [vmem:[%s16429_s5 + $0xb50] sm:$0xff]  }
 0x1b3   : > { %13733 = vmatprep.subr.bf16.mxu1 %v15283_v54  ;;  %v15326_v54 = vld [vmem:[%s16429_s5 + $0xb18] sm:$0xff]  }
 0x1b4   : > { %9981 = vmatmul.mubr.bf16.vlgmr.msra.gmra.mrb[36].mxu0 %v489_v47  ;;  %v15320_v47 = vld [vmem:[%s16429_s5 + $0xb88] sm:$0xff]  }
 0x1b5   : > { %13712 = vmatpush3.bf16.msra.mxu0 %v15282_v51  ;;  %10021 = vmatmul.mubr.bf16.vlgmr.msra.gmra.mrb[36].mxu1 %v491_v53  ;;  %v15324_v51 = vld [vmem:[%s16429_s5 + $0xb90] sm:$0xff]  }
 0x1b6   : > { %13734 = vmatpush3.bf16.msra.mxu1 %v15284_v55  ;;  %13713 = vmatprep.subr.bf16.mxu0 %v15285_v56  ;;  %v15327_v56 = vld [vmem:[%s16429_s5 + $0xbd8] sm:$0xff]  }
 0x1b7   : > { %13735 = vmatprep.subr.bf16.mxu1 %v15287_v58  ;;  %10060 = vmatprep.mubr.bf16.mxu0 %v494_v32  ;;  %v15349_v32 = vld [vmem:[%s16429_s5 + $0xc48] sm:$0xff]  }
 0x1b8   : > { %10100 = vmatprep.mubr.bf16.mxu1 %v496_v38  ;;  %v15355_v38 = vld [vmem:[%s16429_s5 + $0xcd0] sm:$0xff]  }
 0x1b9   : > { %13714 = vmatpush3.bf16.msra.mxu0 %v15286_v57 }
 0x1ba   : > { %13736 = vmatpush3.bf16.msra.mxu1 %v15288_v59  ;;  %13715 = vmatprep.subr.bf16.mxu0 %v15289_v60  ;;  %v15328_v59 = vld [vmem:[%s16429_s5 + $0xb98] sm:$0xff]  }
 0x1bb   : > { %13737 = vmatprep.subr.bf16.mxu1 %v15291_v62 }
 0x1bd   : > { %13716 = vmatpush3.bf16.msra.mxu0 %v15290_v61  ;;  %v15329_v61 = vld [vmem:[%s16429_s5 + $0xb60] sm:$0xff]  }
 0x1be   : > { %13738 = vmatpush3.bf16.msra.mxu1 %v15292_v63  ;;  %13717 = vmatprep.subr.bf16.mxu0 %v15293_v0  ;;  %v15330_v0 = vld [vmem:[%s16429_s5 + $0xb20] sm:$0xff]  }
 0x1bf   : > { %13739 = vmatprep.subr.bf16.mxu1 %v15295_v4 }
 0x1c1   : > { %13718 = vmatpush3.bf16.msra.mxu0 %v15294_v2  ;;  %v15331_v2 = vld [vmem:[%s16429_s5 + $0xbe0] sm:$0xff]  }
 0x1c2   : > { %13740 = vmatpush3.bf16.msra.mxu1 %v15296_v7  ;;  %13719 = vmatprep.subr.bf16.mxu0 %v15297_v9  ;;  %v15333_v7 = vld [vmem:[%s16429_s5 + $0xb68] sm:$0xff]  }
 0x1c3   : > { %13741 = vmatprep.subr.bf16.mxu1 %v15299_v14  ;;  %v15334_v9 = vld [vmem:[%s16429_s5 + $0xb28] sm:$0xff]   ;;  %v15339_v14 = vld [vmem:[%s16429_s5 + $0xbf0] sm:$0xff]  }
 0x1c5   : > { %13720 = vmatpush3.bf16.msra.mxu0 %v15298_v12  ;;  %v15337_v12 = vld [vmem:[%s16429_s5 + $0xb70] sm:$0xff]  }
 0x1c6   : > { %13742 = vmatpush3.bf16.msra.mxu1 %v15300_v17  ;;  %13721 = vmatprep.subr.bf16.mxu0 %v15301_v19  ;;  %v15342_v17 = vld [vmem:[%s16429_s5 + $0xb38] sm:$0xff]   ;;  %v363_v19 = vld [vmem:[%s16453_s15 + $0x168] sm:$0xff] }
 0x1c7   : > { %v13419_v1 = vpop.f32.mrb[12].mxu0  ;;  %13743 = vmatprep.subr.bf16.mxu1 %v15303_v22  ;;  %v362_v22 = vld [vmem:[%s16453_s15 + $0x160] sm:$0xff] }
 0x1c8   : > { %v13420_v3 = vpop.f32.mrb[13].mxu0  ;;  %v13441_v8 = vpop.f32.mrb[12].mxu1 }
 0x1c9   : > { %v13421_v5 = vadd.f32 %v13420_v3, %v13419_v1  ;;  %v13422_v6 = vpop.f32.mrb[14].mxu0  ;;  %v13442_v13 = vpop.f32.mrb[13].mxu1  ;;  %13722 = vmatpush3.bf16.msra.mxu0 %v15302_v21  ;;  %v15344_v21 = vld [vmem:[%s16429_s5 + $0xbb8] sm:$0xff]  }
 0x1ca   : > { %v13423_v11 = vpop.f32.mrb[15].mxu0  ;;  %v13443_v15 = vadd.f32 %v13442_v13, %v13441_v8  ;;  %v13444_v16 = vpop.f32.mrb[14].mxu1  ;;  %13744 = vmatpush3.bf16.msra.mxu1 %v15304_v23  ;;  %13723 = vmatprep.subr.bf16.mxu0 %v15305_v24  ;;  %v15338_v13 = vld [vmem:[%s16429_s5 + $0xb30] sm:$0xff]   ;;  %v497_v23 = vpack.c.bf16 %v362_v22, %v362_v22  ;;  %v15345_v24 = vld [vmem:[%s16429_s5 + $0xc40] sm:$0xff]   ;;  %v15383_v22 = vld [vmem:[%s16429_s5 + $0xdc8] sm:$0xff]  }
 0x1cb   : > { %v9503_v10 = vadd.f32 %v13421_v5, %v16814_v33  ;;  %v13445_v18 = vpop.f32.mrb[15].mxu1  ;;  %13745 = vmatprep.subr.bf16.mxu1 %v15307_v26  ;;  %v15312_v33 = vld [vmem:[%s16429_s5 + $0xab8] sm:$0xff]   ;;  %v15332_v5 = vld [vmem:[%s16429_s5 + $0xba0] sm:$0xff]   ;;  %v15336_v11 = vld [vmem:[%s16429_s5 + $0xba8] sm:$0xff]  }
 0x1cc   : > { %v15341_v16 = vld [vmem:[%s16429_s5 + $0xb78] sm:$0xff]  }
 0x1cd   : > { %v16852_v20 = vadd.f32 %v13443_v15, %v9503_v10  ;;  %13724 = vmatpush3.bf16.msra.mxu0 %v15306_v25  ;;  %v15335_v10 = vld [vmem:[%s16429_s5 + $0xbe8] sm:$0xff]   ;;  %v15340_v15 = vld [vmem:[%s16429_s5 + $0xbb0] sm:$0xff]   ;;  %v15343_v18 = vld [vmem:[%s16429_s5 + $0xbf8] sm:$0xff]  }
 0x1ce   : > { %13746 = vmatpush3.bf16.msra.mxu1 %v15308_v27  ;;  %13725 = vmatprep.subr.bf16.mxu0 %v15309_v28  ;;  %v365_v25 = vld [vmem:[%s16453_s15 + $0x178] sm:$0xff]  ;;  %v15346_v27 = vld [vmem:[%s16429_s5 + $0xc00] sm:$0xff]   ;;  %v364_v28 = vld [vmem:[%s16453_s15 + $0x170] sm:$0xff] }
 0x1cf   : > { %13747 = vmatprep.subr.bf16.mxu1 %v15311_v30  ;;  %v500_v26 = vpack.c.bf16 %v365_v25, %v365_v25  ;;  %v15347_v30 = vld [vmem:[%s16429_s5 + $0xcc0] sm:$0xff]   ;;  %v15386_v25 = vld [vmem:[%s16429_s5 + $0xd10] sm:$0xff]  }
 0x1d1   : > { %13726 = vmatpush3.bf16.msra.mxu0 %v15310_v29  ;;  %v499_v29 = vpack.c.bf16 %v364_v28, %v364_v28  ;;  %v15389_v28 = vld [vmem:[%s16429_s5 + $0xd58] sm:$0xff]  }
 0x1d2   : > { %13748 = vmatpush3.bf16.msra.mxu1 %v15312_v33  ;;  %13755 = vmatprep.subr.bf16.mxu0 %v15313_v36  ;;  %v15350_v33 = vld [vmem:[%s16429_s5 + $0xc08] sm:$0xff]   ;;  %v15353_v36 = vld [vmem:[%s16429_s5 + $0xc50] sm:$0xff]  }
 0x1d3   : > { %13777 = vmatprep.subr.bf16.mxu1 %v15315_v42 }
 0x1d4   : > { %10061 = vmatmul.mubr.bf16.vlgmr.msra.gmra.mrb[40].mxu0 %v493_v35  ;;  %v15352_v35 = vld [vmem:[%s16429_s5 + $0xc88] sm:$0xff]  }
 0x1d5   : > { %13756 = vmatpush3.bf16.msra.mxu0 %v15314_v39  ;;  %10101 = vmatmul.mubr.bf16.vlgmr.msra.gmra.mrb[40].mxu1 %v495_v41  ;;  %v15356_v39 = vld [vmem:[%s16429_s5 + $0xc90] sm:$0xff]   ;;  %v15358_v41 = vld [vmem:[%s16429_s5 + $0xc18] sm:$0xff]  }
 0x1d6   : > { %13778 = vmatpush3.bf16.msra.mxu1 %v15316_v43  ;;  %13757 = vmatprep.subr.bf16.mxu0 %v15317_v44  ;;  %v15359_v43 = vld [vmem:[%s16429_s5 + $0xcd8] sm:$0xff]  }
 0x1d7   : > { %13779 = vmatprep.subr.bf16.mxu1 %v15319_v46  ;;  %10180 = vmatprep.mubr.bf16.mxu1 %v500_v26  ;;  %v15387_v26 = vld [vmem:[%s16429_s5 + $0xdd0] sm:$0xff]  }
 0x1d9   : > { %13758 = vmatpush3.bf16.msra.mxu0 %v15318_v45  ;;  %v15360_v45 = vld [vmem:[%s16429_s5 + $0xc98] sm:$0xff]  }
 0x1da   : > { %13780 = vmatpush3.bf16.msra.mxu1 %v15320_v47  ;;  %13759 = vmatprep.subr.bf16.mxu0 %v15321_v48  ;;  %v15361_v48 = vld [vmem:[%s16429_s5 + $0xc60] sm:$0xff]  }
 0x1db   : > { %13781 = vmatprep.subr.bf16.mxu1 %v15323_v50  ;;  %v15362_v50 = vld [vmem:[%s16429_s5 + $0xc20] sm:$0xff]  }
 0x1dd   : > { %13760 = vmatpush3.bf16.msra.mxu0 %v15322_v49 }
 0x1de   : > { %13782 = vmatpush3.bf16.msra.mxu1 %v15324_v51  ;;  %13761 = vmatprep.subr.bf16.mxu0 %v15325_v52 }
 0x1df   : > { %13783 = vmatprep.subr.bf16.mxu1 %v15327_v56 }
 0x1e1   : > { %13762 = vmatpush3.bf16.msra.mxu0 %v15326_v54 }
 0x1e2   : > { %13784 = vmatpush3.bf16.msra.mxu1 %v15328_v59  ;;  %13763 = vmatprep.subr.bf16.mxu0 %v15329_v61 }
 0x1e3   : > { %13785 = vmatprep.subr.bf16.mxu1 %v15331_v2  ;;  %v15371_v2 = vld [vmem:[%s16429_s5 + $0xcf0] sm:$0xff]  }
 0x1e5   : > { %13764 = vmatpush3.bf16.msra.mxu0 %v15330_v0  ;;  %v15369_v0 = vld [vmem:[%s16429_s5 + $0xc70] sm:$0xff]  }
 0x1e6   : > { %13786 = vmatpush3.bf16.msra.mxu1 %v15332_v5  ;;  %13765 = vmatprep.subr.bf16.mxu0 %v15333_v7  ;;  %v15374_v5 = vld [vmem:[%s16429_s5 + $0xc38] sm:$0xff]   ;;  %v367_v7 = vld [vmem:[%s16453_s15 + $0x188] sm:$0xff] }
 0x1e7   : > { %v13463_v53 = vpop.f32.mrb[16].mxu0  ;;  %13787 = vmatprep.subr.bf16.mxu1 %v15335_v10  ;;  %v366_v10 = vld [vmem:[%s16453_s15 + $0x180] sm:$0xff] }
 0x1e8   : > { %v13464_v55 = vpop.f32.mrb[17].mxu0  ;;  %v13485_v60 = vpop.f32.mrb[16].mxu1 }
 0x1e9   : > { %v13465_v57 = vadd.f32 %v13464_v55, %v13463_v53  ;;  %v13466_v58 = vpop.f32.mrb[18].mxu0  ;;  %v13486_v1 = vpop.f32.mrb[17].mxu1  ;;  %13766 = vmatpush3.bf16.msra.mxu0 %v15334_v9  ;;  %v15363_v53 = vld [vmem:[%s16429_s5 + $0xce0] sm:$0xff]   ;;  %v15376_v9 = vld [vmem:[%s16429_s5 + $0xcb8] sm:$0xff]  }
 0x1ea   : > { %v13467_v63 = vpop.f32.mrb[19].mxu0  ;;  %v13487_v3 = vadd.f32 %v13486_v1, %v13485_v60  ;;  %v13488_v4 = vpop.f32.mrb[18].mxu1  ;;  %13788 = vmatpush3.bf16.msra.mxu1 %v15336_v11  ;;  %13767 = vmatprep.subr.bf16.mxu0 %v15337_v12  ;;  %v15364_v55 = vld [vmem:[%s16429_s5 + $0xca0] sm:$0xff]   ;;  %v15365_v58 = vld [vmem:[%s16429_s5 + $0xc68] sm:$0xff]   ;;  %v15370_v1 = vld [vmem:[%s16429_s5 + $0xc30] sm:$0xff]   ;;  %v501_v11 = vpack.c.bf16 %v366_v10, %v366_v10 }
 0x1eb   : > { %v9583_v62 = vadd.f32 %v13465_v57, %v16852_v20  ;;  %v13489_v6 = vpop.f32.mrb[19].mxu1  ;;  %13789 = vmatprep.subr.bf16.mxu1 %v15339_v14  ;;  %v498_v20 = vpack.c.bf16 %v363_v19, %v363_v19  ;;  %v15366_v60 = vld [vmem:[%s16429_s5 + $0xc28] sm:$0xff]   ;;  %v15373_v4 = vld [vmem:[%s16429_s5 + $0xc78] sm:$0xff]   ;;  %v15377_v12 = vld [vmem:[%s16429_s5 + $0xd40] sm:$0xff]  }
 0x1ec   : > { %v15368_v63 = vld [vmem:[%s16429_s5 + $0xca8] sm:$0xff]   ;;  %v15375_v6 = vld [vmem:[%s16429_s5 + $0xcf8] sm:$0xff]   ;;  %v15380_v19 = vld [vmem:[%s16429_s5 + $0xd80] sm:$0xff]  }
 0x1ed   : > { %v16891_v8 = vadd.f32 %v13487_v3, %v9583_v62  ;;  %13768 = vmatpush3.bf16.msra.mxu0 %v15338_v13  ;;  %10140 = vmatprep.mubr.bf16.mxu0 %v498_v20  ;;  %v15367_v62 = vld [vmem:[%s16429_s5 + $0xce8] sm:$0xff]   ;;  %v15372_v3 = vld [vmem:[%s16429_s5 + $0xcb0] sm:$0xff]  }
 0x1ee   : > { %13790 = vmatpush3.bf16.msra.mxu1 %v15340_v15  ;;  %13769 = vmatprep.subr.bf16.mxu0 %v15341_v16  ;;  %v369_v13 = vld [vmem:[%s16453_s15 + $0x198] sm:$0xff]  ;;  %v15378_v15 = vld [vmem:[%s16429_s5 + $0xd00] sm:$0xff]   ;;  %v368_v16 = vld [vmem:[%s16453_s15 + $0x190] sm:$0xff] }
 0x1ef   : > { %13791 = vmatprep.subr.bf16.mxu1 %v15343_v18  ;;  %v504_v14 = vpack.c.bf16 %v369_v13, %v369_v13  ;;  %v15379_v18 = vld [vmem:[%s16429_s5 + $0xdc0] sm:$0xff]   ;;  %v15381_v20 = vld [vmem:[%s16429_s5 + $0xd48] sm:$0xff]   ;;  %v15418_v13 = vld [vmem:[%s16429_s5 + $0xe10] sm:$0xff]  }
 0x1f0   : > { %v15415_v10 = vld [vmem:[%s16429_s5 + $0xec8] sm:$0xff]  }
 0x1f1   : > { %13770 = vmatpush3.bf16.msra.mxu0 %v15342_v17  ;;  %v503_v17 = vpack.c.bf16 %v368_v16, %v368_v16  ;;  %v15421_v16 = vld [vmem:[%s16429_s5 + $0xe58] sm:$0xff]  }
 0x1f2   : > { %13792 = vmatpush3.bf16.msra.mxu1 %v15344_v21  ;;  %13799 = vmatprep.subr.bf16.mxu0 %v15345_v24  ;;  %v15382_v21 = vld [vmem:[%s16429_s5 + $0xd08] sm:$0xff]   ;;  %v15385_v24 = vld [vmem:[%s16429_s5 + $0xd50] sm:$0xff]  }
 0x1f3   : > { %13821 = vmatprep.subr.bf16.mxu1 %v15347_v30  ;;  %v15390_v30 = vld [vmem:[%s16429_s5 + $0xd18] sm:$0xff]  }
 0x1f4   : > { %10141 = vmatmul.mubr.bf16.vlgmr.msra.gmra.mrb[44].mxu0 %v497_v23  ;;  %v15384_v23 = vld [vmem:[%s16429_s5 + $0xd88] sm:$0xff]  }
 0x1f5   : > { %13800 = vmatpush3.bf16.msra.mxu0 %v15346_v27  ;;  %10181 = vmatmul.mubr.bf16.vlgmr.msra.gmra.mrb[44].mxu1 %v499_v29  ;;  %v15388_v27 = vld [vmem:[%s16429_s5 + $0xd90] sm:$0xff]  }
 0x1f6   : > { %13822 = vmatpush3.bf16.msra.mxu1 %v15348_v31  ;;  %13801 = vmatprep.subr.bf16.mxu0 %v15349_v32  ;;  %v15391_v32 = vld [vmem:[%s16429_s5 + $0xdd8] sm:$0xff]  }
 0x1f7   : > { %13823 = vmatprep.subr.bf16.mxu1 %v15351_v34  ;;  %10260 = vmatprep.mubr.bf16.mxu1 %v504_v14  ;;  %v15419_v14 = vld [vmem:[%s16429_s5 + $0xed0] sm:$0xff]  }
 0x1f9   : > { %13802 = vmatpush3.bf16.msra.mxu0 %v15350_v33 }
 0x1fa   : > { %13824 = vmatpush3.bf16.msra.mxu1 %v15352_v35  ;;  %13803 = vmatprep.subr.bf16.mxu0 %v15353_v36  ;;  %v15392_v35 = vld [vmem:[%s16429_s5 + $0xd98] sm:$0xff]  }
 0x1fb   : > { %13825 = vmatprep.subr.bf16.mxu1 %v15355_v38 }
 0x1fd   : > { %13804 = vmatpush3.bf16.msra.mxu0 %v15354_v37  ;;  %v15393_v37 = vld [vmem:[%s16429_s5 + $0xd60] sm:$0xff]  }
 0x1fe   : > { %13826 = vmatpush3.bf16.msra.mxu1 %v15356_v39  ;;  %13805 = vmatprep.subr.bf16.mxu0 %v15357_v40  ;;  %v15394_v40 = vld [vmem:[%s16429_s5 + $0xd20] sm:$0xff]  }
 0x1ff   : > { %13827 = vmatprep.subr.bf16.mxu1 %v15359_v43 }
 0x201   : > { %13806 = vmatpush3.bf16.msra.mxu0 %v15358_v41 }
 0x202   : > { %13828 = vmatpush3.bf16.msra.mxu1 %v15360_v45  ;;  %13807 = vmatprep.subr.bf16.mxu0 %v15361_v48  ;;  %v15396_v45 = vld [vmem:[%s16429_s5 + $0xda0] sm:$0xff]  }
 0x203   : > { %13829 = vmatprep.subr.bf16.mxu1 %v15363_v53  ;;  %v15402_v53 = vld [vmem:[%s16429_s5 + $0xd30] sm:$0xff]  }
 0x205   : > { %13808 = vmatpush3.bf16.msra.mxu0 %v15362_v50  ;;  %v15399_v50 = vld [vmem:[%s16429_s5 + $0xde8] sm:$0xff]  }
 0x206   : > { %13830 = vmatpush3.bf16.msra.mxu1 %v15364_v55  ;;  %13809 = vmatprep.subr.bf16.mxu0 %v15365_v58  ;;  %v15404_v55 = vld [vmem:[%s16429_s5 + $0xdb0] sm:$0xff]   ;;  %v15407_v58 = vld [vmem:[%s16429_s5 + $0xdf8] sm:$0xff]  }
 0x207   : > { %v13507_v42 = vpop.f32.mrb[20].mxu0  ;;  %13831 = vmatprep.subr.bf16.mxu1 %v15367_v62  ;;  %v370_v62 = vld [vmem:[%s16453_s15 + $0x1a0] sm:$0xff] }
 0x208   : > { %v13508_v44 = vpop.f32.mrb[21].mxu0  ;;  %v13529_v49 = vpop.f32.mrb[20].mxu1 }
 0x209   : > { %v13509_v46 = vadd.f32 %v13508_v44, %v13507_v42  ;;  %v13510_v47 = vpop.f32.mrb[22].mxu0  ;;  %v13530_v54 = vpop.f32.mrb[21].mxu1  ;;  %13810 = vmatpush3.bf16.msra.mxu0 %v15366_v60  ;;  %v15395_v42 = vld [vmem:[%s16429_s5 + $0xde0] sm:$0xff]  }
 0x20a   : > { %v13511_v52 = vpop.f32.mrb[23].mxu0  ;;  %v13531_v56 = vadd.f32 %v13530_v54, %v13529_v49  ;;  %v13532_v57 = vpop.f32.mrb[22].mxu1  ;;  %13832 = vmatpush3.bf16.msra.mxu1 %v15368_v63  ;;  %13811 = vmatprep.subr.bf16.mxu0 %v15369_v0  ;;  %v15397_v47 = vld [vmem:[%s16429_s5 + $0xd68] sm:$0xff]   ;;  %v15403_v54 = vld [vmem:[%s16429_s5 + $0xdf0] sm:$0xff]   ;;  %v505_v63 = vpack.c.bf16 %v370_v62, %v370_v62  ;;  %v15409_v0 = vld [vmem:[%s16429_s5 + $0xe40] sm:$0xff]  }
 0x20b   : > { %v9663_v51 = vadd.f32 %v13509_v46, %v16891_v8  ;;  %v13533_v59 = vpop.f32.mrb[23].mxu1  ;;  %13833 = vmatprep.subr.bf16.mxu1 %v15371_v2  ;;  %v502_v8 = vpack.c.bf16 %v367_v7, %v367_v7  ;;  %v15398_v49 = vld [vmem:[%s16429_s5 + $0xd28] sm:$0xff]   ;;  %v15401_v52 = vld [vmem:[%s16429_s5 + $0xd70] sm:$0xff]   ;;  %v15406_v57 = vld [vmem:[%s16429_s5 + $0xd38] sm:$0xff]  }
 0x20c   : > { %v371_v59 = vld [vmem:[%s16453_s15 + $0x1a8] sm:$0xff]  ;;  %v15447_v62 = vld [vmem:[%s16429_s5 + $0xfc8] sm:$0xff]  }
 0x20d   : > { %v16931_v61 = vadd.f32 %v13531_v56, %v9663_v51  ;;  %13812 = vmatpush3.bf16.msra.mxu0 %v15370_v1  ;;  %10220 = vmatprep.mubr.bf16.mxu0 %v502_v8  ;;  %v15400_v51 = vld [vmem:[%s16429_s5 + $0xda8] sm:$0xff]   ;;  %v15405_v56 = vld [vmem:[%s16429_s5 + $0xd78] sm:$0xff]   ;;  %v506_v60 = vpack.c.bf16 %v371_v59, %v371_v59  ;;  %v373_v1 = vld [vmem:[%s16453_s15 + $0x1b8] sm:$0xff] }
 0x20e   : > { %13834 = vmatpush3.bf16.msra.mxu1 %v15372_v3  ;;  %13813 = vmatprep.subr.bf16.mxu0 %v15373_v4  ;;  %v508_v2 = vpack.c.bf16 %v373_v1, %v373_v1  ;;  %v15410_v3 = vld [vmem:[%s16429_s5 + $0xe00] sm:$0xff]   ;;  %v372_v4 = vld [vmem:[%s16453_s15 + $0x1b0] sm:$0xff]  ;;  %v15450_v1 = vld [vmem:[%s16429_s5 + $0xf10] sm:$0xff]  }
 0x20f   : > { %13835 = vmatprep.subr.bf16.mxu1 %v15375_v6  ;;  %v15411_v6 = vld [vmem:[%s16429_s5 + $0xec0] sm:$0xff]   ;;  %v15413_v8 = vld [vmem:[%s16429_s5 + $0xe48] sm:$0xff]  }
 0x210   : > { %v15412_v7 = vld [vmem:[%s16429_s5 + $0xe80] sm:$0xff]  }
 0x211   : > { %13814 = vmatpush3.bf16.msra.mxu0 %v15374_v5  ;;  %v507_v5 = vpack.c.bf16 %v372_v4, %v372_v4  ;;  %v15444_v59 = vld [vmem:[%s16429_s5 + $0xf80] sm:$0xff]   ;;  %v15453_v4 = vld [vmem:[%s16429_s5 + $0xf58] sm:$0xff]  }
 0x212   : > { %13836 = vmatpush3.bf16.msra.mxu1 %v15376_v9  ;;  %13843 = vmatprep.subr.bf16.mxu0 %v15377_v12  ;;  %v15414_v9 = vld [vmem:[%s16429_s5 + $0xe08] sm:$0xff]   ;;  %v15417_v12 = vld [vmem:[%s16429_s5 + $0xe50] sm:$0xff]  }
 0x213   : > { %13865 = vmatprep.subr.bf16.mxu1 %v15379_v18  ;;  %v15422_v18 = vld [vmem:[%s16429_s5 + $0xe18] sm:$0xff]  }
 0x214   : > { %10221 = vmatmul.mubr.bf16.vlgmr.msra.gmra.mrb[48].mxu0 %v501_v11  ;;  %v15416_v11 = vld [vmem:[%s16429_s5 + $0xe88] sm:$0xff]  }
 0x215   : > { %13844 = vmatpush3.bf16.msra.mxu0 %v15378_v15  ;;  %10261 = vmatmul.mubr.bf16.vlgmr.msra.gmra.mrb[48].mxu1 %v503_v17  ;;  %v15420_v15 = vld [vmem:[%s16429_s5 + $0xe90] sm:$0xff]  }
 0x216   : > { %13866 = vmatpush3.bf16.msra.mxu1 %v15380_v19  ;;  %13845 = vmatprep.subr.bf16.mxu0 %v15381_v20  ;;  %v15423_v20 = vld [vmem:[%s16429_s5 + $0xed8] sm:$0xff]  }
 0x217   : > { %13867 = vmatprep.subr.bf16.mxu1 %v15383_v22  ;;  %10300 = vmatprep.mubr.bf16.mxu0 %v506_v60  ;;  %v15445_v60 = vld [vmem:[%s16429_s5 + $0xf48] sm:$0xff]  }
 0x218   : > { %10340 = vmatprep.mubr.bf16.mxu1 %v508_v2  ;;  %v15451_v2 = vld [vmem:[%s16429_s5 + $0xfd0] sm:$0xff]  }
 0x219   : > { %13846 = vmatpush3.bf16.msra.mxu0 %v15382_v21 }
 0x21a   : > { %13868 = vmatpush3.bf16.msra.mxu1 %v15384_v23  ;;  %13847 = vmatprep.subr.bf16.mxu0 %v15385_v24  ;;  %v15424_v23 = vld [vmem:[%s16429_s5 + $0xe98] sm:$0xff]  }
 0x21b   : > { %13869 = vmatprep.subr.bf16.mxu1 %v15387_v26 }
 0x21d   : > { %13848 = vmatpush3.bf16.msra.mxu0 %v15386_v25  ;;  %v15425_v25 = vld [vmem:[%s16429_s5 + $0xe60] sm:$0xff]  }
 0x21e   : > { %13870 = vmatpush3.bf16.msra.mxu1 %v15388_v27  ;;  %13849 = vmatprep.subr.bf16.mxu0 %v15389_v28  ;;  %v15426_v28 = vld [vmem:[%s16429_s5 + $0xe20] sm:$0xff]  }
 0x21f   : > { %13871 = vmatprep.subr.bf16.mxu1 %v15391_v32 }
 0x221   : > { %13850 = vmatpush3.bf16.msra.mxu0 %v15390_v30  ;;  %v15427_v30 = vld [vmem:[%s16429_s5 + $0xee0] sm:$0xff]  }
 0x222   : > { %13872 = vmatpush3.bf16.msra.mxu1 %v15392_v35  ;;  %13851 = vmatprep.subr.bf16.mxu0 %v15393_v37  ;;  %v15429_v35 = vld [vmem:[%s16429_s5 + $0xe68] sm:$0xff]  }
 0x223   : > { %13873 = vmatprep.subr.bf16.mxu1 %v15395_v42  ;;  %v15430_v37 = vld [vmem:[%s16429_s5 + $0xe28] sm:$0xff]   ;;  %v15435_v42 = vld [vmem:[%s16429_s5 + $0xef0] sm:$0xff]  }
 0x225   : > { %13852 = vmatpush3.bf16.msra.mxu0 %v15394_v40  ;;  %v15433_v40 = vld [vmem:[%s16429_s5 + $0xe70] sm:$0xff]  }
 0x226   : > { %13874 = vmatpush3.bf16.msra.mxu1 %v15396_v45  ;;  %13853 = vmatprep.subr.bf16.mxu0 %v15397_v47  ;;  %v15438_v45 = vld [vmem:[%s16429_s5 + $0xe38] sm:$0xff]   ;;  %v375_v47 = vld [vmem:[%s16453_s15 + $0x1c8] sm:$0xff] }
 0x227   : > { %v13551_v29 = vpop.f32.mrb[24].mxu0  ;;  %13875 = vmatprep.subr.bf16.mxu1 %v15399_v50  ;;  %v374_v50 = vld [vmem:[%s16453_s15 + $0x1c0] sm:$0xff] }
 0x228   : > { %v13552_v31 = vpop.f32.mrb[25].mxu0  ;;  %v13573_v36 = vpop.f32.mrb[24].mxu1 }
 0x229   : > { %v13553_v33 = vadd.f32 %v13552_v31, %v13551_v29  ;;  %v13554_v34 = vpop.f32.mrb[26].mxu0  ;;  %v13574_v41 = vpop.f32.mrb[25].mxu1  ;;  %13854 = vmatpush3.bf16.msra.mxu0 %v15398_v49  ;;  %v15440_v49 = vld [vmem:[%s16429_s5 + $0xeb8] sm:$0xff]  }
 0x22a   : > { %v13555_v39 = vpop.f32.mrb[27].mxu0  ;;  %v13575_v43 = vadd.f32 %v13574_v41, %v13573_v36  ;;  %v13576_v44 = vpop.f32.mrb[26].mxu1  ;;  %13876 = vmatpush3.bf16.msra.mxu1 %v15400_v51  ;;  %13855 = vmatprep.subr.bf16.mxu0 %v15401_v52  ;;  %v15434_v41 = vld [vmem:[%s16429_s5 + $0xe30] sm:$0xff]   ;;  %v509_v51 = vpack.c.bf16 %v374_v50, %v374_v50  ;;  %v15441_v52 = vld [vmem:[%s16429_s5 + $0xf40] sm:$0xff]   ;;  %v15479_v50 = vld [vmem:[%s16429_s5 + $0x10c8] sm:$0xff]  }
 0x22b   : > { %v9743_v38 = vadd.f32 %v13553_v33, %v16931_v61  ;;  %v13577_v46 = vpop.f32.mrb[27].mxu1  ;;  %13877 = vmatprep.subr.bf16.mxu1 %v15403_v54  ;;  %v15408_v61 = vld [vmem:[%s16429_s5 + $0xdb8] sm:$0xff]   ;;  %v15428_v33 = vld [vmem:[%s16429_s5 + $0xea0] sm:$0xff]   ;;  %v15432_v39 = vld [vmem:[%s16429_s5 + $0xea8] sm:$0xff]  }
 0x22c   : > { %v15437_v44 = vld [vmem:[%s16429_s5 + $0xe78] sm:$0xff]  }
 0x22d   : > { %v16969_v48 = vadd.f32 %v13575_v43, %v9743_v38  ;;  %13856 = vmatpush3.bf16.msra.mxu0 %v15402_v53  ;;  %v15431_v38 = vld [vmem:[%s16429_s5 + $0xee8] sm:$0xff]   ;;  %v15436_v43 = vld [vmem:[%s16429_s5 + $0xeb0] sm:$0xff]   ;;  %v15439_v46 = vld [vmem:[%s16429_s5 + $0xef8] sm:$0xff]  }
 0x22e   : > { %13878 = vmatpush3.bf16.msra.mxu1 %v15404_v55  ;;  %13857 = vmatprep.subr.bf16.mxu0 %v15405_v56  ;;  %v377_v53 = vld [vmem:[%s16453_s15 + $0x1d8] sm:$0xff]  ;;  %v15442_v55 = vld [vmem:[%s16429_s5 + $0xf00] sm:$0xff]   ;;  %v376_v56 = vld [vmem:[%s16453_s15 + $0x1d0] sm:$0xff] }
 0x22f   : > { %13879 = vmatprep.subr.bf16.mxu1 %v15407_v58  ;;  %v512_v54 = vpack.c.bf16 %v377_v53, %v377_v53  ;;  %v15443_v58 = vld [vmem:[%s16429_s5 + $0xfc0] sm:$0xff]   ;;  %v15482_v53 = vld [vmem:[%s16429_s5 + $0x1010] sm:$0xff]  }
 0x231   : > { %13858 = vmatpush3.bf16.msra.mxu0 %v15406_v57  ;;  %v511_v57 = vpack.c.bf16 %v376_v56, %v376_v56  ;;  %v15485_v56 = vld [vmem:[%s16429_s5 + $0x1058] sm:$0xff]  }
 0x232   : > { %13880 = vmatpush3.bf16.msra.mxu1 %v15408_v61  ;;  %13887 = vmatprep.subr.bf16.mxu0 %v15409_v0  ;;  %v15446_v61 = vld [vmem:[%s16429_s5 + $0xf08] sm:$0xff]   ;;  %v15449_v0 = vld [vmem:[%s16429_s5 + $0xf50] sm:$0xff]  }
 0x233   : > { %13909 = vmatprep.subr.bf16.mxu1 %v15411_v6 }
 0x234   : > { %10301 = vmatmul.mubr.bf16.vlgmr.msra.gmra.mrb[52].mxu0 %v505_v63  ;;  %v15448_v63 = vld [vmem:[%s16429_s5 + $0xf88] sm:$0xff]  }
 0x235   : > { %13888 = vmatpush3.bf16.msra.mxu0 %v15410_v3  ;;  %10341 = vmatmul.mubr.bf16.vlgmr.msra.gmra.mrb[52].mxu1 %v507_v5  ;;  %v15452_v3 = vld [vmem:[%s16429_s5 + $0xf90] sm:$0xff]   ;;  %v15454_v5 = vld [vmem:[%s16429_s5 + $0xf18] sm:$0xff]  }
 0x236   : > { %13910 = vmatpush3.bf16.msra.mxu1 %v15412_v7  ;;  %13889 = vmatprep.subr.bf16.mxu0 %v15413_v8  ;;  %v15455_v7 = vld [vmem:[%s16429_s5 + $0xfd8] sm:$0xff]  }
 0x237   : > { %13911 = vmatprep.subr.bf16.mxu1 %v15415_v10  ;;  %10420 = vmatprep.mubr.bf16.mxu1 %v512_v54  ;;  %v15483_v54 = vld [vmem:[%s16429_s5 + $0x10d0] sm:$0xff]  }
 0x239   : > { %13890 = vmatpush3.bf16.msra.mxu0 %v15414_v9  ;;  %v15456_v9 = vld [vmem:[%s16429_s5 + $0xf98] sm:$0xff]  }
 0x23a   : > { %13912 = vmatpush3.bf16.msra.mxu1 %v15416_v11  ;;  %13891 = vmatprep.subr.bf16.mxu0 %v15417_v12  ;;  %v15457_v12 = vld [vmem:[%s16429_s5 + $0xf60] sm:$0xff]  }
 0x23b   : > { %13913 = vmatprep.subr.bf16.mxu1 %v15419_v14  ;;  %v15458_v14 = vld [vmem:[%s16429_s5 + $0xf20] sm:$0xff]  }
 0x23d   : > { %13892 = vmatpush3.bf16.msra.mxu0 %v15418_v13 }
 0x23e   : > { %13914 = vmatpush3.bf16.msra.mxu1 %v15420_v15  ;;  %13893 = vmatprep.subr.bf16.mxu0 %v15421_v16 }
 0x23f   : > { %13915 = vmatprep.subr.bf16.mxu1 %v15423_v20 }
 0x241   : > { %13894 = vmatpush3.bf16.msra.mxu0 %v15422_v18 }
 0x242   : > { %13916 = vmatpush3.bf16.msra.mxu1 %v15424_v23  ;;  %13895 = vmatprep.subr.bf16.mxu0 %v15425_v25 }
 0x243   : > { %13917 = vmatprep.subr.bf16.mxu1 %v15427_v30  ;;  %v15467_v30 = vld [vmem:[%s16429_s5 + $0xff0] sm:$0xff]  }
 0x245   : > { %13896 = vmatpush3.bf16.msra.mxu0 %v15426_v28  ;;  %v15465_v28 = vld [vmem:[%s16429_s5 + $0xf70] sm:$0xff]  }
 0x246   : > { %13918 = vmatpush3.bf16.msra.mxu1 %v15428_v33  ;;  %13897 = vmatprep.subr.bf16.mxu0 %v15429_v35  ;;  %v15470_v33 = vld [vmem:[%s16429_s5 + $0xf38] sm:$0xff]   ;;  %v379_v35 = vld [vmem:[%s16453_s15 + $0x1e8] sm:$0xff] }
 0x247   : > { %v13595_v17 = vpop.f32.mrb[28].mxu0  ;;  %13919 = vmatprep.subr.bf16.mxu1 %v15431_v38  ;;  %v378_v38 = vld [vmem:[%s16453_s15 + $0x1e0] sm:$0xff] }
 0x248   : > { %v13596_v19 = vpop.f32.mrb[29].mxu0  ;;  %v13617_v24 = vpop.f32.mrb[28].mxu1 }
 0x249   : > { %v13597_v21 = vadd.f32 %v13596_v19, %v13595_v17  ;;  %v13598_v22 = vpop.f32.mrb[30].mxu0  ;;  %v13618_v29 = vpop.f32.mrb[29].mxu1  ;;  %13898 = vmatpush3.bf16.msra.mxu0 %v15430_v37  ;;  %v15459_v17 = vld [vmem:[%s16429_s5 + $0xfe0] sm:$0xff]   ;;  %v15472_v37 = vld [vmem:[%s16429_s5 + $0xfb8] sm:$0xff]  }
 0x24a   : > { %v13599_v27 = vpop.f32.mrb[31].mxu0  ;;  %v13619_v31 = vadd.f32 %v13618_v29, %v13617_v24  ;;  %v13620_v32 = vpop.f32.mrb[30].mxu1  ;;  %13920 = vmatpush3.bf16.msra.mxu1 %v15432_v39  ;;  %13899 = vmatprep.subr.bf16.mxu0 %v15433_v40  ;;  %v15460_v19 = vld [vmem:[%s16429_s5 + $0xfa0] sm:$0xff]   ;;  %v15461_v22 = vld [vmem:[%s16429_s5 + $0xf68] sm:$0xff]   ;;  %v15466_v29 = vld [vmem:[%s16429_s5 + $0xf30] sm:$0xff]   ;;  %v513_v39 = vpack.c.bf16 %v378_v38, %v378_v38 }
 0x24b   : > { %v9823_v26 = vadd.f32 %v13597_v21, %v16969_v48  ;;  %v13621_v34 = vpop.f32.mrb[31].mxu1  ;;  %13921 = vmatprep.subr.bf16.mxu1 %v15435_v42  ;;  %v510_v48 = vpack.c.bf16 %v375_v47, %v375_v47  ;;  %v15462_v24 = vld [vmem:[%s16429_s5 + $0xf28] sm:$0xff]   ;;  %v15469_v32 = vld [vmem:[%s16429_s5 + $0xf78] sm:$0xff]   ;;  %v15473_v40 = vld [vmem:[%s16429_s5 + $0x1040] sm:$0xff]  }
 0x24c   : > { %v15464_v27 = vld [vmem:[%s16429_s5 + $0xfa8] sm:$0xff]   ;;  %v15471_v34 = vld [vmem:[%s16429_s5 + $0xff8] sm:$0xff]   ;;  %v15476_v47 = vld [vmem:[%s16429_s5 + $0x1080] sm:$0xff]  }
 0x24d   : > { %v17008_v36 = vadd.f32 %v13619_v31, %v9823_v26  ;;  %13900 = vmatpush3.bf16.msra.mxu0 %v15434_v41  ;;  %10380 = vmatprep.mubr.bf16.mxu0 %v510_v48  ;;  %v15463_v26 = vld [vmem:[%s16429_s5 + $0xfe8] sm:$0xff]   ;;  %v15468_v31 = vld [vmem:[%s16429_s5 + $0xfb0] sm:$0xff]  }
 0x24e   : > { %13922 = vmatpush3.bf16.msra.mxu1 %v15436_v43  ;;  %13901 = vmatprep.subr.bf16.mxu0 %v15437_v44  ;;  %v381_v41 = vld [vmem:[%s16453_s15 + $0x1f8] sm:$0xff]  ;;  %v15474_v43 = vld [vmem:[%s16429_s5 + $0x1000] sm:$0xff]   ;;  %v380_v44 = vld [vmem:[%s16453_s15 + $0x1f0] sm:$0xff] }
 0x24f   : > { %13923 = vmatprep.subr.bf16.mxu1 %v15439_v46  ;;  %v516_v42 = vpack.c.bf16 %v381_v41, %v381_v41  ;;  %v15475_v46 = vld [vmem:[%s16429_s5 + $0x10c0] sm:$0xff]   ;;  %v15477_v48 = vld [vmem:[%s16429_s5 + $0x1048] sm:$0xff]   ;;  %v15514_v41 = vld [vmem:[%s16429_s5 + $0x1110] sm:$0xff]  }
 0x250   : > { %v15511_v38 = vld [vmem:[%s16429_s5 + $0x11c8] sm:$0xff]  }
 0x251   : > { %13902 = vmatpush3.bf16.msra.mxu0 %v15438_v45  ;;  %v515_v45 = vpack.c.bf16 %v380_v44, %v380_v44  ;;  %v15517_v44 = vld [vmem:[%s16429_s5 + $0x1158] sm:$0xff]  }
 0x252   : > { %13924 = vmatpush3.bf16.msra.mxu1 %v15440_v49  ;;  %13931 = vmatprep.subr.bf16.mxu0 %v15441_v52  ;;  %v15478_v49 = vld [vmem:[%s16429_s5 + $0x1008] sm:$0xff]   ;;  %v15481_v52 = vld [vmem:[%s16429_s5 + $0x1050] sm:$0xff]  }
 0x253   : > { %13953 = vmatprep.subr.bf16.mxu1 %v15443_v58  ;;  %v15486_v58 = vld [vmem:[%s16429_s5 + $0x1018] sm:$0xff]  }
 0x254   : > { %10381 = vmatmul.mubr.bf16.vlgmr.msra.gmra.mrb[56].mxu0 %v509_v51  ;;  %v15480_v51 = vld [vmem:[%s16429_s5 + $0x1088] sm:$0xff]  }
 0x255   : > { %13932 = vmatpush3.bf16.msra.mxu0 %v15442_v55  ;;  %10421 = vmatmul.mubr.bf16.vlgmr.msra.gmra.mrb[56].mxu1 %v511_v57  ;;  %v15484_v55 = vld [vmem:[%s16429_s5 + $0x1090] sm:$0xff]  }
 0x256   : > { %13954 = vmatpush3.bf16.msra.mxu1 %v15444_v59  ;;  %13933 = vmatprep.subr.bf16.mxu0 %v15445_v60  ;;  %v15487_v60 = vld [vmem:[%s16429_s5 + $0x10d8] sm:$0xff]  }
 0x257   : > { %13955 = vmatprep.subr.bf16.mxu1 %v15447_v62  ;;  %10500 = vmatprep.mubr.bf16.mxu1 %v516_v42  ;;  %v15515_v42 = vld [vmem:[%s16429_s5 + $0x11d0] sm:$0xff]  }
 0x259   : > { %13934 = vmatpush3.bf16.msra.mxu0 %v15446_v61 }
 0x25a   : > { %13956 = vmatpush3.bf16.msra.mxu1 %v15448_v63  ;;  %13935 = vmatprep.subr.bf16.mxu0 %v15449_v0  ;;  %v15488_v63 = vld [vmem:[%s16429_s5 + $0x1098] sm:$0xff]  }
 0x25b   : > { %13957 = vmatprep.subr.bf16.mxu1 %v15451_v2 }
 0x25d   : > { %13936 = vmatpush3.bf16.msra.mxu0 %v15450_v1  ;;  %v15489_v1 = vld [vmem:[%s16429_s5 + $0x1060] sm:$0xff]  }
 0x25e   : > { %13958 = vmatpush3.bf16.msra.mxu1 %v15452_v3  ;;  %13937 = vmatprep.subr.bf16.mxu0 %v15453_v4  ;;  %v15490_v4 = vld [vmem:[%s16429_s5 + $0x1020] sm:$0xff]  }
 0x25f   : > { %13959 = vmatprep.subr.bf16.mxu1 %v15455_v7 }
 0x261   : > { %13938 = vmatpush3.bf16.msra.mxu0 %v15454_v5 }
 0x262   : > { %13960 = vmatpush3.bf16.msra.mxu1 %v15456_v9  ;;  %13939 = vmatprep.subr.bf16.mxu0 %v15457_v12  ;;  %v15492_v9 = vld [vmem:[%s16429_s5 + $0x10a0] sm:$0xff]  }
 0x263   : > { %13961 = vmatprep.subr.bf16.mxu1 %v15459_v17  ;;  %v15498_v17 = vld [vmem:[%s16429_s5 + $0x1030] sm:$0xff]  }
 0x265   : > { %13940 = vmatpush3.bf16.msra.mxu0 %v15458_v14  ;;  %v15495_v14 = vld [vmem:[%s16429_s5 + $0x10e8] sm:$0xff]  }
 0x266   : > { %13962 = vmatpush3.bf16.msra.mxu1 %v15460_v19  ;;  %13941 = vmatprep.subr.bf16.mxu0 %v15461_v22  ;;  %v15500_v19 = vld [vmem:[%s16429_s5 + $0x10b0] sm:$0xff]   ;;  %v15503_v22 = vld [vmem:[%s16429_s5 + $0x10f8] sm:$0xff]  }
 0x267   : > { %v13639_v6 = vpop.f32.mrb[32].mxu0  ;;  %13963 = vmatprep.subr.bf16.mxu1 %v15463_v26  ;;  %v382_v26 = vld [vmem:[%s16453_s15 + $0x200] sm:$0xff] }
 0x268   : > { %v13640_v8 = vpop.f32.mrb[33].mxu0  ;;  %v13661_v13 = vpop.f32.mrb[32].mxu1 }
 0x269   : > { %v13641_v10 = vadd.f32 %v13640_v8, %v13639_v6  ;;  %v13642_v11 = vpop.f32.mrb[34].mxu0  ;;  %v13662_v18 = vpop.f32.mrb[33].mxu1  ;;  %13942 = vmatpush3.bf16.msra.mxu0 %v15462_v24  ;;  %v15491_v6 = vld [vmem:[%s16429_s5 + $0x10e0] sm:$0xff]  }
 0x26a   : > { %v13643_v16 = vpop.f32.mrb[35].mxu0  ;;  %v13663_v20 = vadd.f32 %v13662_v18, %v13661_v13  ;;  %v13664_v21 = vpop.f32.mrb[34].mxu1  ;;  %13964 = vmatpush3.bf16.msra.mxu1 %v15464_v27  ;;  %13943 = vmatprep.subr.bf16.mxu0 %v15465_v28  ;;  %v15493_v11 = vld [vmem:[%s16429_s5 + $0x1068] sm:$0xff]   ;;  %v15499_v18 = vld [vmem:[%s16429_s5 + $0x10f0] sm:$0xff]   ;;  %v517_v27 = vpack.c.bf16 %v382_v26, %v382_v26  ;;  %v15505_v28 = vld [vmem:[%s16429_s5 + $0x1140] sm:$0xff]  }
 0x26b   : > { %v9903_v15 = vadd.f32 %v13641_v10, %v17008_v36  ;;  %v13665_v23 = vpop.f32.mrb[35].mxu1  ;;  %13965 = vmatprep.subr.bf16.mxu1 %v15467_v30  ;;  %v514_v36 = vpack.c.bf16 %v379_v35, %v379_v35  ;;  %v15494_v13 = vld [vmem:[%s16429_s5 + $0x1028] sm:$0xff]   ;;  %v15497_v16 = vld [vmem:[%s16429_s5 + $0x1070] sm:$0xff]   ;;  %v15502_v21 = vld [vmem:[%s16429_s5 + $0x1038] sm:$0xff]  }
 0x26c   : > { %v383_v23 = vld [vmem:[%s16453_s15 + $0x208] sm:$0xff]  ;;  %v15543_v26 = vld [vmem:[%s16429_s5 + $0x12c8] sm:$0xff]  }
 0x26d   : > { %v17048_v25 = vadd.f32 %v13663_v20, %v9903_v15  ;;  %13944 = vmatpush3.bf16.msra.mxu0 %v15466_v29  ;;  %10460 = vmatprep.mubr.bf16.mxu0 %v514_v36  ;;  %v15496_v15 = vld [vmem:[%s16429_s5 + $0x10a8] sm:$0xff]   ;;  %v15501_v20 = vld [vmem:[%s16429_s5 + $0x1078] sm:$0xff]   ;;  %v518_v24 = vpack.c.bf16 %v383_v23, %v383_v23  ;;  %v385_v29 = vld [vmem:[%s16453_s15 + $0x218] sm:$0xff] }
 0x26e   : > { %13966 = vmatpush3.bf16.msra.mxu1 %v15468_v31  ;;  %13945 = vmatprep.subr.bf16.mxu0 %v15469_v32  ;;  %v520_v30 = vpack.c.bf16 %v385_v29, %v385_v29  ;;  %v15506_v31 = vld [vmem:[%s16429_s5 + $0x1100] sm:$0xff]   ;;  %v384_v32 = vld [vmem:[%s16453_s15 + $0x210] sm:$0xff]  ;;  %v15546_v29 = vld [vmem:[%s16429_s5 + $0x1210] sm:$0xff]  }
 0x26f   : > { %13967 = vmatprep.subr.bf16.mxu1 %v15471_v34  ;;  %v15507_v34 = vld [vmem:[%s16429_s5 + $0x11c0] sm:$0xff]   ;;  %v15509_v36 = vld [vmem:[%s16429_s5 + $0x1148] sm:$0xff]  }
 0x270   : > { %v15508_v35 = vld [vmem:[%s16429_s5 + $0x1180] sm:$0xff]  }
 0x271   : > { %13946 = vmatpush3.bf16.msra.mxu0 %v15470_v33  ;;  %v519_v33 = vpack.c.bf16 %v384_v32, %v384_v32  ;;  %v15540_v23 = vld [vmem:[%s16429_s5 + $0x1280] sm:$0xff]   ;;  %v15549_v32 = vld [vmem:[%s16429_s5 + $0x1258] sm:$0xff]  }
 0x272   : > { %13968 = vmatpush3.bf16.msra.mxu1 %v15472_v37  ;;  %13975 = vmatprep.subr.bf16.mxu0 %v15473_v40  ;;  %v15510_v37 = vld [vmem:[%s16429_s5 + $0x1108] sm:$0xff]   ;;  %v15513_v40 = vld [vmem:[%s16429_s5 + $0x1150] sm:$0xff]  }
 0x273   : > { %13997 = vmatprep.subr.bf16.mxu1 %v15475_v46  ;;  %v15518_v46 = vld [vmem:[%s16429_s5 + $0x1118] sm:$0xff]  }
 0x274   : > { %10461 = vmatmul.mubr.bf16.vlgmr.msra.gmra.mrb[60].mxu0 %v513_v39  ;;  %v15512_v39 = vld [vmem:[%s16429_s5 + $0x1188] sm:$0xff]  }
 0x275   : > { %13976 = vmatpush3.bf16.msra.mxu0 %v15474_v43  ;;  %10501 = vmatmul.mubr.bf16.vlgmr.msra.gmra.mrb[60].mxu1 %v515_v45  ;;  %v15516_v43 = vld [vmem:[%s16429_s5 + $0x1190] sm:$0xff]  }
 0x276   : > { %13998 = vmatpush3.bf16.msra.mxu1 %v15476_v47  ;;  %13977 = vmatprep.subr.bf16.mxu0 %v15477_v48  ;;  %v15519_v48 = vld [vmem:[%s16429_s5 + $0x11d8] sm:$0xff]  }
 0x277   : > { %13999 = vmatprep.subr.bf16.mxu1 %v15479_v50  ;;  %10540 = vmatprep.mubr.bf16.mxu0 %v518_v24  ;;  %v15541_v24 = vld [vmem:[%s16429_s5 + $0x1248] sm:$0xff]  }
 0x278   : > { %10580 = vmatprep.mubr.bf16.mxu1 %v520_v30  ;;  %v15547_v30 = vld [vmem:[%s16429_s5 + $0x12d0] sm:$0xff]  }
 0x279   : > { %13978 = vmatpush3.bf16.msra.mxu0 %v15478_v49 }
 0x27a   : > { %14000 = vmatpush3.bf16.msra.mxu1 %v15480_v51  ;;  %13979 = vmatprep.subr.bf16.mxu0 %v15481_v52  ;;  %v15520_v51 = vld [vmem:[%s16429_s5 + $0x1198] sm:$0xff]  }
 0x27b   : > { %14001 = vmatprep.subr.bf16.mxu1 %v15483_v54 }
 0x27d   : > { %13980 = vmatpush3.bf16.msra.mxu0 %v15482_v53  ;;  %v15521_v53 = vld [vmem:[%s16429_s5 + $0x1160] sm:$0xff]  }
 0x27e   : > { %14002 = vmatpush3.bf16.msra.mxu1 %v15484_v55  ;;  %13981 = vmatprep.subr.bf16.mxu0 %v15485_v56  ;;  %v15522_v56 = vld [vmem:[%s16429_s5 + $0x1120] sm:$0xff]  }
 0x27f   : > { %14003 = vmatprep.subr.bf16.mxu1 %v15487_v60 }
 0x281   : > { %13982 = vmatpush3.bf16.msra.mxu0 %v15486_v58  ;;  %v15523_v58 = vld [vmem:[%s16429_s5 + $0x11e0] sm:$0xff]  }
 0x282   : > { %14004 = vmatpush3.bf16.msra.mxu1 %v15488_v63  ;;  %13983 = vmatprep.subr.bf16.mxu0 %v15489_v1  ;;  %v15525_v63 = vld [vmem:[%s16429_s5 + $0x1168] sm:$0xff]  }
 0x283   : > { %14005 = vmatprep.subr.bf16.mxu1 %v15491_v6  ;;  %v15526_v1 = vld [vmem:[%s16429_s5 + $0x1128] sm:$0xff]   ;;  %v15531_v6 = vld [vmem:[%s16429_s5 + $0x11f0] sm:$0xff]  }
 0x285   : > { %13984 = vmatpush3.bf16.msra.mxu0 %v15490_v4  ;;  %v15529_v4 = vld [vmem:[%s16429_s5 + $0x1170] sm:$0xff]  }
 0x286   : > { %14006 = vmatpush3.bf16.msra.mxu1 %v15492_v9  ;;  %13985 = vmatprep.subr.bf16.mxu0 %v15493_v11  ;;  %v15534_v9 = vld [vmem:[%s16429_s5 + $0x1138] sm:$0xff]   ;;  %v387_v11 = vld [vmem:[%s16453_s15 + $0x228] sm:$0xff] }
 0x287   : > { %v13683_v57 = vpop.f32.mrb[36].mxu0  ;;  %14007 = vmatprep.subr.bf16.mxu1 %v15495_v14  ;;  %v386_v14 = vld [vmem:[%s16453_s15 + $0x220] sm:$0xff] }
 0x288   : > { %v13684_v59 = vpop.f32.mrb[37].mxu0  ;;  %v13705_v0 = vpop.f32.mrb[36].mxu1 }
 0x289   : > { %v13685_v61 = vadd.f32 %v13684_v59, %v13683_v57  ;;  %v13686_v62 = vpop.f32.mrb[38].mxu0  ;;  %v13706_v5 = vpop.f32.mrb[37].mxu1  ;;  %13986 = vmatpush3.bf16.msra.mxu0 %v15494_v13  ;;  %v15536_v13 = vld [vmem:[%s16429_s5 + $0x11b8] sm:$0xff]  }
 0x28a   : > { %v13687_v3 = vpop.f32.mrb[39].mxu0  ;;  %v13707_v7 = vadd.f32 %v13706_v5, %v13705_v0  ;;  %v13708_v8 = vpop.f32.mrb[38].mxu1  ;;  %14008 = vmatpush3.bf16.msra.mxu1 %v15496_v15  ;;  %13987 = vmatprep.subr.bf16.mxu0 %v15497_v16  ;;  %v15530_v5 = vld [vmem:[%s16429_s5 + $0x1130] sm:$0xff]   ;;  %v521_v15 = vpack.c.bf16 %v386_v14, %v386_v14  ;;  %v15537_v16 = vld [vmem:[%s16429_s5 + $0x1240] sm:$0xff]   ;;  %v15575_v14 = vld [vmem:[%s16429_s5 + $0x13c8] sm:$0xff]  }
 0x28b   : > { %v9983_v2 = vadd.f32 %v13685_v61, %v17048_v25  ;;  %v13709_v10 = vpop.f32.mrb[39].mxu1  ;;  %14009 = vmatprep.subr.bf16.mxu1 %v15499_v18  ;;  %v15504_v25 = vld [vmem:[%s16429_s5 + $0x10b8] sm:$0xff]   ;;  %v15524_v61 = vld [vmem:[%s16429_s5 + $0x11a0] sm:$0xff]   ;;  %v15528_v3 = vld [vmem:[%s16429_s5 + $0x11a8] sm:$0xff]  }
 0x28c   : > { %v15533_v8 = vld [vmem:[%s16429_s5 + $0x1178] sm:$0xff]  }
 0x28d   : > { %v17086_v12 = vadd.f32 %v13707_v7, %v9983_v2  ;;  %13988 = vmatpush3.bf16.msra.mxu0 %v15498_v17  ;;  %v15527_v2 = vld [vmem:[%s16429_s5 + $0x11e8] sm:$0xff]   ;;  %v15532_v7 = vld [vmem:[%s16429_s5 + $0x11b0] sm:$0xff]   ;;  %v15535_v10 = vld [vmem:[%s16429_s5 + $0x11f8] sm:$0xff]  }
 0x28e   : > { %14010 = vmatpush3.bf16.msra.mxu1 %v15500_v19  ;;  %13989 = vmatprep.subr.bf16.mxu0 %v15501_v20  ;;  %v389_v17 = vld [vmem:[%s16453_s15 + $0x238] sm:$0xff]  ;;  %v15538_v19 = vld [vmem:[%s16429_s5 + $0x1200] sm:$0xff]   ;;  %v388_v20 = vld [vmem:[%s16453_s15 + $0x230] sm:$0xff] }
 0x28f   : > { %14011 = vmatprep.subr.bf16.mxu1 %v15503_v22  ;;  %v524_v18 = vpack.c.bf16 %v389_v17, %v389_v17  ;;  %v15539_v22 = vld [vmem:[%s16429_s5 + $0x12c0] sm:$0xff]   ;;  %v15578_v17 = vld [vmem:[%s16429_s5 + $0x1310] sm:$0xff]  }
 0x291   : > { %13990 = vmatpush3.bf16.msra.mxu0 %v15502_v21  ;;  %v523_v21 = vpack.c.bf16 %v388_v20, %v388_v20  ;;  %v15581_v20 = vld [vmem:[%s16429_s5 + $0x1358] sm:$0xff]  }
 0x292   : > { %14012 = vmatpush3.bf16.msra.mxu1 %v15504_v25  ;;  %14019 = vmatprep.subr.bf16.mxu0 %v15505_v28  ;;  %v15542_v25 = vld [vmem:[%s16429_s5 + $0x1208] sm:$0xff]   ;;  %v15545_v28 = vld [vmem:[%s16429_s5 + $0x1250] sm:$0xff]  }
 0x293   : > { %14041 = vmatprep.subr.bf16.mxu1 %v15507_v34 }
 0x294   : > { %10541 = vmatmul.mubr.bf16.vlgmr.msra.gmra.mrb[64].mxu0 %v517_v27  ;;  %v15544_v27 = vld [vmem:[%s16429_s5 + $0x1288] sm:$0xff]  }
 0x295   : > { %14020 = vmatpush3.bf16.msra.mxu0 %v15506_v31  ;;  %10581 = vmatmul.mubr.bf16.vlgmr.msra.gmra.mrb[64].mxu1 %v519_v33  ;;  %v15548_v31 = vld [vmem:[%s16429_s5 + $0x1290] sm:$0xff]   ;;  %v15550_v33 = vld [vmem:[%s16429_s5 + $0x1218] sm:$0xff]  }
 0x296   : > { %14042 = vmatpush3.bf16.msra.mxu1 %v15508_v35  ;;  %14021 = vmatprep.subr.bf16.mxu0 %v15509_v36  ;;  %v15551_v35 = vld [vmem:[%s16429_s5 + $0x12d8] sm:$0xff]  }
 0x297   : > { %14043 = vmatprep.subr.bf16.mxu1 %v15511_v38  ;;  %10660 = vmatprep.mubr.bf16.mxu1 %v524_v18  ;;  %v15579_v18 = vld [vmem:[%s16429_s5 + $0x13d0] sm:$0xff]  }
 0x299   : > { %14022 = vmatpush3.bf16.msra.mxu0 %v15510_v37  ;;  %v15552_v37 = vld [vmem:[%s16429_s5 + $0x1298] sm:$0xff]  }
 0x29a   : > { %14044 = vmatpush3.bf16.msra.mxu1 %v15512_v39  ;;  %14023 = vmatprep.subr.bf16.mxu0 %v15513_v40  ;;  %v15553_v40 = vld [vmem:[%s16429_s5 + $0x1260] sm:$0xff]  }
 0x29b   : > { %14045 = vmatprep.subr.bf16.mxu1 %v15515_v42  ;;  %v15554_v42 = vld [vmem:[%s16429_s5 + $0x1220] sm:$0xff]  }
 0x29d   : > { %14024 = vmatpush3.bf16.msra.mxu0 %v15514_v41 }
 0x29e   : > { %14046 = vmatpush3.bf16.msra.mxu1 %v15516_v43  ;;  %14025 = vmatprep.subr.bf16.mxu0 %v15517_v44 }
 0x29f   : > { %14047 = vmatprep.subr.bf16.mxu1 %v15519_v48 }
 0x2a1   : > { %14026 = vmatpush3.bf16.msra.mxu0 %v15518_v46 }
 0x2a2   : > { %14048 = vmatpush3.bf16.msra.mxu1 %v15520_v51  ;;  %14027 = vmatprep.subr.bf16.mxu0 %v15521_v53 }
 0x2a3   : > { %14049 = vmatprep.subr.bf16.mxu1 %v15523_v58  ;;  %v15563_v58 = vld [vmem:[%s16429_s5 + $0x12f0] sm:$0xff]  }
 0x2a5   : > { %14028 = vmatpush3.bf16.msra.mxu0 %v15522_v56  ;;  %v15561_v56 = vld [vmem:[%s16429_s5 + $0x1270] sm:$0xff]  }
 0x2a6   : > { %14050 = vmatpush3.bf16.msra.mxu1 %v15524_v61  ;;  %14029 = vmatprep.subr.bf16.mxu0 %v15525_v63  ;;  %v15566_v61 = vld [vmem:[%s16429_s5 + $0x1238] sm:$0xff]   ;;  %v391_v63 = vld [vmem:[%s16453_s15 + $0x248] sm:$0xff] }
 0x2a7   : > { %v13727_v45 = vpop.f32.mrb[40].mxu0  ;;  %14051 = vmatprep.subr.bf16.mxu1 %v15527_v2  ;;  %v390_v2 = vld [vmem:[%s16453_s15 + $0x240] sm:$0xff] }
 0x2a8   : > { %v13728_v47 = vpop.f32.mrb[41].mxu0  ;;  %v13749_v52 = vpop.f32.mrb[40].mxu1 }
 0x2a9   : > { %v13729_v49 = vadd.f32 %v13728_v47, %v13727_v45  ;;  %v13730_v50 = vpop.f32.mrb[42].mxu0  ;;  %v13750_v57 = vpop.f32.mrb[41].mxu1  ;;  %14030 = vmatpush3.bf16.msra.mxu0 %v15526_v1  ;;  %v15555_v45 = vld [vmem:[%s16429_s5 + $0x12e0] sm:$0xff]   ;;  %v15568_v1 = vld [vmem:[%s16429_s5 + $0x12b8] sm:$0xff]  }
 0x2aa   : > { %v13731_v55 = vpop.f32.mrb[43].mxu0  ;;  %v13751_v59 = vadd.f32 %v13750_v57, %v13749_v52  ;;  %v13752_v60 = vpop.f32.mrb[42].mxu1  ;;  %14052 = vmatpush3.bf16.msra.mxu1 %v15528_v3  ;;  %14031 = vmatprep.subr.bf16.mxu0 %v15529_v4  ;;  %v15556_v47 = vld [vmem:[%s16429_s5 + $0x12a0] sm:$0xff]   ;;  %v15557_v50 = vld [vmem:[%s16429_s5 + $0x1268] sm:$0xff]   ;;  %v15562_v57 = vld [vmem:[%s16429_s5 + $0x1230] sm:$0xff]   ;;  %v525_v3 = vpack.c.bf16 %v390_v2, %v390_v2 }
 0x2ab   : > { %v10063_v54 = vadd.f32 %v13729_v49, %v17086_v12  ;;  %v13753_v62 = vpop.f32.mrb[43].mxu1  ;;  %14053 = vmatprep.subr.bf16.mxu1 %v15531_v6  ;;  %v522_v12 = vpack.c.bf16 %v387_v11, %v387_v11  ;;  %v15558_v52 = vld [vmem:[%s16429_s5 + $0x1228] sm:$0xff]   ;;  %v15565_v60 = vld [vmem:[%s16429_s5 + $0x1278] sm:$0xff]   ;;  %v15569_v4 = vld [vmem:[%s16429_s5 + $0x1340] sm:$0xff]  }
 0x2ac   : > { %v15560_v55 = vld [vmem:[%s16429_s5 + $0x12a8] sm:$0xff]   ;;  %v15567_v62 = vld [vmem:[%s16429_s5 + $0x12f8] sm:$0xff]   ;;  %v15572_v11 = vld [vmem:[%s16429_s5 + $0x1380] sm:$0xff]  }
 0x2ad   : > { %v17125_v0 = vadd.f32 %v13751_v59, %v10063_v54  ;;  %14032 = vmatpush3.bf16.msra.mxu0 %v15530_v5  ;;  %10620 = vmatprep.mubr.bf16.mxu0 %v522_v12  ;;  %v15559_v54 = vld [vmem:[%s16429_s5 + $0x12e8] sm:$0xff]   ;;  %v15564_v59 = vld [vmem:[%s16429_s5 + $0x12b0] sm:$0xff]  }
 0x2ae   : > { %14054 = vmatpush3.bf16.msra.mxu1 %v15532_v7  ;;  %14033 = vmatprep.subr.bf16.mxu0 %v15533_v8  ;;  %v393_v5 = vld [vmem:[%s16453_s15 + $0x258] sm:$0xff]  ;;  %v15570_v7 = vld [vmem:[%s16429_s5 + $0x1300] sm:$0xff]   ;;  %v392_v8 = vld [vmem:[%s16453_s15 + $0x250] sm:$0xff] }
 0x2af   : > { %14055 = vmatprep.subr.bf16.mxu1 %v15535_v10  ;;  %v528_v6 = vpack.c.bf16 %v393_v5, %v393_v5  ;;  %v15571_v10 = vld [vmem:[%s16429_s5 + $0x13c0] sm:$0xff]   ;;  %v15573_v12 = vld [vmem:[%s16429_s5 + $0x1348] sm:$0xff]   ;;  %v15610_v5 = vld [vmem:[%s16429_s5 + $0x1410] sm:$0xff]  }
 0x2b0   : > { %v15607_v2 = vld [vmem:[%s16429_s5 + $0x14c8] sm:$0xff]  }
 0x2b1   : > { %14034 = vmatpush3.bf16.msra.mxu0 %v15534_v9  ;;  %v527_v9 = vpack.c.bf16 %v392_v8, %v392_v8  ;;  %v15613_v8 = vld [vmem:[%s16429_s5 + $0x1458] sm:$0xff]  }
 0x2b2   : > { %14056 = vmatpush3.bf16.msra.mxu1 %v15536_v13  ;;  %14063 = vmatprep.subr.bf16.mxu0 %v15537_v16  ;;  %v15574_v13 = vld [vmem:[%s16429_s5 + $0x1308] sm:$0xff]   ;;  %v15577_v16 = vld [vmem:[%s16429_s5 + $0x1350] sm:$0xff]  }
 0x2b3   : > { %14085 = vmatprep.subr.bf16.mxu1 %v15539_v22  ;;  %v15582_v22 = vld [vmem:[%s16429_s5 + $0x1318] sm:$0xff]  }
 0x2b4   : > { %10621 = vmatmul.mubr.bf16.vlgmr.msra.gmra.mrb[68].mxu0 %v521_v15  ;;  %v15576_v15 = vld [vmem:[%s16429_s5 + $0x1388] sm:$0xff]  }
 0x2b5   : > { %14064 = vmatpush3.bf16.msra.mxu0 %v15538_v19  ;;  %10661 = vmatmul.mubr.bf16.vlgmr.msra.gmra.mrb[68].mxu1 %v523_v21  ;;  %v15580_v19 = vld [vmem:[%s16429_s5 + $0x1390] sm:$0xff]  }
 0x2b6   : > { %14086 = vmatpush3.bf16.msra.mxu1 %v15540_v23  ;;  %14065 = vmatprep.subr.bf16.mxu0 %v15541_v24  ;;  %v15583_v24 = vld [vmem:[%s16429_s5 + $0x13d8] sm:$0xff]  }
 0x2b7   : > { %14087 = vmatprep.subr.bf16.mxu1 %v15543_v26  ;;  %10740 = vmatprep.mubr.bf16.mxu1 %v528_v6  ;;  %v15611_v6 = vld [vmem:[%s16429_s5 + $0x14d0] sm:$0xff]  }
 0x2b9   : > { %14066 = vmatpush3.bf16.msra.mxu0 %v15542_v25 }
 0x2ba   : > { %14088 = vmatpush3.bf16.msra.mxu1 %v15544_v27  ;;  %14067 = vmatprep.subr.bf16.mxu0 %v15545_v28  ;;  %v15584_v27 = vld [vmem:[%s16429_s5 + $0x1398] sm:$0xff]  }
 0x2bb   : > { %14089 = vmatprep.subr.bf16.mxu1 %v15547_v30 }
 0x2bd   : > { %14068 = vmatpush3.bf16.msra.mxu0 %v15546_v29  ;;  %v15585_v29 = vld [vmem:[%s16429_s5 + $0x1360] sm:$0xff]  }
 0x2be   : > { %14090 = vmatpush3.bf16.msra.mxu1 %v15548_v31  ;;  %14069 = vmatprep.subr.bf16.mxu0 %v15549_v32  ;;  %v15586_v32 = vld [vmem:[%s16429_s5 + $0x1320] sm:$0xff]  }
 0x2bf   : > { %14091 = vmatprep.subr.bf16.mxu1 %v15551_v35 }
 0x2c1   : > { %14070 = vmatpush3.bf16.msra.mxu0 %v15550_v33 }
 0x2c2   : > { %14092 = vmatpush3.bf16.msra.mxu1 %v15552_v37  ;;  %14071 = vmatprep.subr.bf16.mxu0 %v15553_v40  ;;  %v15588_v37 = vld [vmem:[%s16429_s5 + $0x13a0] sm:$0xff]  }
 0x2c3   : > { %14093 = vmatprep.subr.bf16.mxu1 %v15555_v45  ;;  %v15594_v45 = vld [vmem:[%s16429_s5 + $0x1330] sm:$0xff]  }
 0x2c5   : > { %14072 = vmatpush3.bf16.msra.mxu0 %v15554_v42  ;;  %v15591_v42 = vld [vmem:[%s16429_s5 + $0x13e8] sm:$0xff]  }
 0x2c6   : > { %14094 = vmatpush3.bf16.msra.mxu1 %v15556_v47  ;;  %14073 = vmatprep.subr.bf16.mxu0 %v15557_v50  ;;  %v15596_v47 = vld [vmem:[%s16429_s5 + $0x13b0] sm:$0xff]   ;;  %v15599_v50 = vld [vmem:[%s16429_s5 + $0x13f8] sm:$0xff]  }
 0x2c7   : > { %v13771_v34 = vpop.f32.mrb[44].mxu0  ;;  %14095 = vmatprep.subr.bf16.mxu1 %v15559_v54  ;;  %v394_v54 = vld [vmem:[%s16453_s15 + $0x260] sm:$0xff] }
 0x2c8   : > { %v13772_v36 = vpop.f32.mrb[45].mxu0  ;;  %v13793_v41 = vpop.f32.mrb[44].mxu1 }
 0x2c9   : > { %v13773_v38 = vadd.f32 %v13772_v36, %v13771_v34  ;;  %v13774_v39 = vpop.f32.mrb[46].mxu0  ;;  %v13794_v46 = vpop.f32.mrb[45].mxu1  ;;  %14074 = vmatpush3.bf16.msra.mxu0 %v15558_v52  ;;  %v15587_v34 = vld [vmem:[%s16429_s5 + $0x13e0] sm:$0xff]  }
 0x2ca   : > { %v13775_v44 = vpop.f32.mrb[47].mxu0  ;;  %v13795_v48 = vadd.f32 %v13794_v46, %v13793_v41  ;;  %v13796_v49 = vpop.f32.mrb[46].mxu1  ;;  %14096 = vmatpush3.bf16.msra.mxu1 %v15560_v55  ;;  %14075 = vmatprep.subr.bf16.mxu0 %v15561_v56  ;;  %v15589_v39 = vld [vmem:[%s16429_s5 + $0x1368] sm:$0xff]   ;;  %v15595_v46 = vld [vmem:[%s16429_s5 + $0x13f0] sm:$0xff]   ;;  %v529_v55 = vpack.c.bf16 %v394_v54, %v394_v54  ;;  %v15601_v56 = vld [vmem:[%s16429_s5 + $0x1440] sm:$0xff]  }
 0x2cb   : > { %v10143_v43 = vadd.f32 %v13773_v38, %v17125_v0  ;;  %v13797_v51 = vpop.f32.mrb[47].mxu1  ;;  %14097 = vmatprep.subr.bf16.mxu1 %v15563_v58  ;;  %v526_v0 = vpack.c.bf16 %v391_v63, %v391_v63  ;;  %v15590_v41 = vld [vmem:[%s16429_s5 + $0x1328] sm:$0xff]   ;;  %v15593_v44 = vld [vmem:[%s16429_s5 + $0x1370] sm:$0xff]   ;;  %v15598_v49 = vld [vmem:[%s16429_s5 + $0x1338] sm:$0xff]  }
 0x2cc   : > { %v395_v51 = vld [vmem:[%s16453_s15 + $0x268] sm:$0xff]  ;;  %v15639_v54 = vld [vmem:[%s16429_s5 + $0x15c8] sm:$0xff]  }
 0x2cd   : > { %v17165_v53 = vadd.f32 %v13795_v48, %v10143_v43  ;;  %14076 = vmatpush3.bf16.msra.mxu0 %v15562_v57  ;;  %10700 = vmatprep.mubr.bf16.mxu0 %v526_v0  ;;  %v15592_v43 = vld [vmem:[%s16429_s5 + $0x13a8] sm:$0xff]   ;;  %v15597_v48 = vld [vmem:[%s16429_s5 + $0x1378] sm:$0xff]   ;;  %v530_v52 = vpack.c.bf16 %v395_v51, %v395_v51  ;;  %v397_v57 = vld [vmem:[%s16453_s15 + $0x278] sm:$0xff] }
 0x2ce   : > { %14098 = vmatpush3.bf16.msra.mxu1 %v15564_v59  ;;  %14077 = vmatprep.subr.bf16.mxu0 %v15565_v60  ;;  %v532_v58 = vpack.c.bf16 %v397_v57, %v397_v57  ;;  %v15602_v59 = vld [vmem:[%s16429_s5 + $0x1400] sm:$0xff]   ;;  %v396_v60 = vld [vmem:[%s16453_s15 + $0x270] sm:$0xff]  ;;  %v15642_v57 = vld [vmem:[%s16429_s5 + $0x1510] sm:$0xff]  }
 0x2cf   : > { %14099 = vmatprep.subr.bf16.mxu1 %v15567_v62  ;;  %v15603_v62 = vld [vmem:[%s16429_s5 + $0x14c0] sm:$0xff]   ;;  %v15605_v0 = vld [vmem:[%s16429_s5 + $0x1448] sm:$0xff]  }
 0x2d0   : > { %v15604_v63 = vld [vmem:[%s16429_s5 + $0x1480] sm:$0xff]  }
 0x2d1   : > { %14078 = vmatpush3.bf16.msra.mxu0 %v15566_v61  ;;  %v531_v61 = vpack.c.bf16 %v396_v60, %v396_v60  ;;  %v15636_v51 = vld [vmem:[%s16429_s5 + $0x1580] sm:$0xff]   ;;  %v15645_v60 = vld [vmem:[%s16429_s5 + $0x1558] sm:$0xff]  }
 0x2d2   : > { %14100 = vmatpush3.bf16.msra.mxu1 %v15568_v1  ;;  %14107 = vmatprep.subr.bf16.mxu0 %v15569_v4  ;;  %v15606_v1 = vld [vmem:[%s16429_s5 + $0x1408] sm:$0xff]   ;;  %v15609_v4 = vld [vmem:[%s16429_s5 + $0x1450] sm:$0xff]  }
 0x2d3   : > { %14129 = vmatprep.subr.bf16.mxu1 %v15571_v10  ;;  %v15614_v10 = vld [vmem:[%s16429_s5 + $0x1418] sm:$0xff]  }
 0x2d4   : > { %10701 = vmatmul.mubr.bf16.vlgmr.msra.gmra.mrb[72].mxu0 %v525_v3  ;;  %v15608_v3 = vld [vmem:[%s16429_s5 + $0x1488] sm:$0xff]  }
 0x2d5   : > { %14108 = vmatpush3.bf16.msra.mxu0 %v15570_v7  ;;  %10741 = vmatmul.mubr.bf16.vlgmr.msra.gmra.mrb[72].mxu1 %v527_v9  ;;  %v15612_v7 = vld [vmem:[%s16429_s5 + $0x1490] sm:$0xff]  }
 0x2d6   : > { %14130 = vmatpush3.bf16.msra.mxu1 %v15572_v11  ;;  %14109 = vmatprep.subr.bf16.mxu0 %v15573_v12  ;;  %v15615_v12 = vld [vmem:[%s16429_s5 + $0x14d8] sm:$0xff]  }
 0x2d7   : > { %14131 = vmatprep.subr.bf16.mxu1 %v15575_v14  ;;  %10780 = vmatprep.mubr.bf16.mxu0 %v530_v52  ;;  %v15637_v52 = vld [vmem:[%s16429_s5 + $0x1548] sm:$0xff]  }
 0x2d8   : > { %10820 = vmatprep.mubr.bf16.mxu1 %v532_v58  ;;  %v15643_v58 = vld [vmem:[%s16429_s5 + $0x15d0] sm:$0xff]  }
 0x2d9   : > { %14110 = vmatpush3.bf16.msra.mxu0 %v15574_v13 }
 0x2da   : > { %14132 = vmatpush3.bf16.msra.mxu1 %v15576_v15  ;;  %14111 = vmatprep.subr.bf16.mxu0 %v15577_v16  ;;  %v15616_v15 = vld [vmem:[%s16429_s5 + $0x1498] sm:$0xff]  }
 0x2db   : > { %14133 = vmatprep.subr.bf16.mxu1 %v15579_v18 }
 0x2dd   : > { %14112 = vmatpush3.bf16.msra.mxu0 %v15578_v17  ;;  %v15617_v17 = vld [vmem:[%s16429_s5 + $0x1460] sm:$0xff]  }
 0x2de   : > { %14134 = vmatpush3.bf16.msra.mxu1 %v15580_v19  ;;  %14113 = vmatprep.subr.bf16.mxu0 %v15581_v20  ;;  %v15618_v20 = vld [vmem:[%s16429_s5 + $0x1420] sm:$0xff]  }
 0x2df   : > { %14135 = vmatprep.subr.bf16.mxu1 %v15583_v24 }
 0x2e1   : > { %14114 = vmatpush3.bf16.msra.mxu0 %v15582_v22  ;;  %v15619_v22 = vld [vmem:[%s16429_s5 + $0x14e0] sm:$0xff]  }
 0x2e2   : > { %14136 = vmatpush3.bf16.msra.mxu1 %v15584_v27  ;;  %14115 = vmatprep.subr.bf16.mxu0 %v15585_v29  ;;  %v15621_v27 = vld [vmem:[%s16429_s5 + $0x1468] sm:$0xff]  }
 0x2e3   : > { %14137 = vmatprep.subr.bf16.mxu1 %v15587_v34  ;;  %v15622_v29 = vld [vmem:[%s16429_s5 + $0x1428] sm:$0xff]   ;;  %v15627_v34 = vld [vmem:[%s16429_s5 + $0x14f0] sm:$0xff]  }
 0x2e5   : > { %14116 = vmatpush3.bf16.msra.mxu0 %v15586_v32  ;;  %v15625_v32 = vld [vmem:[%s16429_s5 + $0x1470] sm:$0xff]  }
 0x2e6   : > { %14138 = vmatpush3.bf16.msra.mxu1 %v15588_v37  ;;  %14117 = vmatprep.subr.bf16.mxu0 %v15589_v39  ;;  %v15630_v37 = vld [vmem:[%s16429_s5 + $0x1438] sm:$0xff]   ;;  %v399_v39 = vld [vmem:[%s16453_s15 + $0x288] sm:$0xff] }
 0x2e7   : > { %v13815_v21 = vpop.f32.mrb[48].mxu0  ;;  %14139 = vmatprep.subr.bf16.mxu1 %v15591_v42  ;;  %v398_v42 = vld [vmem:[%s16453_s15 + $0x280] sm:$0xff] }
 0x2e8   : > { %v13816_v23 = vpop.f32.mrb[49].mxu0  ;;  %v13837_v28 = vpop.f32.mrb[48].mxu1 }
 0x2e9   : > { %v13817_v25 = vadd.f32 %v13816_v23, %v13815_v21  ;;  %v13818_v26 = vpop.f32.mrb[50].mxu0  ;;  %v13838_v33 = vpop.f32.mrb[49].mxu1  ;;  %14118 = vmatpush3.bf16.msra.mxu0 %v15590_v41  ;;  %v15632_v41 = vld [vmem:[%s16429_s5 + $0x14b8] sm:$0xff]  }
 0x2ea   : > { %v13819_v31 = vpop.f32.mrb[51].mxu0  ;;  %v13839_v35 = vadd.f32 %v13838_v33, %v13837_v28  ;;  %v13840_v36 = vpop.f32.mrb[50].mxu1  ;;  %14140 = vmatpush3.bf16.msra.mxu1 %v15592_v43  ;;  %14119 = vmatprep.subr.bf16.mxu0 %v15593_v44  ;;  %v15626_v33 = vld [vmem:[%s16429_s5 + $0x1430] sm:$0xff]   ;;  %v533_v43 = vpack.c.bf16 %v398_v42, %v398_v42  ;;  %v15633_v44 = vld [vmem:[%s16429_s5 + $0x1540] sm:$0xff]   ;;  %v15671_v42 = vld [vmem:[%s16429_s5 + $0x16c8] sm:$0xff]  }
 0x2eb   : > { %v10223_v30 = vadd.f32 %v13817_v25, %v17165_v53  ;;  %v13841_v38 = vpop.f32.mrb[51].mxu1  ;;  %14141 = vmatprep.subr.bf16.mxu1 %v15595_v46  ;;  %v15600_v53 = vld [vmem:[%s16429_s5 + $0x13b8] sm:$0xff]   ;;  %v15620_v25 = vld [vmem:[%s16429_s5 + $0x14a0] sm:$0xff]   ;;  %v15624_v31 = vld [vmem:[%s16429_s5 + $0x14a8] sm:$0xff]  }
 0x2ec   : > { %v15629_v36 = vld [vmem:[%s16429_s5 + $0x1478] sm:$0xff]  }
 0x2ed   : > { %v17203_v40 = vadd.f32 %v13839_v35, %v10223_v30  ;;  %14120 = vmatpush3.bf16.msra.mxu0 %v15594_v45  ;;  %v15623_v30 = vld [vmem:[%s16429_s5 + $0x14e8] sm:$0xff]   ;;  %v15628_v35 = vld [vmem:[%s16429_s5 + $0x14b0] sm:$0xff]   ;;  %v15631_v38 = vld [vmem:[%s16429_s5 + $0x14f8] sm:$0xff]  }
 0x2ee   : > { %14142 = vmatpush3.bf16.msra.mxu1 %v15596_v47  ;;  %14121 = vmatprep.subr.bf16.mxu0 %v15597_v48  ;;  %v401_v45 = vld [vmem:[%s16453_s15 + $0x298] sm:$0xff]  ;;  %v15634_v47 = vld [vmem:[%s16429_s5 + $0x1500] sm:$0xff]   ;;  %v400_v48 = vld [vmem:[%s16453_s15 + $0x290] sm:$0xff] }
 0x2ef   : > { %14143 = vmatprep.subr.bf16.mxu1 %v15599_v50  ;;  %v536_v46 = vpack.c.bf16 %v401_v45, %v401_v45  ;;  %v15635_v50 = vld [vmem:[%s16429_s5 + $0x15c0] sm:$0xff]   ;;  %v15674_v45 = vld [vmem:[%s16429_s5 + $0x1610] sm:$0xff]  }
 0x2f1   : > { %14122 = vmatpush3.bf16.msra.mxu0 %v15598_v49  ;;  %v535_v49 = vpack.c.bf16 %v400_v48, %v400_v48  ;;  %v15677_v48 = vld [vmem:[%s16429_s5 + $0x1658] sm:$0xff]  }
 0x2f2   : > { %14144 = vmatpush3.bf16.msra.mxu1 %v15600_v53  ;;  %14151 = vmatprep.subr.bf16.mxu0 %v15601_v56  ;;  %v15638_v53 = vld [vmem:[%s16429_s5 + $0x1508] sm:$0xff]   ;;  %v15641_v56 = vld [vmem:[%s16429_s5 + $0x1550] sm:$0xff]  }
 0x2f3   : > { %14173 = vmatprep.subr.bf16.mxu1 %v15603_v62 }
 0x2f4   : > { %10781 = vmatmul.mubr.bf16.vlgmr.msra.gmra.mrb[76].mxu0 %v529_v55  ;;  %v15640_v55 = vld [vmem:[%s16429_s5 + $0x1588] sm:$0xff]  }
 0x2f5   : > { %14152 = vmatpush3.bf16.msra.mxu0 %v15602_v59  ;;  %10821 = vmatmul.mubr.bf16.vlgmr.msra.gmra.mrb[76].mxu1 %v531_v61  ;;  %v15644_v59 = vld [vmem:[%s16429_s5 + $0x1590] sm:$0xff]   ;;  %v15646_v61 = vld [vmem:[%s16429_s5 + $0x1518] sm:$0xff]  }
 0x2f6   : > { %14174 = vmatpush3.bf16.msra.mxu1 %v15604_v63  ;;  %14153 = vmatprep.subr.bf16.mxu0 %v15605_v0  ;;  %v15647_v63 = vld [vmem:[%s16429_s5 + $0x15d8] sm:$0xff]  }
 0x2f7   : > { %14175 = vmatprep.subr.bf16.mxu1 %v15607_v2  ;;  %10900 = vmatprep.mubr.bf16.mxu1 %v536_v46  ;;  %v15675_v46 = vld [vmem:[%s16429_s5 + $0x16d0] sm:$0xff]  }
 0x2f9   : > { %14154 = vmatpush3.bf16.msra.mxu0 %v15606_v1  ;;  %v15648_v1 = vld [vmem:[%s16429_s5 + $0x1598] sm:$0xff]  }
 0x2fa   : > { %14176 = vmatpush3.bf16.msra.mxu1 %v15608_v3  ;;  %14155 = vmatprep.subr.bf16.mxu0 %v15609_v4  ;;  %v15649_v4 = vld [vmem:[%s16429_s5 + $0x1560] sm:$0xff]  }
 0x2fb   : > { %14177 = vmatprep.subr.bf16.mxu1 %v15611_v6  ;;  %v15650_v6 = vld [vmem:[%s16429_s5 + $0x1520] sm:$0xff]  }
 0x2fd   : > { %14156 = vmatpush3.bf16.msra.mxu0 %v15610_v5 }
 0x2fe   : > { %14178 = vmatpush3.bf16.msra.mxu1 %v15612_v7  ;;  %14157 = vmatprep.subr.bf16.mxu0 %v15613_v8 }
 0x2ff   : > { %14179 = vmatprep.subr.bf16.mxu1 %v15615_v12 }
 0x301   : > { %14158 = vmatpush3.bf16.msra.mxu0 %v15614_v10 }
 0x302   : > { %14180 = vmatpush3.bf16.msra.mxu1 %v15616_v15  ;;  %14159 = vmatprep.subr.bf16.mxu0 %v15617_v17 }
 0x303   : > { %14181 = vmatprep.subr.bf16.mxu1 %v15619_v22  ;;  %v15659_v22 = vld [vmem:[%s16429_s5 + $0x15f0] sm:$0xff]  }
 0x305   : > { %14160 = vmatpush3.bf16.msra.mxu0 %v15618_v20  ;;  %v15657_v20 = vld [vmem:[%s16429_s5 + $0x1570] sm:$0xff]  }
 0x306   : > { %14182 = vmatpush3.bf16.msra.mxu1 %v15620_v25  ;;  %14161 = vmatprep.subr.bf16.mxu0 %v15621_v27  ;;  %v15662_v25 = vld [vmem:[%s16429_s5 + $0x1538] sm:$0xff]   ;;  %v403_v27 = vld [vmem:[%s16453_s15 + $0x2a8] sm:$0xff] }
 0x307   : > { %v13859_v9 = vpop.f32.mrb[52].mxu0  ;;  %14183 = vmatprep.subr.bf16.mxu1 %v15623_v30  ;;  %v402_v30 = vld [vmem:[%s16453_s15 + $0x2a0] sm:$0xff] }
 0x308   : > { %v13860_v11 = vpop.f32.mrb[53].mxu0  ;;  %v13881_v16 = vpop.f32.mrb[52].mxu1 }
 0x309   : > { %v13861_v13 = vadd.f32 %v13860_v11, %v13859_v9  ;;  %v13862_v14 = vpop.f32.mrb[54].mxu0  ;;  %v13882_v21 = vpop.f32.mrb[53].mxu1  ;;  %14162 = vmatpush3.bf16.msra.mxu0 %v15622_v29  ;;  %v15651_v9 = vld [vmem:[%s16429_s5 + $0x15e0] sm:$0xff]   ;;  %v15664_v29 = vld [vmem:[%s16429_s5 + $0x15b8] sm:$0xff]  }
 0x30a   : > { %v13863_v19 = vpop.f32.mrb[55].mxu0  ;;  %v13883_v23 = vadd.f32 %v13882_v21, %v13881_v16  ;;  %v13884_v24 = vpop.f32.mrb[54].mxu1  ;;  %14184 = vmatpush3.bf16.msra.mxu1 %v15624_v31  ;;  %14163 = vmatprep.subr.bf16.mxu0 %v15625_v32  ;;  %v15652_v11 = vld [vmem:[%s16429_s5 + $0x15a0] sm:$0xff]   ;;  %v15653_v14 = vld [vmem:[%s16429_s5 + $0x1568] sm:$0xff]   ;;  %v15658_v21 = vld [vmem:[%s16429_s5 + $0x1530] sm:$0xff]   ;;  %v537_v31 = vpack.c.bf16 %v402_v30, %v402_v30 }
 0x30b   : > { %v10303_v18 = vadd.f32 %v13861_v13, %v17203_v40  ;;  %v13885_v26 = vpop.f32.mrb[55].mxu1  ;;  %14185 = vmatprep.subr.bf16.mxu1 %v15627_v34  ;;  %v534_v40 = vpack.c.bf16 %v399_v39, %v399_v39  ;;  %v15654_v16 = vld [vmem:[%s16429_s5 + $0x1528] sm:$0xff]   ;;  %v15661_v24 = vld [vmem:[%s16429_s5 + $0x1578] sm:$0xff]   ;;  %v15665_v32 = vld [vmem:[%s16429_s5 + $0x1640] sm:$0xff]  }
 0x30c   : > { %v15656_v19 = vld [vmem:[%s16429_s5 + $0x15a8] sm:$0xff]   ;;  %v15663_v26 = vld [vmem:[%s16429_s5 + $0x15f8] sm:$0xff]   ;;  %v15668_v39 = vld [vmem:[%s16429_s5 + $0x1680] sm:$0xff]  }
 0x30d   : > { %v17242_v28 = vadd.f32 %v13883_v23, %v10303_v18  ;;  %14164 = vmatpush3.bf16.msra.mxu0 %v15626_v33  ;;  %10860 = vmatprep.mubr.bf16.mxu0 %v534_v40  ;;  %v15655_v18 = vld [vmem:[%s16429_s5 + $0x15e8] sm:$0xff]   ;;  %v15660_v23 = vld [vmem:[%s16429_s5 + $0x15b0] sm:$0xff]  }
 0x30e   : > { %14186 = vmatpush3.bf16.msra.mxu1 %v15628_v35  ;;  %14165 = vmatprep.subr.bf16.mxu0 %v15629_v36  ;;  %v405_v33 = vld [vmem:[%s16453_s15 + $0x2b8] sm:$0xff]  ;;  %v15666_v35 = vld [vmem:[%s16429_s5 + $0x1600] sm:$0xff]   ;;  %v404_v36 = vld [vmem:[%s16453_s15 + $0x2b0] sm:$0xff] }
 0x30f   : > { %14187 = vmatprep.subr.bf16.mxu1 %v15631_v38  ;;  %v540_v34 = vpack.c.bf16 %v405_v33, %v405_v33  ;;  %v15667_v38 = vld [vmem:[%s16429_s5 + $0x16c0] sm:$0xff]   ;;  %v15669_v40 = vld [vmem:[%s16429_s5 + $0x1648] sm:$0xff]   ;;  %v15706_v33 = vld [vmem:[%s16429_s5 + $0x1710] sm:$0xff]  }
 0x310   : > { %v15703_v30 = vld [vmem:[%s16429_s5 + $0x17c8] sm:$0xff]  }
 0x311   : > { %14166 = vmatpush3.bf16.msra.mxu0 %v15630_v37  ;;  %v539_v37 = vpack.c.bf16 %v404_v36, %v404_v36  ;;  %v15709_v36 = vld [vmem:[%s16429_s5 + $0x1758] sm:$0xff]  }
 0x312   : > { %14188 = vmatpush3.bf16.msra.mxu1 %v15632_v41  ;;  %14195 = vmatprep.subr.bf16.mxu0 %v15633_v44  ;;  %v15670_v41 = vld [vmem:[%s16429_s5 + $0x1608] sm:$0xff]   ;;  %v15673_v44 = vld [vmem:[%s16429_s5 + $0x1650] sm:$0xff]  }
 0x313   : > { %14217 = vmatprep.subr.bf16.mxu1 %v15635_v50  ;;  %v15678_v50 = vld [vmem:[%s16429_s5 + $0x1618] sm:$0xff]  }
 0x314   : > { %10861 = vmatmul.mubr.bf16.vlgmr.msra.gmra.mrb[80].mxu0 %v533_v43  ;;  %v15672_v43 = vld [vmem:[%s16429_s5 + $0x1688] sm:$0xff]  }
 0x315   : > { %14196 = vmatpush3.bf16.msra.mxu0 %v15634_v47  ;;  %10901 = vmatmul.mubr.bf16.vlgmr.msra.gmra.mrb[80].mxu1 %v535_v49  ;;  %v15676_v47 = vld [vmem:[%s16429_s5 + $0x1690] sm:$0xff]  }
 0x316   : > { %14218 = vmatpush3.bf16.msra.mxu1 %v15636_v51  ;;  %14197 = vmatprep.subr.bf16.mxu0 %v15637_v52  ;;  %v15679_v52 = vld [vmem:[%s16429_s5 + $0x16d8] sm:$0xff]  }
 0x317   : > { %14219 = vmatprep.subr.bf16.mxu1 %v15639_v54  ;;  %10980 = vmatprep.mubr.bf16.mxu1 %v540_v34  ;;  %v15707_v34 = vld [vmem:[%s16429_s5 + $0x17d0] sm:$0xff]  }
 0x319   : > { %14198 = vmatpush3.bf16.msra.mxu0 %v15638_v53 }
 0x31a   : > { %14220 = vmatpush3.bf16.msra.mxu1 %v15640_v55  ;;  %14199 = vmatprep.subr.bf16.mxu0 %v15641_v56  ;;  %v15680_v55 = vld [vmem:[%s16429_s5 + $0x1698] sm:$0xff]  }
 0x31b   : > { %14221 = vmatprep.subr.bf16.mxu1 %v15643_v58 }
 0x31d   : > { %14200 = vmatpush3.bf16.msra.mxu0 %v15642_v57  ;;  %v15681_v57 = vld [vmem:[%s16429_s5 + $0x1660] sm:$0xff]  }
 0x31e   : > { %14222 = vmatpush3.bf16.msra.mxu1 %v15644_v59  ;;  %14201 = vmatprep.subr.bf16.mxu0 %v15645_v60  ;;  %v15682_v60 = vld [vmem:[%s16429_s5 + $0x1620] sm:$0xff]  }
 0x31f   : > { %14223 = vmatprep.subr.bf16.mxu1 %v15647_v63 }
 0x321   : > { %14202 = vmatpush3.bf16.msra.mxu0 %v15646_v61 }
 0x322   : > { %14224 = vmatpush3.bf16.msra.mxu1 %v15648_v1  ;;  %14203 = vmatprep.subr.bf16.mxu0 %v15649_v4  ;;  %v15684_v1 = vld [vmem:[%s16429_s5 + $0x16a0] sm:$0xff]  }
 0x323   : > { %14225 = vmatprep.subr.bf16.mxu1 %v15651_v9  ;;  %v15690_v9 = vld [vmem:[%s16429_s5 + $0x1630] sm:$0xff]  }
 0x325   : > { %14204 = vmatpush3.bf16.msra.mxu0 %v15650_v6  ;;  %v15687_v6 = vld [vmem:[%s16429_s5 + $0x16e8] sm:$0xff]  }
 0x326   : > { %14226 = vmatpush3.bf16.msra.mxu1 %v15652_v11  ;;  %14205 = vmatprep.subr.bf16.mxu0 %v15653_v14  ;;  %v15692_v11 = vld [vmem:[%s16429_s5 + $0x16b0] sm:$0xff]   ;;  %v15695_v14 = vld [vmem:[%s16429_s5 + $0x16f8] sm:$0xff]  }
 0x327   : > { %v13903_v62 = vpop.f32.mrb[56].mxu0  ;;  %14227 = vmatprep.subr.bf16.mxu1 %v15655_v18  ;;  %v406_v18 = vld [vmem:[%s16453_s15 + $0x2c0] sm:$0xff] }
 0x328   : > { %v13904_v0 = vpop.f32.mrb[57].mxu0  ;;  %v13925_v5 = vpop.f32.mrb[56].mxu1 }
 0x329   : > { %v13905_v2 = vadd.f32 %v13904_v0, %v13903_v62  ;;  %v13906_v3 = vpop.f32.mrb[58].mxu0  ;;  %v13926_v10 = vpop.f32.mrb[57].mxu1  ;;  %14206 = vmatpush3.bf16.msra.mxu0 %v15654_v16  ;;  %v15683_v62 = vld [vmem:[%s16429_s5 + $0x16e0] sm:$0xff]  }
 0x32a   : > { %v13907_v8 = vpop.f32.mrb[59].mxu0  ;;  %v13927_v12 = vadd.f32 %v13926_v10, %v13925_v5  ;;  %v13928_v13 = vpop.f32.mrb[58].mxu1  ;;  %14228 = vmatpush3.bf16.msra.mxu1 %v15656_v19  ;;  %14207 = vmatprep.subr.bf16.mxu0 %v15657_v20  ;;  %v15685_v3 = vld [vmem:[%s16429_s5 + $0x1668] sm:$0xff]   ;;  %v15691_v10 = vld [vmem:[%s16429_s5 + $0x16f0] sm:$0xff]   ;;  %v541_v19 = vpack.c.bf16 %v406_v18, %v406_v18  ;;  %v15697_v20 = vld [vmem:[%s16429_s5 + $0x1740] sm:$0xff]  }
 0x32b   : > { %v10383_v7 = vadd.f32 %v13905_v2, %v17242_v28  ;;  %v13929_v15 = vpop.f32.mrb[59].mxu1  ;;  %14229 = vmatprep.subr.bf16.mxu1 %v15659_v22  ;;  %v538_v28 = vpack.c.bf16 %v403_v27, %v403_v27  ;;  %v15686_v5 = vld [vmem:[%s16429_s5 + $0x1628] sm:$0xff]   ;;  %v15689_v8 = vld [vmem:[%s16429_s5 + $0x1670] sm:$0xff]   ;;  %v15694_v13 = vld [vmem:[%s16429_s5 + $0x1638] sm:$0xff]  }
 0x32c   : > { %v407_v15 = vld [vmem:[%s16453_s15 + $0x2c8] sm:$0xff]  ;;  %v15735_v18 = vld [vmem:[%s16429_s5 + $0x18c8] sm:$0xff]  }
 0x32d   : > { %v17282_v17 = vadd.f32 %v13927_v12, %v10383_v7  ;;  %14208 = vmatpush3.bf16.msra.mxu0 %v15658_v21  ;;  %10940 = vmatprep.mubr.bf16.mxu0 %v538_v28  ;;  %v15688_v7 = vld [vmem:[%s16429_s5 + $0x16a8] sm:$0xff]   ;;  %v15693_v12 = vld [vmem:[%s16429_s5 + $0x1678] sm:$0xff]   ;;  %v542_v16 = vpack.c.bf16 %v407_v15, %v407_v15  ;;  %v409_v21 = vld [vmem:[%s16453_s15 + $0x2d8] sm:$0xff] }
 0x32e   : > { %14230 = vmatpush3.bf16.msra.mxu1 %v15660_v23  ;;  %14209 = vmatprep.subr.bf16.mxu0 %v15661_v24  ;;  %v544_v22 = vpack.c.bf16 %v409_v21, %v409_v21  ;;  %v15698_v23 = vld [vmem:[%s16429_s5 + $0x1700] sm:$0xff]   ;;  %v408_v24 = vld [vmem:[%s16453_s15 + $0x2d0] sm:$0xff]  ;;  %v15738_v21 = vld [vmem:[%s16429_s5 + $0x1810] sm:$0xff]  }
 0x32f   : > { %14231 = vmatprep.subr.bf16.mxu1 %v15663_v26  ;;  %v15699_v26 = vld [vmem:[%s16429_s5 + $0x17c0] sm:$0xff]   ;;  %v15701_v28 = vld [vmem:[%s16429_s5 + $0x1748] sm:$0xff]  }
 0x330   : > { %v15700_v27 = vld [vmem:[%s16429_s5 + $0x1780] sm:$0xff]  }
 0x331   : > { %14210 = vmatpush3.bf16.msra.mxu0 %v15662_v25  ;;  %v543_v25 = vpack.c.bf16 %v408_v24, %v408_v24  ;;  %v15732_v15 = vld [vmem:[%s16429_s5 + $0x1880] sm:$0xff]   ;;  %v15741_v24 = vld [vmem:[%s16429_s5 + $0x1858] sm:$0xff]  }
 0x332   : > { %14232 = vmatpush3.bf16.msra.mxu1 %v15664_v29  ;;  %14239 = vmatprep.subr.bf16.mxu0 %v15665_v32  ;;  %v15702_v29 = vld [vmem:[%s16429_s5 + $0x1708] sm:$0xff]   ;;  %v15705_v32 = vld [vmem:[%s16429_s5 + $0x1750] sm:$0xff]  }
 0x333   : > { %14261 = vmatprep.subr.bf16.mxu1 %v15667_v38  ;;  %v15710_v38 = vld [vmem:[%s16429_s5 + $0x1718] sm:$0xff]  }
 0x334   : > { %10941 = vmatmul.mubr.bf16.vlgmr.msra.gmra.mrb[84].mxu0 %v537_v31  ;;  %v15704_v31 = vld [vmem:[%s16429_s5 + $0x1788] sm:$0xff]  }
 0x335   : > { %14240 = vmatpush3.bf16.msra.mxu0 %v15666_v35  ;;  %10981 = vmatmul.mubr.bf16.vlgmr.msra.gmra.mrb[84].mxu1 %v539_v37  ;;  %v15708_v35 = vld [vmem:[%s16429_s5 + $0x1790] sm:$0xff]  }
 0x336   : > { %14262 = vmatpush3.bf16.msra.mxu1 %v15668_v39  ;;  %14241 = vmatprep.subr.bf16.mxu0 %v15669_v40  ;;  %v15711_v40 = vld [vmem:[%s16429_s5 + $0x17d8] sm:$0xff]  }
 0x337   : > { %14263 = vmatprep.subr.bf16.mxu1 %v15671_v42  ;;  %11020 = vmatprep.mubr.bf16.mxu0 %v542_v16  ;;  %v15733_v16 = vld [vmem:[%s16429_s5 + $0x1848] sm:$0xff]  }
 0x338   : > { %11060 = vmatprep.mubr.bf16.mxu1 %v544_v22  ;;  %v15739_v22 = vld [vmem:[%s16429_s5 + $0x18d0] sm:$0xff]  }
 0x339   : > { %14242 = vmatpush3.bf16.msra.mxu0 %v15670_v41 }
 0x33a   : > { %14264 = vmatpush3.bf16.msra.mxu1 %v15672_v43  ;;  %14243 = vmatprep.subr.bf16.mxu0 %v15673_v44  ;;  %v15712_v43 = vld [vmem:[%s16429_s5 + $0x1798] sm:$0xff]  }
 0x33b   : > { %14265 = vmatprep.subr.bf16.mxu1 %v15675_v46 }
 0x33d   : > { %14244 = vmatpush3.bf16.msra.mxu0 %v15674_v45  ;;  %v15713_v45 = vld [vmem:[%s16429_s5 + $0x1760] sm:$0xff]  }
 0x33e   : > { %14266 = vmatpush3.bf16.msra.mxu1 %v15676_v47  ;;  %14245 = vmatprep.subr.bf16.mxu0 %v15677_v48  ;;  %v15714_v48 = vld [vmem:[%s16429_s5 + $0x1720] sm:$0xff]  }
 0x33f   : > { %14267 = vmatprep.subr.bf16.mxu1 %v15679_v52 }
 0x341   : > { %14246 = vmatpush3.bf16.msra.mxu0 %v15678_v50  ;;  %v15715_v50 = vld [vmem:[%s16429_s5 + $0x17e0] sm:$0xff]  }
 0x342   : > { %14268 = vmatpush3.bf16.msra.mxu1 %v15680_v55  ;;  %14247 = vmatprep.subr.bf16.mxu0 %v15681_v57  ;;  %v15717_v55 = vld [vmem:[%s16429_s5 + $0x1768] sm:$0xff]  }
 0x343   : > { %14269 = vmatprep.subr.bf16.mxu1 %v15683_v62  ;;  %v15718_v57 = vld [vmem:[%s16429_s5 + $0x1728] sm:$0xff]   ;;  %v15723_v62 = vld [vmem:[%s16429_s5 + $0x17f0] sm:$0xff]  }
 0x345   : > { %14248 = vmatpush3.bf16.msra.mxu0 %v15682_v60  ;;  %v15721_v60 = vld [vmem:[%s16429_s5 + $0x1770] sm:$0xff]  }
 0x346   : > { %14270 = vmatpush3.bf16.msra.mxu1 %v15684_v1  ;;  %14249 = vmatprep.subr.bf16.mxu0 %v15685_v3  ;;  %v15726_v1 = vld [vmem:[%s16429_s5 + $0x1738] sm:$0xff]   ;;  %v411_v3 = vld [vmem:[%s16453_s15 + $0x2e8] sm:$0xff] }
 0x347   : > { %v13947_v49 = vpop.f32.mrb[60].mxu0  ;;  %14271 = vmatprep.subr.bf16.mxu1 %v15687_v6  ;;  %v410_v6 = vld [vmem:[%s16453_s15 + $0x2e0] sm:$0xff] }
 0x348   : > { %v13948_v51 = vpop.f32.mrb[61].mxu0  ;;  %v13969_v56 = vpop.f32.mrb[60].mxu1 }
 0x349   : > { %v13949_v53 = vadd.f32 %v13948_v51, %v13947_v49  ;;  %v13950_v54 = vpop.f32.mrb[62].mxu0  ;;  %v13970_v61 = vpop.f32.mrb[61].mxu1  ;;  %14250 = vmatpush3.bf16.msra.mxu0 %v15686_v5  ;;  %v15728_v5 = vld [vmem:[%s16429_s5 + $0x17b8] sm:$0xff]  }
 0x34a   : > { %v13951_v59 = vpop.f32.mrb[63].mxu0  ;;  %v13971_v63 = vadd.f32 %v13970_v61, %v13969_v56  ;;  %v13972_v0 = vpop.f32.mrb[62].mxu1  ;;  %14272 = vmatpush3.bf16.msra.mxu1 %v15688_v7  ;;  %14251 = vmatprep.subr.bf16.mxu0 %v15689_v8  ;;  %v15722_v61 = vld [vmem:[%s16429_s5 + $0x1730] sm:$0xff]   ;;  %v545_v7 = vpack.c.bf16 %v410_v6, %v410_v6  ;;  %v15729_v8 = vld [vmem:[%s16429_s5 + $0x1840] sm:$0xff]   ;;  %v15767_v6 = vld [vmem:[%s16429_s5 + $0x19c8] sm:$0xff]  }
 0x34b   : > { %v10463_v58 = vadd.f32 %v13949_v53, %v17282_v17  ;;  %v13973_v2 = vpop.f32.mrb[63].mxu1  ;;  %14273 = vmatprep.subr.bf16.mxu1 %v15691_v10  ;;  %v15696_v17 = vld [vmem:[%s16429_s5 + $0x16b8] sm:$0xff]   ;;  %v15716_v53 = vld [vmem:[%s16429_s5 + $0x17a0] sm:$0xff]   ;;  %v15720_v59 = vld [vmem:[%s16429_s5 + $0x17a8] sm:$0xff]  }
 0x34c   : > { %v15725_v0 = vld [vmem:[%s16429_s5 + $0x1778] sm:$0xff]  }
 0x34d   : > { %v17320_v4 = vadd.f32 %v13971_v63, %v10463_v58  ;;  %14252 = vmatpush3.bf16.msra.mxu0 %v15690_v9  ;;  %v15719_v58 = vld [vmem:[%s16429_s5 + $0x17e8] sm:$0xff]   ;;  %v15724_v63 = vld [vmem:[%s16429_s5 + $0x17b0] sm:$0xff]   ;;  %v15727_v2 = vld [vmem:[%s16429_s5 + $0x17f8] sm:$0xff]  }
 0x34e   : > { %14274 = vmatpush3.bf16.msra.mxu1 %v15692_v11  ;;  %14253 = vmatprep.subr.bf16.mxu0 %v15693_v12  ;;  %v413_v9 = vld [vmem:[%s16453_s15 + $0x2f8] sm:$0xff]  ;;  %v15730_v11 = vld [vmem:[%s16429_s5 + $0x1800] sm:$0xff]   ;;  %v412_v12 = vld [vmem:[%s16453_s15 + $0x2f0] sm:$0xff] }
 0x34f   : > { %14275 = vmatprep.subr.bf16.mxu1 %v15695_v14  ;;  %v548_v10 = vpack.c.bf16 %v413_v9, %v413_v9  ;;  %v15731_v14 = vld [vmem:[%s16429_s5 + $0x18c0] sm:$0xff]   ;;  %v15770_v9 = vld [vmem:[%s16429_s5 + $0x1910] sm:$0xff]  }
 0x351   : > { %14254 = vmatpush3.bf16.msra.mxu0 %v15694_v13  ;;  %v547_v13 = vpack.c.bf16 %v412_v12, %v412_v12  ;;  %v15773_v12 = vld [vmem:[%s16429_s5 + $0x1958] sm:$0xff]  }
 0x352   : > { %14276 = vmatpush3.bf16.msra.mxu1 %v15696_v17  ;;  %14283 = vmatprep.subr.bf16.mxu0 %v15697_v20  ;;  %v15734_v17 = vld [vmem:[%s16429_s5 + $0x1808] sm:$0xff]   ;;  %v15737_v20 = vld [vmem:[%s16429_s5 + $0x1850] sm:$0xff]  }
 0x353   : > { %14305 = vmatprep.subr.bf16.mxu1 %v15699_v26 }
 0x354   : > { %11021 = vmatmul.mubr.bf16.vlgmr.msra.gmra.mrb[88].mxu0 %v541_v19  ;;  %v15736_v19 = vld [vmem:[%s16429_s5 + $0x1888] sm:$0xff]  }
 0x355   : > { %14284 = vmatpush3.bf16.msra.mxu0 %v15698_v23  ;;  %11061 = vmatmul.mubr.bf16.vlgmr.msra.gmra.mrb[88].mxu1 %v543_v25  ;;  %v15740_v23 = vld [vmem:[%s16429_s5 + $0x1890] sm:$0xff]   ;;  %v15742_v25 = vld [vmem:[%s16429_s5 + $0x1818] sm:$0xff]  }
 0x356   : > { %14306 = vmatpush3.bf16.msra.mxu1 %v15700_v27  ;;  %14285 = vmatprep.subr.bf16.mxu0 %v15701_v28  ;;  %v15743_v27 = vld [vmem:[%s16429_s5 + $0x18d8] sm:$0xff]  }
 0x357   : > { %14307 = vmatprep.subr.bf16.mxu1 %v15703_v30  ;;  %11140 = vmatprep.mubr.bf16.mxu1 %v548_v10  ;;  %v15771_v10 = vld [vmem:[%s16429_s5 + $0x19d0] sm:$0xff]  }
 0x359   : > { %14286 = vmatpush3.bf16.msra.mxu0 %v15702_v29  ;;  %v15744_v29 = vld [vmem:[%s16429_s5 + $0x1898] sm:$0xff]  }
 0x35a   : > { %14308 = vmatpush3.bf16.msra.mxu1 %v15704_v31  ;;  %14287 = vmatprep.subr.bf16.mxu0 %v15705_v32  ;;  %v15745_v32 = vld [vmem:[%s16429_s5 + $0x1860] sm:$0xff]  }
 0x35b   : > { %14309 = vmatprep.subr.bf16.mxu1 %v15707_v34  ;;  %v15746_v34 = vld [vmem:[%s16429_s5 + $0x1820] sm:$0xff]  }
 0x35d   : > { %14288 = vmatpush3.bf16.msra.mxu0 %v15706_v33 }
 0x35e   : > { %14310 = vmatpush3.bf16.msra.mxu1 %v15708_v35  ;;  %14289 = vmatprep.subr.bf16.mxu0 %v15709_v36 }
 0x35f   : > { %14311 = vmatprep.subr.bf16.mxu1 %v15711_v40 }
 0x361   : > { %14290 = vmatpush3.bf16.msra.mxu0 %v15710_v38 }
 0x362   : > { %14312 = vmatpush3.bf16.msra.mxu1 %v15712_v43  ;;  %14291 = vmatprep.subr.bf16.mxu0 %v15713_v45 }
 0x363   : > { %14313 = vmatprep.subr.bf16.mxu1 %v15715_v50  ;;  %v15755_v50 = vld [vmem:[%s16429_s5 + $0x18f0] sm:$0xff]  }
 0x365   : > { %14292 = vmatpush3.bf16.msra.mxu0 %v15714_v48  ;;  %v15753_v48 = vld [vmem:[%s16429_s5 + $0x1870] sm:$0xff]  }
 0x366   : > { %14314 = vmatpush3.bf16.msra.mxu1 %v15716_v53  ;;  %14293 = vmatprep.subr.bf16.mxu0 %v15717_v55  ;;  %v15758_v53 = vld [vmem:[%s16429_s5 + $0x1838] sm:$0xff]   ;;  %v415_v55 = vld [vmem:[%s16453_s15 + $0x308] sm:$0xff] }
 0x367   : > { %v13991_v37 = vpop.f32.mrb[64].mxu0  ;;  %14315 = vmatprep.subr.bf16.mxu1 %v15719_v58  ;;  %v414_v58 = vld [vmem:[%s16453_s15 + $0x300] sm:$0xff] }
 0x368   : > { %v13992_v39 = vpop.f32.mrb[65].mxu0  ;;  %v14013_v44 = vpop.f32.mrb[64].mxu1 }
 0x369   : > { %v13993_v41 = vadd.f32 %v13992_v39, %v13991_v37  ;;  %v13994_v42 = vpop.f32.mrb[66].mxu0  ;;  %v14014_v49 = vpop.f32.mrb[65].mxu1  ;;  %14294 = vmatpush3.bf16.msra.mxu0 %v15718_v57  ;;  %v15747_v37 = vld [vmem:[%s16429_s5 + $0x18e0] sm:$0xff]   ;;  %v15760_v57 = vld [vmem:[%s16429_s5 + $0x18b8] sm:$0xff]  }
 0x36a   : > { %v13995_v47 = vpop.f32.mrb[67].mxu0  ;;  %v14015_v51 = vadd.f32 %v14014_v49, %v14013_v44  ;;  %v14016_v52 = vpop.f32.mrb[66].mxu1  ;;  %14316 = vmatpush3.bf16.msra.mxu1 %v15720_v59  ;;  %14295 = vmatprep.subr.bf16.mxu0 %v15721_v60  ;;  %v15748_v39 = vld [vmem:[%s16429_s5 + $0x18a0] sm:$0xff]   ;;  %v15749_v42 = vld [vmem:[%s16429_s5 + $0x1868] sm:$0xff]   ;;  %v15754_v49 = vld [vmem:[%s16429_s5 + $0x1830] sm:$0xff]   ;;  %v549_v59 = vpack.c.bf16 %v414_v58, %v414_v58 }
 0x36b   : > { %v10543_v46 = vadd.f32 %v13993_v41, %v17320_v4  ;;  %v14017_v54 = vpop.f32.mrb[67].mxu1  ;;  %14317 = vmatprep.subr.bf16.mxu1 %v15723_v62  ;;  %v546_v4 = vpack.c.bf16 %v411_v3, %v411_v3  ;;  %v15750_v44 = vld [vmem:[%s16429_s5 + $0x1828] sm:$0xff]   ;;  %v15757_v52 = vld [vmem:[%s16429_s5 + $0x1878] sm:$0xff]   ;;  %v15761_v60 = vld [vmem:[%s16429_s5 + $0x1940] sm:$0xff]  }
 0x36c   : > { %v15752_v47 = vld [vmem:[%s16429_s5 + $0x18a8] sm:$0xff]   ;;  %v15759_v54 = vld [vmem:[%s16429_s5 + $0x18f8] sm:$0xff]   ;;  %v15764_v3 = vld [vmem:[%s16429_s5 + $0x1980] sm:$0xff]  }
 0x36d   : > { %v17359_v56 = vadd.f32 %v14015_v51, %v10543_v46  ;;  %14296 = vmatpush3.bf16.msra.mxu0 %v15722_v61  ;;  %11100 = vmatprep.mubr.bf16.mxu0 %v546_v4  ;;  %v15751_v46 = vld [vmem:[%s16429_s5 + $0x18e8] sm:$0xff]   ;;  %v15756_v51 = vld [vmem:[%s16429_s5 + $0x18b0] sm:$0xff]  }
 0x36e   : > { %14318 = vmatpush3.bf16.msra.mxu1 %v15724_v63  ;;  %14297 = vmatprep.subr.bf16.mxu0 %v15725_v0  ;;  %v417_v61 = vld [vmem:[%s16453_s15 + $0x318] sm:$0xff]  ;;  %v15762_v63 = vld [vmem:[%s16429_s5 + $0x1900] sm:$0xff]   ;;  %v416_v0 = vld [vmem:[%s16453_s15 + $0x310] sm:$0xff] }
 0x36f   : > { %14319 = vmatprep.subr.bf16.mxu1 %v15727_v2  ;;  %v552_v62 = vpack.c.bf16 %v417_v61, %v417_v61  ;;  %v15763_v2 = vld [vmem:[%s16429_s5 + $0x19c0] sm:$0xff]   ;;  %v15765_v4 = vld [vmem:[%s16429_s5 + $0x1948] sm:$0xff]   ;;  %v15802_v61 = vld [vmem:[%s16429_s5 + $0x1a10] sm:$0xff]  }
 0x370   : > { %v15799_v58 = vld [vmem:[%s16429_s5 + $0x1ac8] sm:$0xff]  }
 0x371   : > { %14298 = vmatpush3.bf16.msra.mxu0 %v15726_v1  ;;  %v551_v1 = vpack.c.bf16 %v416_v0, %v416_v0  ;;  %v15805_v0 = vld [vmem:[%s16429_s5 + $0x1a58] sm:$0xff]  }
 0x372   : > { %14320 = vmatpush3.bf16.msra.mxu1 %v15728_v5  ;;  %14327 = vmatprep.subr.bf16.mxu0 %v15729_v8  ;;  %v15766_v5 = vld [vmem:[%s16429_s5 + $0x1908] sm:$0xff]   ;;  %v15769_v8 = vld [vmem:[%s16429_s5 + $0x1950] sm:$0xff]  }
 0x373   : > { %14349 = vmatprep.subr.bf16.mxu1 %v15731_v14  ;;  %v15774_v14 = vld [vmem:[%s16429_s5 + $0x1918] sm:$0xff]  }
 0x374   : > { %11101 = vmatmul.mubr.bf16.vlgmr.msra.gmra.mrb[92].mxu0 %v545_v7  ;;  %v15768_v7 = vld [vmem:[%s16429_s5 + $0x1988] sm:$0xff]  }
 0x375   : > { %14328 = vmatpush3.bf16.msra.mxu0 %v15730_v11  ;;  %11141 = vmatmul.mubr.bf16.vlgmr.msra.gmra.mrb[92].mxu1 %v547_v13  ;;  %v15772_v11 = vld [vmem:[%s16429_s5 + $0x1990] sm:$0xff]  }
 0x376   : > { %14350 = vmatpush3.bf16.msra.mxu1 %v15732_v15  ;;  %14329 = vmatprep.subr.bf16.mxu0 %v15733_v16  ;;  %v15775_v16 = vld [vmem:[%s16429_s5 + $0x19d8] sm:$0xff]  }
 0x377   : > { %14351 = vmatprep.subr.bf16.mxu1 %v15735_v18  ;;  %11220 = vmatprep.mubr.bf16.mxu1 %v552_v62  ;;  %v15803_v62 = vld [vmem:[%s16429_s5 + $0x1ad0] sm:$0xff]  }
 0x379   : > { %14330 = vmatpush3.bf16.msra.mxu0 %v15734_v17 }
 0x37a   : > { %14352 = vmatpush3.bf16.msra.mxu1 %v15736_v19  ;;  %14331 = vmatprep.subr.bf16.mxu0 %v15737_v20  ;;  %v15776_v19 = vld [vmem:[%s16429_s5 + $0x1998] sm:$0xff]  }
 0x37b   : > { %14353 = vmatprep.subr.bf16.mxu1 %v15739_v22 }
 0x37d   : > { %14332 = vmatpush3.bf16.msra.mxu0 %v15738_v21  ;;  %v15777_v21 = vld [vmem:[%s16429_s5 + $0x1960] sm:$0xff]  }
 0x37e   : > { %14354 = vmatpush3.bf16.msra.mxu1 %v15740_v23  ;;  %14333 = vmatprep.subr.bf16.mxu0 %v15741_v24  ;;  %v15778_v24 = vld [vmem:[%s16429_s5 + $0x1920] sm:$0xff]  }
 0x37f   : > { %14355 = vmatprep.subr.bf16.mxu1 %v15743_v27 }
 0x381   : > { %14334 = vmatpush3.bf16.msra.mxu0 %v15742_v25 }
 0x382   : > { %14356 = vmatpush3.bf16.msra.mxu1 %v15744_v29  ;;  %14335 = vmatprep.subr.bf16.mxu0 %v15745_v32  ;;  %v15780_v29 = vld [vmem:[%s16429_s5 + $0x19a0] sm:$0xff]  }
 0x383   : > { %14357 = vmatprep.subr.bf16.mxu1 %v15747_v37  ;;  %v15786_v37 = vld [vmem:[%s16429_s5 + $0x1930] sm:$0xff]  }
 0x385   : > { %14336 = vmatpush3.bf16.msra.mxu0 %v15746_v34  ;;  %v15783_v34 = vld [vmem:[%s16429_s5 + $0x19e8] sm:$0xff]  }
 0x386   : > { %14358 = vmatpush3.bf16.msra.mxu1 %v15748_v39  ;;  %14337 = vmatprep.subr.bf16.mxu0 %v15749_v42  ;;  %v15788_v39 = vld [vmem:[%s16429_s5 + $0x19b0] sm:$0xff]   ;;  %v15791_v42 = vld [vmem:[%s16429_s5 + $0x19f8] sm:$0xff]  }
 0x387   : > { %v14035_v26 = vpop.f32.mrb[68].mxu0  ;;  %14359 = vmatprep.subr.bf16.mxu1 %v15751_v46  ;;  %v418_v46 = vld [vmem:[%s16453_s15 + $0x320] sm:$0xff] }
 0x388   : > { %v14036_v28 = vpop.f32.mrb[69].mxu0  ;;  %v14057_v33 = vpop.f32.mrb[68].mxu1 }
 0x389   : > { %v14037_v30 = vadd.f32 %v14036_v28, %v14035_v26  ;;  %v14038_v31 = vpop.f32.mrb[70].mxu0  ;;  %v14058_v38 = vpop.f32.mrb[69].mxu1  ;;  %14338 = vmatpush3.bf16.msra.mxu0 %v15750_v44  ;;  %v15779_v26 = vld [vmem:[%s16429_s5 + $0x19e0] sm:$0xff]  }
 0x38a   : > { %v14039_v36 = vpop.f32.mrb[71].mxu0  ;;  %v14059_v40 = vadd.f32 %v14058_v38, %v14057_v33  ;;  %v14060_v41 = vpop.f32.mrb[70].mxu1  ;;  %14360 = vmatpush3.bf16.msra.mxu1 %v15752_v47  ;;  %14339 = vmatprep.subr.bf16.mxu0 %v15753_v48  ;;  %v15781_v31 = vld [vmem:[%s16429_s5 + $0x1968] sm:$0xff]   ;;  %v15787_v38 = vld [vmem:[%s16429_s5 + $0x19f0] sm:$0xff]   ;;  %v553_v47 = vpack.c.bf16 %v418_v46, %v418_v46  ;;  %v15793_v48 = vld [vmem:[%s16429_s5 + $0x1a40] sm:$0xff]  }
 0x38b   : > { %v10623_v35 = vadd.f32 %v14037_v30, %v17359_v56  ;;  %v14061_v43 = vpop.f32.mrb[71].mxu1  ;;  %14361 = vmatprep.subr.bf16.mxu1 %v15755_v50  ;;  %v550_v56 = vpack.c.bf16 %v415_v55, %v415_v55  ;;  %v15782_v33 = vld [vmem:[%s16429_s5 + $0x1928] sm:$0xff]   ;;  %v15785_v36 = vld [vmem:[%s16429_s5 + $0x1970] sm:$0xff]   ;;  %v15790_v41 = vld [vmem:[%s16429_s5 + $0x1938] sm:$0xff]  }
 0x38c   : > { %v419_v43 = vld [vmem:[%s16453_s15 + $0x328] sm:$0xff]  ;;  %v15831_v46 = vld [vmem:[%s16429_s5 + $0x1bc8] sm:$0xff]  }
 0x38d   : > { %v17399_v45 = vadd.f32 %v14059_v40, %v10623_v35  ;;  %14340 = vmatpush3.bf16.msra.mxu0 %v15754_v49  ;;  %11180 = vmatprep.mubr.bf16.mxu0 %v550_v56  ;;  %v15784_v35 = vld [vmem:[%s16429_s5 + $0x19a8] sm:$0xff]   ;;  %v15789_v40 = vld [vmem:[%s16429_s5 + $0x1978] sm:$0xff]   ;;  %v554_v44 = vpack.c.bf16 %v419_v43, %v419_v43  ;;  %v421_v49 = vld [vmem:[%s16453_s15 + $0x338] sm:$0xff] }
 0x38e   : > { %14362 = vmatpush3.bf16.msra.mxu1 %v15756_v51  ;;  %14341 = vmatprep.subr.bf16.mxu0 %v15757_v52  ;;  %v556_v50 = vpack.c.bf16 %v421_v49, %v421_v49  ;;  %v15794_v51 = vld [vmem:[%s16429_s5 + $0x1a00] sm:$0xff]   ;;  %v420_v52 = vld [vmem:[%s16453_s15 + $0x330] sm:$0xff]  ;;  %v15834_v49 = vld [vmem:[%s16429_s5 + $0x1b10] sm:$0xff]  }
 0x38f   : > { %14363 = vmatprep.subr.bf16.mxu1 %v15759_v54  ;;  %v15795_v54 = vld [vmem:[%s16429_s5 + $0x1ac0] sm:$0xff]   ;;  %v15797_v56 = vld [vmem:[%s16429_s5 + $0x1a48] sm:$0xff]  }
 0x390   : > { %v15796_v55 = vld [vmem:[%s16429_s5 + $0x1a80] sm:$0xff]  }
 0x391   : > { %14342 = vmatpush3.bf16.msra.mxu0 %v15758_v53  ;;  %v555_v53 = vpack.c.bf16 %v420_v52, %v420_v52  ;;  %v15828_v43 = vld [vmem:[%s16429_s5 + $0x1b80] sm:$0xff]   ;;  %v15837_v52 = vld [vmem:[%s16429_s5 + $0x1b58] sm:$0xff]  }
 0x392   : > { %14364 = vmatpush3.bf16.msra.mxu1 %v15760_v57  ;;  %14371 = vmatprep.subr.bf16.mxu0 %v15761_v60  ;;  %v15798_v57 = vld [vmem:[%s16429_s5 + $0x1a08] sm:$0xff]   ;;  %v15801_v60 = vld [vmem:[%s16429_s5 + $0x1a50] sm:$0xff]  }
 0x393   : > { %14393 = vmatprep.subr.bf16.mxu1 %v15763_v2  ;;  %v15806_v2 = vld [vmem:[%s16429_s5 + $0x1a18] sm:$0xff]  }
 0x394   : > { %11181 = vmatmul.mubr.bf16.vlgmr.msra.gmra.mrb[96].mxu0 %v549_v59  ;;  %v15800_v59 = vld [vmem:[%s16429_s5 + $0x1a88] sm:$0xff]  }
 0x395   : > { %14372 = vmatpush3.bf16.msra.mxu0 %v15762_v63  ;;  %11221 = vmatmul.mubr.bf16.vlgmr.msra.gmra.mrb[96].mxu1 %v551_v1  ;;  %v15804_v63 = vld [vmem:[%s16429_s5 + $0x1a90] sm:$0xff]  }
 0x396   : > { %14394 = vmatpush3.bf16.msra.mxu1 %v15764_v3  ;;  %14373 = vmatprep.subr.bf16.mxu0 %v15765_v4  ;;  %v15807_v4 = vld [vmem:[%s16429_s5 + $0x1ad8] sm:$0xff]  }
 0x397   : > { %14395 = vmatprep.subr.bf16.mxu1 %v15767_v6  ;;  %11260 = vmatprep.mubr.bf16.mxu0 %v554_v44  ;;  %v15829_v44 = vld [vmem:[%s16429_s5 + $0x1b48] sm:$0xff]  }
 0x398   : > { %11300 = vmatprep.mubr.bf16.mxu1 %v556_v50  ;;  %v15835_v50 = vld [vmem:[%s16429_s5 + $0x1bd0] sm:$0xff]  }
 0x399   : > { %14374 = vmatpush3.bf16.msra.mxu0 %v15766_v5 }
 0x39a   : > { %14396 = vmatpush3.bf16.msra.mxu1 %v15768_v7  ;;  %14375 = vmatprep.subr.bf16.mxu0 %v15769_v8  ;;  %v15808_v7 = vld [vmem:[%s16429_s5 + $0x1a98] sm:$0xff]  }
 0x39b   : > { %14397 = vmatprep.subr.bf16.mxu1 %v15771_v10 }
 0x39d   : > { %14376 = vmatpush3.bf16.msra.mxu0 %v15770_v9  ;;  %v15809_v9 = vld [vmem:[%s16429_s5 + $0x1a60] sm:$0xff]  }
 0x39e   : > { %14398 = vmatpush3.bf16.msra.mxu1 %v15772_v11  ;;  %14377 = vmatprep.subr.bf16.mxu0 %v15773_v12  ;;  %v15810_v12 = vld [vmem:[%s16429_s5 + $0x1a20] sm:$0xff]  }
 0x39f   : > { %14399 = vmatprep.subr.bf16.mxu1 %v15775_v16 }
 0x3a1   : > { %14378 = vmatpush3.bf16.msra.mxu0 %v15774_v14  ;;  %v15811_v14 = vld [vmem:[%s16429_s5 + $0x1ae0] sm:$0xff]  }
 0x3a2   : > { %14400 = vmatpush3.bf16.msra.mxu1 %v15776_v19  ;;  %14379 = vmatprep.subr.bf16.mxu0 %v15777_v21  ;;  %v15813_v19 = vld [vmem:[%s16429_s5 + $0x1a68] sm:$0xff]  }
 0x3a3   : > { %14401 = vmatprep.subr.bf16.mxu1 %v15779_v26  ;;  %v15814_v21 = vld [vmem:[%s16429_s5 + $0x1a28] sm:$0xff]   ;;  %v15819_v26 = vld [vmem:[%s16429_s5 + $0x1af0] sm:$0xff]  }
 0x3a5   : > { %14380 = vmatpush3.bf16.msra.mxu0 %v15778_v24  ;;  %v15817_v24 = vld [vmem:[%s16429_s5 + $0x1a70] sm:$0xff]  }
 0x3a6   : > { %14402 = vmatpush3.bf16.msra.mxu1 %v15780_v29  ;;  %14381 = vmatprep.subr.bf16.mxu0 %v15781_v31  ;;  %v15822_v29 = vld [vmem:[%s16429_s5 + $0x1a38] sm:$0xff]   ;;  %v423_v31 = vld [vmem:[%s16453_s15 + $0x348] sm:$0xff] }
 0x3a7   : > { %v14079_v13 = vpop.f32.mrb[72].mxu0  ;;  %14403 = vmatprep.subr.bf16.mxu1 %v15783_v34  ;;  %v422_v34 = vld [vmem:[%s16453_s15 + $0x340] sm:$0xff] }
 0x3a8   : > { %v14080_v15 = vpop.f32.mrb[73].mxu0  ;;  %v14101_v20 = vpop.f32.mrb[72].mxu1 }
 0x3a9   : > { %v14081_v17 = vadd.f32 %v14080_v15, %v14079_v13  ;;  %v14082_v18 = vpop.f32.mrb[74].mxu0  ;;  %v14102_v25 = vpop.f32.mrb[73].mxu1  ;;  %14382 = vmatpush3.bf16.msra.mxu0 %v15782_v33  ;;  %v15824_v33 = vld [vmem:[%s16429_s5 + $0x1ab8] sm:$0xff]  }
 0x3aa   : > { %v14083_v23 = vpop.f32.mrb[75].mxu0  ;;  %v14103_v27 = vadd.f32 %v14102_v25, %v14101_v20  ;;  %v14104_v28 = vpop.f32.mrb[74].mxu1  ;;  %14404 = vmatpush3.bf16.msra.mxu1 %v15784_v35  ;;  %14383 = vmatprep.subr.bf16.mxu0 %v15785_v36  ;;  %v15818_v25 = vld [vmem:[%s16429_s5 + $0x1a30] sm:$0xff]   ;;  %v557_v35 = vpack.c.bf16 %v422_v34, %v422_v34  ;;  %v15825_v36 = vld [vmem:[%s16429_s5 + $0x1b40] sm:$0xff]   ;;  %v15863_v34 = vld [vmem:[%s16429_s5 + $0x1cc8] sm:$0xff]  }
 0x3ab   : > { %v10703_v22 = vadd.f32 %v14081_v17, %v17399_v45  ;;  %v14105_v30 = vpop.f32.mrb[75].mxu1  ;;  %14405 = vmatprep.subr.bf16.mxu1 %v15787_v38  ;;  %v15792_v45 = vld [vmem:[%s16429_s5 + $0x19b8] sm:$0xff]   ;;  %v15812_v17 = vld [vmem:[%s16429_s5 + $0x1aa0] sm:$0xff]   ;;  %v15816_v23 = vld [vmem:[%s16429_s5 + $0x1aa8] sm:$0xff]  }
 0x3ac   : > { %v15821_v28 = vld [vmem:[%s16429_s5 + $0x1a78] sm:$0xff]  }
 0x3ad   : > { %v17437_v32 = vadd.f32 %v14103_v27, %v10703_v22  ;;  %14384 = vmatpush3.bf16.msra.mxu0 %v15786_v37  ;;  %v15815_v22 = vld [vmem:[%s16429_s5 + $0x1ae8] sm:$0xff]   ;;  %v15820_v27 = vld [vmem:[%s16429_s5 + $0x1ab0] sm:$0xff]   ;;  %v15823_v30 = vld [vmem:[%s16429_s5 + $0x1af8] sm:$0xff]  }
 0x3ae   : > { %14406 = vmatpush3.bf16.msra.mxu1 %v15788_v39  ;;  %14385 = vmatprep.subr.bf16.mxu0 %v15789_v40  ;;  %v425_v37 = vld [vmem:[%s16453_s15 + $0x358] sm:$0xff]  ;;  %v15826_v39 = vld [vmem:[%s16429_s5 + $0x1b00] sm:$0xff]   ;;  %v424_v40 = vld [vmem:[%s16453_s15 + $0x350] sm:$0xff] }
 0x3af   : > { %14407 = vmatprep.subr.bf16.mxu1 %v15791_v42  ;;  %v560_v38 = vpack.c.bf16 %v425_v37, %v425_v37  ;;  %v15827_v42 = vld [vmem:[%s16429_s5 + $0x1bc0] sm:$0xff]   ;;  %v15866_v37 = vld [vmem:[%s16429_s5 + $0x1c10] sm:$0xff]  }
 0x3b1   : > { %14386 = vmatpush3.bf16.msra.mxu0 %v15790_v41  ;;  %v559_v41 = vpack.c.bf16 %v424_v40, %v424_v40  ;;  %v15869_v40 = vld [vmem:[%s16429_s5 + $0x1c58] sm:$0xff]  }
 0x3b2   : > { %14408 = vmatpush3.bf16.msra.mxu1 %v15792_v45  ;;  %14415 = vmatprep.subr.bf16.mxu0 %v15793_v48  ;;  %v15830_v45 = vld [vmem:[%s16429_s5 + $0x1b08] sm:$0xff]   ;;  %v15833_v48 = vld [vmem:[%s16429_s5 + $0x1b50] sm:$0xff]  }
 0x3b3   : > { %14437 = vmatprep.subr.bf16.mxu1 %v15795_v54 }
 0x3b4   : > { %11261 = vmatmul.mubr.bf16.vlgmr.msra.gmra.mrb[100].mxu0 %v553_v47  ;;  %v15832_v47 = vld [vmem:[%s16429_s5 + $0x1b88] sm:$0xff]  }
 0x3b5   : > { %14416 = vmatpush3.bf16.msra.mxu0 %v15794_v51  ;;  %11301 = vmatmul.mubr.bf16.vlgmr.msra.gmra.mrb[100].mxu1 %v555_v53  ;;  %v15836_v51 = vld [vmem:[%s16429_s5 + $0x1b90] sm:$0xff]   ;;  %v15838_v53 = vld [vmem:[%s16429_s5 + $0x1b18] sm:$0xff]  }
 0x3b6   : > { %14438 = vmatpush3.bf16.msra.mxu1 %v15796_v55  ;;  %14417 = vmatprep.subr.bf16.mxu0 %v15797_v56  ;;  %v15839_v55 = vld [vmem:[%s16429_s5 + $0x1bd8] sm:$0xff]  }
 0x3b7   : > { %14439 = vmatprep.subr.bf16.mxu1 %v15799_v58  ;;  %11380 = vmatprep.mubr.bf16.mxu1 %v560_v38  ;;  %v15867_v38 = vld [vmem:[%s16429_s5 + $0x1cd0] sm:$0xff]  }
 0x3b9   : > { %14418 = vmatpush3.bf16.msra.mxu0 %v15798_v57  ;;  %v15840_v57 = vld [vmem:[%s16429_s5 + $0x1b98] sm:$0xff]  }
 0x3ba   : > { %14440 = vmatpush3.bf16.msra.mxu1 %v15800_v59  ;;  %14419 = vmatprep.subr.bf16.mxu0 %v15801_v60  ;;  %v15841_v60 = vld [vmem:[%s16429_s5 + $0x1b60] sm:$0xff]  }
 0x3bb   : > { %14441 = vmatprep.subr.bf16.mxu1 %v15803_v62  ;;  %v15842_v62 = vld [vmem:[%s16429_s5 + $0x1b20] sm:$0xff]  }
 0x3bd   : > { %14420 = vmatpush3.bf16.msra.mxu0 %v15802_v61 }
 0x3be   : > { %14442 = vmatpush3.bf16.msra.mxu1 %v15804_v63  ;;  %14421 = vmatprep.subr.bf16.mxu0 %v15805_v0 }
 0x3bf   : > { %14443 = vmatprep.subr.bf16.mxu1 %v15807_v4 }
 0x3c1   : > { %14422 = vmatpush3.bf16.msra.mxu0 %v15806_v2 }
 0x3c2   : > { %14444 = vmatpush3.bf16.msra.mxu1 %v15808_v7  ;;  %14423 = vmatprep.subr.bf16.mxu0 %v15809_v9 }
 0x3c3   : > { %14445 = vmatprep.subr.bf16.mxu1 %v15811_v14  ;;  %v15851_v14 = vld [vmem:[%s16429_s5 + $0x1bf0] sm:$0xff]  }
 0x3c5   : > { %14424 = vmatpush3.bf16.msra.mxu0 %v15810_v12  ;;  %v15849_v12 = vld [vmem:[%s16429_s5 + $0x1b70] sm:$0xff]  }
 0x3c6   : > { %14446 = vmatpush3.bf16.msra.mxu1 %v15812_v17  ;;  %14425 = vmatprep.subr.bf16.mxu0 %v15813_v19  ;;  %v15854_v17 = vld [vmem:[%s16429_s5 + $0x1b38] sm:$0xff]   ;;  %v427_v19 = vld [vmem:[%s16453_s15 + $0x368] sm:$0xff] }
 0x3c7   : > { %v14123_v1 = vpop.f32.mrb[76].mxu0  ;;  %14447 = vmatprep.subr.bf16.mxu1 %v15815_v22  ;;  %v426_v22 = vld [vmem:[%s16453_s15 + $0x360] sm:$0xff] }
 0x3c8   : > { %v14124_v3 = vpop.f32.mrb[77].mxu0  ;;  %v14145_v8 = vpop.f32.mrb[76].mxu1 }
 0x3c9   : > { %v14125_v5 = vadd.f32 %v14124_v3, %v14123_v1  ;;  %v14126_v6 = vpop.f32.mrb[78].mxu0  ;;  %v14146_v13 = vpop.f32.mrb[77].mxu1  ;;  %14426 = vmatpush3.bf16.msra.mxu0 %v15814_v21  ;;  %v15843_v1 = vld [vmem:[%s16429_s5 + $0x1be0] sm:$0xff]   ;;  %v15856_v21 = vld [vmem:[%s16429_s5 + $0x1bb8] sm:$0xff]  }
 0x3ca   : > { %v14127_v11 = vpop.f32.mrb[79].mxu0  ;;  %v14147_v15 = vadd.f32 %v14146_v13, %v14145_v8  ;;  %v14148_v16 = vpop.f32.mrb[78].mxu1  ;;  %14448 = vmatpush3.bf16.msra.mxu1 %v15816_v23  ;;  %14427 = vmatprep.subr.bf16.mxu0 %v15817_v24  ;;  %v15844_v3 = vld [vmem:[%s16429_s5 + $0x1ba0] sm:$0xff]   ;;  %v15845_v6 = vld [vmem:[%s16429_s5 + $0x1b68] sm:$0xff]   ;;  %v15850_v13 = vld [vmem:[%s16429_s5 + $0x1b30] sm:$0xff]   ;;  %v561_v23 = vpack.c.bf16 %v426_v22, %v426_v22 }
 0x3cb   : > { %v10783_v10 = vadd.f32 %v14125_v5, %v17437_v32  ;;  %v14149_v18 = vpop.f32.mrb[79].mxu1  ;;  %14449 = vmatprep.subr.bf16.mxu1 %v15819_v26  ;;  %v558_v32 = vpack.c.bf16 %v423_v31, %v423_v31  ;;  %v15846_v8 = vld [vmem:[%s16429_s5 + $0x1b28] sm:$0xff]   ;;  %v15853_v16 = vld [vmem:[%s16429_s5 + $0x1b78] sm:$0xff]   ;;  %v15857_v24 = vld [vmem:[%s16429_s5 + $0x1c40] sm:$0xff]  }
 0x3cc   : > { %v15848_v11 = vld [vmem:[%s16429_s5 + $0x1ba8] sm:$0xff]   ;;  %v15855_v18 = vld [vmem:[%s16429_s5 + $0x1bf8] sm:$0xff]   ;;  %v15860_v31 = vld [vmem:[%s16429_s5 + $0x1c80] sm:$0xff]  }
 0x3cd   : > { %v17476_v20 = vadd.f32 %v14147_v15, %v10783_v10  ;;  %14428 = vmatpush3.bf16.msra.mxu0 %v15818_v25  ;;  %11340 = vmatprep.mubr.bf16.mxu0 %v558_v32  ;;  %v15847_v10 = vld [vmem:[%s16429_s5 + $0x1be8] sm:$0xff]   ;;  %v15852_v15 = vld [vmem:[%s16429_s5 + $0x1bb0] sm:$0xff]  }
 0x3ce   : > { %14450 = vmatpush3.bf16.msra.mxu1 %v15820_v27  ;;  %14429 = vmatprep.subr.bf16.mxu0 %v15821_v28  ;;  %v429_v25 = vld [vmem:[%s16453_s15 + $0x378] sm:$0xff]  ;;  %v15858_v27 = vld [vmem:[%s16429_s5 + $0x1c00] sm:$0xff]   ;;  %v428_v28 = vld [vmem:[%s16453_s15 + $0x370] sm:$0xff] }
 0x3cf   : > { %14451 = vmatprep.subr.bf16.mxu1 %v15823_v30  ;;  %v564_v26 = vpack.c.bf16 %v429_v25, %v429_v25  ;;  %v15859_v30 = vld [vmem:[%s16429_s5 + $0x1cc0] sm:$0xff]   ;;  %v15861_v32 = vld [vmem:[%s16429_s5 + $0x1c48] sm:$0xff]   ;;  %v15898_v25 = vld [vmem:[%s16429_s5 + $0x1d10] sm:$0xff]  }
 0x3d0   : > { %v15895_v22 = vld [vmem:[%s16429_s5 + $0x1dc8] sm:$0xff]  }
 0x3d1   : > { %14430 = vmatpush3.bf16.msra.mxu0 %v15822_v29  ;;  %v563_v29 = vpack.c.bf16 %v428_v28, %v428_v28  ;;  %v15901_v28 = vld [vmem:[%s16429_s5 + $0x1d58] sm:$0xff]  }
 0x3d2   : > { %14452 = vmatpush3.bf16.msra.mxu1 %v15824_v33  ;;  %14459 = vmatprep.subr.bf16.mxu0 %v15825_v36  ;;  %v15862_v33 = vld [vmem:[%s16429_s5 + $0x1c08] sm:$0xff]   ;;  %v15865_v36 = vld [vmem:[%s16429_s5 + $0x1c50] sm:$0xff]  }
 0x3d3   : > { %14481 = vmatprep.subr.bf16.mxu1 %v15827_v42  ;;  %v15870_v42 = vld [vmem:[%s16429_s5 + $0x1c18] sm:$0xff]  }
 0x3d4   : > { %11341 = vmatmul.mubr.bf16.vlgmr.msra.gmra.mrb[104].mxu0 %v557_v35  ;;  %v15864_v35 = vld [vmem:[%s16429_s5 + $0x1c88] sm:$0xff]  }
 0x3d5   : > { %14460 = vmatpush3.bf16.msra.mxu0 %v15826_v39  ;;  %11381 = vmatmul.mubr.bf16.vlgmr.msra.gmra.mrb[104].mxu1 %v559_v41  ;;  %v15868_v39 = vld [vmem:[%s16429_s5 + $0x1c90] sm:$0xff]  }
 0x3d6   : > { %14482 = vmatpush3.bf16.msra.mxu1 %v15828_v43  ;;  %14461 = vmatprep.subr.bf16.mxu0 %v15829_v44  ;;  %v15871_v44 = vld [vmem:[%s16429_s5 + $0x1cd8] sm:$0xff]  }
 0x3d7   : > { %14483 = vmatprep.subr.bf16.mxu1 %v15831_v46  ;;  %11460 = vmatprep.mubr.bf16.mxu1 %v564_v26  ;;  %v15899_v26 = vld [vmem:[%s16429_s5 + $0x1dd0] sm:$0xff]  }
 0x3d9   : > { %14462 = vmatpush3.bf16.msra.mxu0 %v15830_v45 }
 0x3da   : > { %14484 = vmatpush3.bf16.msra.mxu1 %v15832_v47  ;;  %14463 = vmatprep.subr.bf16.mxu0 %v15833_v48  ;;  %v15872_v47 = vld [vmem:[%s16429_s5 + $0x1c98] sm:$0xff]  }
 0x3db   : > { %14485 = vmatprep.subr.bf16.mxu1 %v15835_v50 }
 0x3dd   : > { %14464 = vmatpush3.bf16.msra.mxu0 %v15834_v49  ;;  %v15873_v49 = vld [vmem:[%s16429_s5 + $0x1c60] sm:$0xff]  }
 0x3de   : > { %14486 = vmatpush3.bf16.msra.mxu1 %v15836_v51  ;;  %14465 = vmatprep.subr.bf16.mxu0 %v15837_v52  ;;  %v15874_v52 = vld [vmem:[%s16429_s5 + $0x1c20] sm:$0xff]  }
 0x3df   : > { %14487 = vmatprep.subr.bf16.mxu1 %v15839_v55 }
 0x3e1   : > { %14466 = vmatpush3.bf16.msra.mxu0 %v15838_v53 }
 0x3e2   : > { %14488 = vmatpush3.bf16.msra.mxu1 %v15840_v57  ;;  %14467 = vmatprep.subr.bf16.mxu0 %v15841_v60  ;;  %v15876_v57 = vld [vmem:[%s16429_s5 + $0x1ca0] sm:$0xff]  }
 0x3e3   : > { %14489 = vmatprep.subr.bf16.mxu1 %v15843_v1  ;;  %v15882_v1 = vld [vmem:[%s16429_s5 + $0x1c30] sm:$0xff]  }
 0x3e5   : > { %14468 = vmatpush3.bf16.msra.mxu0 %v15842_v62  ;;  %v15879_v62 = vld [vmem:[%s16429_s5 + $0x1ce8] sm:$0xff]  }
 0x3e6   : > { %14490 = vmatpush3.bf16.msra.mxu1 %v15844_v3  ;;  %14469 = vmatprep.subr.bf16.mxu0 %v15845_v6  ;;  %v15884_v3 = vld [vmem:[%s16429_s5 + $0x1cb0] sm:$0xff]   ;;  %v15887_v6 = vld [vmem:[%s16429_s5 + $0x1cf8] sm:$0xff]  }
 0x3e7   : > { %v14167_v54 = vpop.f32.mrb[80].mxu0  ;;  %14491 = vmatprep.subr.bf16.mxu1 %v15847_v10  ;;  %v430_v10 = vld [vmem:[%s16453_s15 + $0x380] sm:$0xff] }
 0x3e8   : > { %v14168_v56 = vpop.f32.mrb[81].mxu0  ;;  %v14189_v61 = vpop.f32.mrb[80].mxu1 }
 0x3e9   : > { %v14169_v58 = vadd.f32 %v14168_v56, %v14167_v54  ;;  %v14170_v59 = vpop.f32.mrb[82].mxu0  ;;  %v14190_v2 = vpop.f32.mrb[81].mxu1  ;;  %14470 = vmatpush3.bf16.msra.mxu0 %v15846_v8  ;;  %v15875_v54 = vld [vmem:[%s16429_s5 + $0x1ce0] sm:$0xff]  }
 0x3ea   : > { %v14171_v0 = vpop.f32.mrb[83].mxu0  ;;  %v14191_v4 = vadd.f32 %v14190_v2, %v14189_v61  ;;  %v14192_v5 = vpop.f32.mrb[82].mxu1  ;;  %14492 = vmatpush3.bf16.msra.mxu1 %v15848_v11  ;;  %14471 = vmatprep.subr.bf16.mxu0 %v15849_v12  ;;  %v15877_v59 = vld [vmem:[%s16429_s5 + $0x1c68] sm:$0xff]   ;;  %v15883_v2 = vld [vmem:[%s16429_s5 + $0x1cf0] sm:$0xff]   ;;  %v565_v11 = vpack.c.bf16 %v430_v10, %v430_v10  ;;  %v15889_v12 = vld [vmem:[%s16429_s5 + $0x1d40] sm:$0xff]  }
 0x3eb   : > { %v10863_v63 = vadd.f32 %v14169_v58, %v17476_v20  ;;  %v14193_v7 = vpop.f32.mrb[83].mxu1  ;;  %14493 = vmatprep.subr.bf16.mxu1 %v15851_v14  ;;  %v562_v20 = vpack.c.bf16 %v427_v19, %v427_v19  ;;  %v15878_v61 = vld [vmem:[%s16429_s5 + $0x1c28] sm:$0xff]   ;;  %v15881_v0 = vld [vmem:[%s16429_s5 + $0x1c70] sm:$0xff]   ;;  %v15886_v5 = vld [vmem:[%s16429_s5 + $0x1c38] sm:$0xff]  }
 0x3ec   : > { %v431_v7 = vld [vmem:[%s16453_s15 + $0x388] sm:$0xff]  ;;  %v15927_v10 = vld [vmem:[%s16429_s5 + $0x1ec8] sm:$0xff]  }
 0x3ed   : > { %v17516_v9 = vadd.f32 %v14191_v4, %v10863_v63  ;;  %14472 = vmatpush3.bf16.msra.mxu0 %v15850_v13  ;;  %11420 = vmatprep.mubr.bf16.mxu0 %v562_v20  ;;  %v15880_v63 = vld [vmem:[%s16429_s5 + $0x1ca8] sm:$0xff]   ;;  %v15885_v4 = vld [vmem:[%s16429_s5 + $0x1c78] sm:$0xff]   ;;  %v566_v8 = vpack.c.bf16 %v431_v7, %v431_v7  ;;  %v433_v13 = vld [vmem:[%s16453_s15 + $0x398] sm:$0xff] }
 0x3ee   : > { %14494 = vmatpush3.bf16.msra.mxu1 %v15852_v15  ;;  %14473 = vmatprep.subr.bf16.mxu0 %v15853_v16  ;;  %v568_v14 = vpack.c.bf16 %v433_v13, %v433_v13  ;;  %v15890_v15 = vld [vmem:[%s16429_s5 + $0x1d00] sm:$0xff]   ;;  %v432_v16 = vld [vmem:[%s16453_s15 + $0x390] sm:$0xff]  ;;  %v15930_v13 = vld [vmem:[%s16429_s5 + $0x1e10] sm:$0xff]  }
 0x3ef   : > { %14495 = vmatprep.subr.bf16.mxu1 %v15855_v18  ;;  %v15891_v18 = vld [vmem:[%s16429_s5 + $0x1dc0] sm:$0xff]   ;;  %v15893_v20 = vld [vmem:[%s16429_s5 + $0x1d48] sm:$0xff]  }
 0x3f0   : > { %v15892_v19 = vld [vmem:[%s16429_s5 + $0x1d80] sm:$0xff]  }
 0x3f1   : > { %14474 = vmatpush3.bf16.msra.mxu0 %v15854_v17  ;;  %v567_v17 = vpack.c.bf16 %v432_v16, %v432_v16  ;;  %v15924_v7 = vld [vmem:[%s16429_s5 + $0x1e80] sm:$0xff]   ;;  %v15933_v16 = vld [vmem:[%s16429_s5 + $0x1e58] sm:$0xff]  }
 0x3f2   : > { %14496 = vmatpush3.bf16.msra.mxu1 %v15856_v21  ;;  %14503 = vmatprep.subr.bf16.mxu0 %v15857_v24  ;;  %v15894_v21 = vld [vmem:[%s16429_s5 + $0x1d08] sm:$0xff]   ;;  %v15897_v24 = vld [vmem:[%s16429_s5 + $0x1d50] sm:$0xff]  }
 0x3f3   : > { %14525 = vmatprep.subr.bf16.mxu1 %v15859_v30  ;;  %v15902_v30 = vld [vmem:[%s16429_s5 + $0x1d18] sm:$0xff]  }
 0x3f4   : > { %11421 = vmatmul.mubr.bf16.vlgmr.msra.gmra.mrb[108].mxu0 %v561_v23  ;;  %v15896_v23 = vld [vmem:[%s16429_s5 + $0x1d88] sm:$0xff]  }
 0x3f5   : > { %14504 = vmatpush3.bf16.msra.mxu0 %v15858_v27  ;;  %11461 = vmatmul.mubr.bf16.vlgmr.msra.gmra.mrb[108].mxu1 %v563_v29  ;;  %v15900_v27 = vld [vmem:[%s16429_s5 + $0x1d90] sm:$0xff]  }
 0x3f6   : > { %14526 = vmatpush3.bf16.msra.mxu1 %v15860_v31  ;;  %14505 = vmatprep.subr.bf16.mxu0 %v15861_v32  ;;  %v15903_v32 = vld [vmem:[%s16429_s5 + $0x1dd8] sm:$0xff]  }
 0x3f7   : > { %14527 = vmatprep.subr.bf16.mxu1 %v15863_v34  ;;  %11500 = vmatprep.mubr.bf16.mxu0 %v566_v8  ;;  %v15925_v8 = vld [vmem:[%s16429_s5 + $0x1e48] sm:$0xff]  }
 0x3f8   : > { %11540 = vmatprep.mubr.bf16.mxu1 %v568_v14  ;;  %v15931_v14 = vld [vmem:[%s16429_s5 + $0x1ed0] sm:$0xff]  }
 0x3f9   : > { %14506 = vmatpush3.bf16.msra.mxu0 %v15862_v33 }
 0x3fa   : > { %14528 = vmatpush3.bf16.msra.mxu1 %v15864_v35  ;;  %14507 = vmatprep.subr.bf16.mxu0 %v15865_v36  ;;  %v15904_v35 = vld [vmem:[%s16429_s5 + $0x1d98] sm:$0xff]  }
 0x3fb   : > { %14529 = vmatprep.subr.bf16.mxu1 %v15867_v38 }
 0x3fd   : > { %14508 = vmatpush3.bf16.msra.mxu0 %v15866_v37  ;;  %v15905_v37 = vld [vmem:[%s16429_s5 + $0x1d60] sm:$0xff]  }
 0x3fe   : > { %14530 = vmatpush3.bf16.msra.mxu1 %v15868_v39  ;;  %14509 = vmatprep.subr.bf16.mxu0 %v15869_v40  ;;  %v15906_v40 = vld [vmem:[%s16429_s5 + $0x1d20] sm:$0xff]  }
 0x3ff   : > { %14531 = vmatprep.subr.bf16.mxu1 %v15871_v44 }
 0x401   : > { %14510 = vmatpush3.bf16.msra.mxu0 %v15870_v42  ;;  %v15907_v42 = vld [vmem:[%s16429_s5 + $0x1de0] sm:$0xff]  }
 0x402   : > { %14532 = vmatpush3.bf16.msra.mxu1 %v15872_v47  ;;  %14511 = vmatprep.subr.bf16.mxu0 %v15873_v49  ;;  %v15909_v47 = vld [vmem:[%s16429_s5 + $0x1d68] sm:$0xff]  }
 0x403   : > { %14533 = vmatprep.subr.bf16.mxu1 %v15875_v54  ;;  %v15910_v49 = vld [vmem:[%s16429_s5 + $0x1d28] sm:$0xff]   ;;  %v15915_v54 = vld [vmem:[%s16429_s5 + $0x1df0] sm:$0xff]  }
 0x405   : > { %14512 = vmatpush3.bf16.msra.mxu0 %v15874_v52  ;;  %v15913_v52 = vld [vmem:[%s16429_s5 + $0x1d70] sm:$0xff]  }
 0x406   : > { %14534 = vmatpush3.bf16.msra.mxu1 %v15876_v57  ;;  %14513 = vmatprep.subr.bf16.mxu0 %v15877_v59  ;;  %v15918_v57 = vld [vmem:[%s16429_s5 + $0x1d38] sm:$0xff]   ;;  %v435_v59 = vld [vmem:[%s16453_s15 + $0x3a8] sm:$0xff] }
 0x407   : > { %v14211_v41 = vpop.f32.mrb[84].mxu0  ;;  %14535 = vmatprep.subr.bf16.mxu1 %v15879_v62  ;;  %v434_v62 = vld [vmem:[%s16453_s15 + $0x3a0] sm:$0xff] }
 0x408   : > { %v14212_v43 = vpop.f32.mrb[85].mxu0  ;;  %v14233_v48 = vpop.f32.mrb[84].mxu1 }
 0x409   : > { %v14213_v45 = vadd.f32 %v14212_v43, %v14211_v41  ;;  %v14214_v46 = vpop.f32.mrb[86].mxu0  ;;  %v14234_v53 = vpop.f32.mrb[85].mxu1  ;;  %14514 = vmatpush3.bf16.msra.mxu0 %v15878_v61  ;;  %v15920_v61 = vld [vmem:[%s16429_s5 + $0x1db8] sm:$0xff]  }
 0x40a   : > { %v14215_v51 = vpop.f32.mrb[87].mxu0  ;;  %v14235_v55 = vadd.f32 %v14234_v53, %v14233_v48  ;;  %v14236_v56 = vpop.f32.mrb[86].mxu1  ;;  %14536 = vmatpush3.bf16.msra.mxu1 %v15880_v63  ;;  %14515 = vmatprep.subr.bf16.mxu0 %v15881_v0  ;;  %v15914_v53 = vld [vmem:[%s16429_s5 + $0x1d30] sm:$0xff]   ;;  %v569_v63 = vpack.c.bf16 %v434_v62, %v434_v62  ;;  %v15921_v0 = vld [vmem:[%s16429_s5 + $0x1e40] sm:$0xff]   ;;  %v15959_v62 = vld [vmem:[%s16429_s5 + $0x1fc8] sm:$0xff]  }
 0x40b   : > { %v10943_v50 = vadd.f32 %v14213_v45, %v17516_v9  ;;  %v14237_v58 = vpop.f32.mrb[87].mxu1  ;;  %14537 = vmatprep.subr.bf16.mxu1 %v15883_v2  ;;  %v15888_v9 = vld [vmem:[%s16429_s5 + $0x1cb8] sm:$0xff]   ;;  %v15908_v45 = vld [vmem:[%s16429_s5 + $0x1da0] sm:$0xff]   ;;  %v15912_v51 = vld [vmem:[%s16429_s5 + $0x1da8] sm:$0xff]  }
 0x40c   : > { %v15917_v56 = vld [vmem:[%s16429_s5 + $0x1d78] sm:$0xff]  }
 0x40d   : > { %v17554_v60 = vadd.f32 %v14235_v55, %v10943_v50  ;;  %14516 = vmatpush3.bf16.msra.mxu0 %v15882_v1  ;;  %v15911_v50 = vld [vmem:[%s16429_s5 + $0x1de8] sm:$0xff]   ;;  %v15916_v55 = vld [vmem:[%s16429_s5 + $0x1db0] sm:$0xff]   ;;  %v15919_v58 = vld [vmem:[%s16429_s5 + $0x1df8] sm:$0xff]  }
 0x40e   : > { %14538 = vmatpush3.bf16.msra.mxu1 %v15884_v3  ;;  %14517 = vmatprep.subr.bf16.mxu0 %v15885_v4  ;;  %v437_v1 = vld [vmem:[%s16453_s15 + $0x3b8] sm:$0xff]  ;;  %v15922_v3 = vld [vmem:[%s16429_s5 + $0x1e00] sm:$0xff]   ;;  %v436_v4 = vld [vmem:[%s16453_s15 + $0x3b0] sm:$0xff] }
 0x40f   : > { %14539 = vmatprep.subr.bf16.mxu1 %v15887_v6  ;;  %v572_v2 = vpack.c.bf16 %v437_v1, %v437_v1  ;;  %v15923_v6 = vld [vmem:[%s16429_s5 + $0x1ec0] sm:$0xff]   ;;  %v15962_v1 = vld [vmem:[%s16429_s5 + $0x1f10] sm:$0xff]  }
 0x411   : > { %14518 = vmatpush3.bf16.msra.mxu0 %v15886_v5  ;;  %v571_v5 = vpack.c.bf16 %v436_v4, %v436_v4  ;;  %v15965_v4 = vld [vmem:[%s16429_s5 + $0x1f58] sm:$0xff]  }
 0x412   : > { %14540 = vmatpush3.bf16.msra.mxu1 %v15888_v9  ;;  %14547 = vmatprep.subr.bf16.mxu0 %v15889_v12  ;;  %v15926_v9 = vld [vmem:[%s16429_s5 + $0x1e08] sm:$0xff]   ;;  %v15929_v12 = vld [vmem:[%s16429_s5 + $0x1e50] sm:$0xff]  }
 0x413   : > { %14569 = vmatprep.subr.bf16.mxu1 %v15891_v18 }
 0x414   : > { %11501 = vmatmul.mubr.bf16.vlgmr.msra.gmra.mrb[112].mxu0 %v565_v11  ;;  %v15928_v11 = vld [vmem:[%s16429_s5 + $0x1e88] sm:$0xff]  }
 0x415   : > { %14548 = vmatpush3.bf16.msra.mxu0 %v15890_v15  ;;  %11541 = vmatmul.mubr.bf16.vlgmr.msra.gmra.mrb[112].mxu1 %v567_v17  ;;  %v15932_v15 = vld [vmem:[%s16429_s5 + $0x1e90] sm:$0xff]   ;;  %v15934_v17 = vld [vmem:[%s16429_s5 + $0x1e18] sm:$0xff]  }
 0x416   : > { %14570 = vmatpush3.bf16.msra.mxu1 %v15892_v19  ;;  %14549 = vmatprep.subr.bf16.mxu0 %v15893_v20  ;;  %v15935_v19 = vld [vmem:[%s16429_s5 + $0x1ed8] sm:$0xff]  }
 0x417   : > { %14571 = vmatprep.subr.bf16.mxu1 %v15895_v22  ;;  %11620 = vmatprep.mubr.bf16.mxu1 %v572_v2  ;;  %v15963_v2 = vld [vmem:[%s16429_s5 + $0x1fd0] sm:$0xff]  }
 0x419   : > { %14550 = vmatpush3.bf16.msra.mxu0 %v15894_v21  ;;  %v15936_v21 = vld [vmem:[%s16429_s5 + $0x1e98] sm:$0xff]  }
 0x41a   : > { %14572 = vmatpush3.bf16.msra.mxu1 %v15896_v23  ;;  %14551 = vmatprep.subr.bf16.mxu0 %v15897_v24  ;;  %v15937_v24 = vld [vmem:[%s16429_s5 + $0x1e60] sm:$0xff]  }
 0x41b   : > { %14573 = vmatprep.subr.bf16.mxu1 %v15899_v26  ;;  %v15938_v26 = vld [vmem:[%s16429_s5 + $0x1e20] sm:$0xff]  }
 0x41d   : > { %14552 = vmatpush3.bf16.msra.mxu0 %v15898_v25 }
 0x41e   : > { %14574 = vmatpush3.bf16.msra.mxu1 %v15900_v27  ;;  %14553 = vmatprep.subr.bf16.mxu0 %v15901_v28 }
 0x41f   : > { %14575 = vmatprep.subr.bf16.mxu1 %v15903_v32 }
 0x421   : > { %14554 = vmatpush3.bf16.msra.mxu0 %v15902_v30 }
 0x422   : > { %14576 = vmatpush3.bf16.msra.mxu1 %v15904_v35  ;;  %14555 = vmatprep.subr.bf16.mxu0 %v15905_v37 }
 0x423   : > { %14577 = vmatprep.subr.bf16.mxu1 %v15907_v42  ;;  %v15947_v42 = vld [vmem:[%s16429_s5 + $0x1ef0] sm:$0xff]  }
 0x425   : > { %14556 = vmatpush3.bf16.msra.mxu0 %v15906_v40  ;;  %v15945_v40 = vld [vmem:[%s16429_s5 + $0x1e70] sm:$0xff]  }
 0x426   : > { %14578 = vmatpush3.bf16.msra.mxu1 %v15908_v45  ;;  %14557 = vmatprep.subr.bf16.mxu0 %v15909_v47  ;;  %v15950_v45 = vld [vmem:[%s16429_s5 + $0x1e38] sm:$0xff]   ;;  %v439_v47 = vld [vmem:[%s16453_s15 + $0x3c8] sm:$0xff] }
 0x427   : > { %v14255_v29 = vpop.f32.mrb[88].mxu0  ;;  %14579 = vmatprep.subr.bf16.mxu1 %v15911_v50  ;;  %v438_v50 = vld [vmem:[%s16453_s15 + $0x3c0] sm:$0xff] }
 0x428   : > { %v14256_v31 = vpop.f32.mrb[89].mxu0  ;;  %v14277_v36 = vpop.f32.mrb[88].mxu1 }
 0x429   : > { %v14257_v33 = vadd.f32 %v14256_v31, %v14255_v29  ;;  %v14258_v34 = vpop.f32.mrb[90].mxu0  ;;  %v14278_v41 = vpop.f32.mrb[89].mxu1  ;;  %14558 = vmatpush3.bf16.msra.mxu0 %v15910_v49  ;;  %v15939_v29 = vld [vmem:[%s16429_s5 + $0x1ee0] sm:$0xff]   ;;  %v15952_v49 = vld [vmem:[%s16429_s5 + $0x1eb8] sm:$0xff]  }
 0x42a   : > { %v14259_v39 = vpop.f32.mrb[91].mxu0  ;;  %v14279_v43 = vadd.f32 %v14278_v41, %v14277_v36  ;;  %v14280_v44 = vpop.f32.mrb[90].mxu1  ;;  %14580 = vmatpush3.bf16.msra.mxu1 %v15912_v51  ;;  %14559 = vmatprep.subr.bf16.mxu0 %v15913_v52  ;;  %v15940_v31 = vld [vmem:[%s16429_s5 + $0x1ea0] sm:$0xff]   ;;  %v15941_v34 = vld [vmem:[%s16429_s5 + $0x1e68] sm:$0xff]   ;;  %v15946_v41 = vld [vmem:[%s16429_s5 + $0x1e30] sm:$0xff]   ;;  %v573_v51 = vpack.c.bf16 %v438_v50, %v438_v50 }
 0x42b   : > { %v11023_v38 = vadd.f32 %v14257_v33, %v17554_v60  ;;  %v14281_v46 = vpop.f32.mrb[91].mxu1  ;;  %14581 = vmatprep.subr.bf16.mxu1 %v15915_v54  ;;  %v570_v60 = vpack.c.bf16 %v435_v59, %v435_v59  ;;  %v15942_v36 = vld [vmem:[%s16429_s5 + $0x1e28] sm:$0xff]   ;;  %v15949_v44 = vld [vmem:[%s16429_s5 + $0x1e78] sm:$0xff]   ;;  %v15953_v52 = vld [vmem:[%s16429_s5 + $0x1f40] sm:$0xff]  }
 0x42c   : > { %v15944_v39 = vld [vmem:[%s16429_s5 + $0x1ea8] sm:$0xff]   ;;  %v15951_v46 = vld [vmem:[%s16429_s5 + $0x1ef8] sm:$0xff]   ;;  %v15956_v59 = vld [vmem:[%s16429_s5 + $0x1f80] sm:$0xff]  }
 0x42d   : > { %v17593_v48 = vadd.f32 %v14279_v43, %v11023_v38  ;;  %14560 = vmatpush3.bf16.msra.mxu0 %v15914_v53  ;;  %11580 = vmatprep.mubr.bf16.mxu0 %v570_v60  ;;  %v15943_v38 = vld [vmem:[%s16429_s5 + $0x1ee8] sm:$0xff]   ;;  %v15948_v43 = vld [vmem:[%s16429_s5 + $0x1eb0] sm:$0xff]  }
 0x42e   : > { %14582 = vmatpush3.bf16.msra.mxu1 %v15916_v55  ;;  %14561 = vmatprep.subr.bf16.mxu0 %v15917_v56  ;;  %v441_v53 = vld [vmem:[%s16453_s15 + $0x3d8] sm:$0xff]  ;;  %v15954_v55 = vld [vmem:[%s16429_s5 + $0x1f00] sm:$0xff]   ;;  %v440_v56 = vld [vmem:[%s16453_s15 + $0x3d0] sm:$0xff] }
 0x42f   : > { %14583 = vmatprep.subr.bf16.mxu1 %v15919_v58  ;;  %v576_v54 = vpack.c.bf16 %v441_v53, %v441_v53  ;;  %v15955_v58 = vld [vmem:[%s16429_s5 + $0x1fc0] sm:$0xff]   ;;  %v15957_v60 = vld [vmem:[%s16429_s5 + $0x1f48] sm:$0xff]   ;;  %v15994_v53 = vld [vmem:[%s16429_s5 + $0x2010] sm:$0xff]  }
 0x430   : > { %v15991_v50 = vld [vmem:[%s16429_s5 + $0x20c8] sm:$0xff]  }
 0x431   : > { %14562 = vmatpush3.bf16.msra.mxu0 %v15918_v57  ;;  %v575_v57 = vpack.c.bf16 %v440_v56, %v440_v56  ;;  %v15997_v56 = vld [vmem:[%s16429_s5 + $0x2058] sm:$0xff]  }
 0x432   : > { %14584 = vmatpush3.bf16.msra.mxu1 %v15920_v61  ;;  %14591 = vmatprep.subr.bf16.mxu0 %v15921_v0  ;;  %v15958_v61 = vld [vmem:[%s16429_s5 + $0x1f08] sm:$0xff]   ;;  %v15961_v0 = vld [vmem:[%s16429_s5 + $0x1f50] sm:$0xff]  }
 0x433   : > { %14613 = vmatprep.subr.bf16.mxu1 %v15923_v6  ;;  %v15966_v6 = vld [vmem:[%s16429_s5 + $0x1f18] sm:$0xff]  }
 0x434   : > { %11581 = vmatmul.mubr.bf16.vlgmr.msra.gmra.mrb[116].mxu0 %v569_v63  ;;  %v15960_v63 = vld [vmem:[%s16429_s5 + $0x1f88] sm:$0xff]  }
 0x435   : > { %14592 = vmatpush3.bf16.msra.mxu0 %v15922_v3  ;;  %11621 = vmatmul.mubr.bf16.vlgmr.msra.gmra.mrb[116].mxu1 %v571_v5  ;;  %v15964_v3 = vld [vmem:[%s16429_s5 + $0x1f90] sm:$0xff]  }
 0x436   : > { %14614 = vmatpush3.bf16.msra.mxu1 %v15924_v7  ;;  %14593 = vmatprep.subr.bf16.mxu0 %v15925_v8  ;;  %v15967_v8 = vld [vmem:[%s16429_s5 + $0x1fd8] sm:$0xff]  }
 0x437   : > { %14615 = vmatprep.subr.bf16.mxu1 %v15927_v10  ;;  %11700 = vmatprep.mubr.bf16.mxu1 %v576_v54  ;;  %v15995_v54 = vld [vmem:[%s16429_s5 + $0x20d0] sm:$0xff]  }
 0x439   : > { %14594 = vmatpush3.bf16.msra.mxu0 %v15926_v9 }
 0x43a   : > { %14616 = vmatpush3.bf16.msra.mxu1 %v15928_v11  ;;  %14595 = vmatprep.subr.bf16.mxu0 %v15929_v12  ;;  %v15968_v11 = vld [vmem:[%s16429_s5 + $0x1f98] sm:$0xff]  }
 0x43b   : > { %14617 = vmatprep.subr.bf16.mxu1 %v15931_v14 }
 0x43d   : > { %14596 = vmatpush3.bf16.msra.mxu0 %v15930_v13  ;;  %v15969_v13 = vld [vmem:[%s16429_s5 + $0x1f60] sm:$0xff]  }
 0x43e   : > { %14618 = vmatpush3.bf16.msra.mxu1 %v15932_v15  ;;  %14597 = vmatprep.subr.bf16.mxu0 %v15933_v16  ;;  %v15970_v16 = vld [vmem:[%s16429_s5 + $0x1f20] sm:$0xff]  }
 0x43f   : > { %14619 = vmatprep.subr.bf16.mxu1 %v15935_v19 }
 0x441   : > { %14598 = vmatpush3.bf16.msra.mxu0 %v15934_v17 }
 0x442   : > { %14620 = vmatpush3.bf16.msra.mxu1 %v15936_v21  ;;  %14599 = vmatprep.subr.bf16.mxu0 %v15937_v24  ;;  %v15972_v21 = vld [vmem:[%s16429_s5 + $0x1fa0] sm:$0xff]  }
 0x443   : > { %14621 = vmatprep.subr.bf16.mxu1 %v15939_v29  ;;  %v15978_v29 = vld [vmem:[%s16429_s5 + $0x1f30] sm:$0xff]  }
 0x445   : > { %14600 = vmatpush3.bf16.msra.mxu0 %v15938_v26  ;;  %v15975_v26 = vld [vmem:[%s16429_s5 + $0x1fe8] sm:$0xff]  }
 0x446   : > { %14622 = vmatpush3.bf16.msra.mxu1 %v15940_v31  ;;  %14601 = vmatprep.subr.bf16.mxu0 %v15941_v34  ;;  %v15980_v31 = vld [vmem:[%s16429_s5 + $0x1fb0] sm:$0xff]   ;;  %v15983_v34 = vld [vmem:[%s16429_s5 + $0x1ff8] sm:$0xff]  }
 0x447   : > { %v14299_v18 = vpop.f32.mrb[92].mxu0  ;;  %14623 = vmatprep.subr.bf16.mxu1 %v15943_v38  ;;  %v442_v38 = vld [vmem:[%s16453_s15 + $0x3e0] sm:$0xff] }
 0x448   : > { %v14300_v20 = vpop.f32.mrb[93].mxu0  ;;  %v14321_v25 = vpop.f32.mrb[92].mxu1 }
 0x449   : > { %v14301_v22 = vadd.f32 %v14300_v20, %v14299_v18  ;;  %v14302_v23 = vpop.f32.mrb[94].mxu0  ;;  %v14322_v30 = vpop.f32.mrb[93].mxu1  ;;  %14602 = vmatpush3.bf16.msra.mxu0 %v15942_v36  ;;  %v15971_v18 = vld [vmem:[%s16429_s5 + $0x1fe0] sm:$0xff]  }
 0x44a   : > { %v14303_v28 = vpop.f32.mrb[95].mxu0  ;;  %v14323_v32 = vadd.f32 %v14322_v30, %v14321_v25  ;;  %v14324_v33 = vpop.f32.mrb[94].mxu1  ;;  %14624 = vmatpush3.bf16.msra.mxu1 %v15944_v39  ;;  %14603 = vmatprep.subr.bf16.mxu0 %v15945_v40  ;;  %v15973_v23 = vld [vmem:[%s16429_s5 + $0x1f68] sm:$0xff]   ;;  %v15979_v30 = vld [vmem:[%s16429_s5 + $0x1ff0] sm:$0xff]   ;;  %v577_v39 = vpack.c.bf16 %v442_v38, %v442_v38  ;;  %v15985_v40 = vld [vmem:[%s16429_s5 + $0x2040] sm:$0xff]  }
 0x44b   : > { %v11103_v27 = vadd.f32 %v14301_v22, %v17593_v48  ;;  %v14325_v35 = vpop.f32.mrb[95].mxu1  ;;  %14625 = vmatprep.subr.bf16.mxu1 %v15947_v42  ;;  %v574_v48 = vpack.c.bf16 %v439_v47, %v439_v47  ;;  %v15974_v25 = vld [vmem:[%s16429_s5 + $0x1f28] sm:$0xff]   ;;  %v15977_v28 = vld [vmem:[%s16429_s5 + $0x1f70] sm:$0xff]   ;;  %v15982_v33 = vld [vmem:[%s16429_s5 + $0x1f38] sm:$0xff]  }
 0x44c   : > { %v443_v35 = vld [vmem:[%s16453_s15 + $0x3e8] sm:$0xff]  ;;  %v16022_v38 = vld [vmem:[%s16429_s5 + $0x2188] sm:$0xff]  }
 0x44d   : > { %v17633_v37 = vadd.f32 %v14323_v32, %v11103_v27  ;;  %14604 = vmatpush3.bf16.msra.mxu0 %v15946_v41  ;;  %11660 = vmatprep.mubr.bf16.mxu0 %v574_v48  ;;  %v15976_v27 = vld [vmem:[%s16429_s5 + $0x1fa8] sm:$0xff]   ;;  %v15981_v32 = vld [vmem:[%s16429_s5 + $0x1f78] sm:$0xff]   ;;  %v578_v36 = vpack.c.bf16 %v443_v35, %v443_v35  ;;  %v445_v41 = vld [vmem:[%s16453_s15 + $0x3f8] sm:$0xff] }
 0x44e   : > { %14626 = vmatpush3.bf16.msra.mxu1 %v15948_v43  ;;  %14605 = vmatprep.subr.bf16.mxu0 %v15949_v44  ;;  %v580_v42 = vpack.c.bf16 %v445_v41, %v445_v41  ;;  %v15986_v43 = vld [vmem:[%s16429_s5 + $0x2000] sm:$0xff]   ;;  %v444_v44 = vld [vmem:[%s16453_s15 + $0x3f0] sm:$0xff]  ;;  %v16025_v41 = vld [vmem:[%s16429_s5 + $0x2190] sm:$0xff]  }
 0x44f   : > { %14627 = vmatprep.subr.bf16.mxu1 %v15951_v46  ;;  %v15987_v46 = vld [vmem:[%s16429_s5 + $0x20c0] sm:$0xff]   ;;  %v15989_v48 = vld [vmem:[%s16429_s5 + $0x2048] sm:$0xff]  }
 0x450   : > { %v15988_v47 = vld [vmem:[%s16429_s5 + $0x2080] sm:$0xff]  }
 0x451   : > { %14606 = vmatpush3.bf16.msra.mxu0 %v15950_v45  ;;  %v579_v45 = vpack.c.bf16 %v444_v44, %v444_v44  ;;  %v16019_v35 = vld [vmem:[%s16429_s5 + $0x2180] sm:$0xff]  }
 0x452   : > { %14628 = vmatpush3.bf16.msra.mxu1 %v15952_v49  ;;  %14635 = vmatprep.subr.bf16.mxu0 %v15953_v52  ;;  %v15990_v49 = vld [vmem:[%s16429_s5 + $0x2008] sm:$0xff]   ;;  %v15993_v52 = vld [vmem:[%s16429_s5 + $0x2050] sm:$0xff]   ;;  %v16029_v44 = vld [vmem:[%s16429_s5 + $0x2160] sm:$0xff]  }
 0x453   : > { %14657 = vmatprep.subr.bf16.mxu1 %v15955_v58  ;;  %v15998_v58 = vld [vmem:[%s16429_s5 + $0x2018] sm:$0xff]  }
 0x454   : > { %11661 = vmatmul.mubr.bf16.vlgmr.msra.gmra.mrb[120].mxu0 %v573_v51  ;;  %v15992_v51 = vld [vmem:[%s16429_s5 + $0x2088] sm:$0xff]  }
 0x455   : > { %14636 = vmatpush3.bf16.msra.mxu0 %v15954_v55  ;;  %11701 = vmatmul.mubr.bf16.vlgmr.msra.gmra.mrb[120].mxu1 %v575_v57  ;;  %v15996_v55 = vld [vmem:[%s16429_s5 + $0x2090] sm:$0xff]  }
 0x456   : > { %14658 = vmatpush3.bf16.msra.mxu1 %v15956_v59  ;;  %14637 = vmatprep.subr.bf16.mxu0 %v15957_v60  ;;  %v15999_v60 = vld [vmem:[%s16429_s5 + $0x20d8] sm:$0xff]  }
 0x457   : > { %14659 = vmatprep.subr.bf16.mxu1 %v15959_v62  ;;  %11740 = vmatprep.mubr.bf16.mxu0 %v578_v36  ;;  %v16020_v36 = vld [vmem:[%s16429_s5 + $0x2148] sm:$0xff]  }
 0x458   : > { %11780 = vmatprep.mubr.bf16.mxu1 %v580_v42  ;;  %v16026_v42 = vld [vmem:[%s16429_s5 + $0x2158] sm:$0xff]  }
 0x459   : > { %14638 = vmatpush3.bf16.msra.mxu0 %v15958_v61 }
 0x45a   : > { %14660 = vmatpush3.bf16.msra.mxu1 %v15960_v63  ;;  %14639 = vmatprep.subr.bf16.mxu0 %v15961_v0  ;;  %v16000_v63 = vld [vmem:[%s16429_s5 + $0x2098] sm:$0xff]  }
 0x45b   : > { %14661 = vmatprep.subr.bf16.mxu1 %v15963_v2 }
 0x45d   : > { %14640 = vmatpush3.bf16.msra.mxu0 %v15962_v1  ;;  %v16001_v1 = vld [vmem:[%s16429_s5 + $0x2060] sm:$0xff]  }
 0x45e   : > { %14662 = vmatpush3.bf16.msra.mxu1 %v15964_v3  ;;  %14641 = vmatprep.subr.bf16.mxu0 %v15965_v4  ;;  %v16002_v4 = vld [vmem:[%s16429_s5 + $0x2020] sm:$0xff]  }
 0x45f   : > { %14663 = vmatprep.subr.bf16.mxu1 %v15967_v8 }
 0x461   : > { %14642 = vmatpush3.bf16.msra.mxu0 %v15966_v6  ;;  %v16003_v6 = vld [vmem:[%s16429_s5 + $0x20e0] sm:$0xff]  }
 0x462   : > { %14664 = vmatpush3.bf16.msra.mxu1 %v15968_v11  ;;  %14643 = vmatprep.subr.bf16.mxu0 %v15969_v13  ;;  %v16005_v11 = vld [vmem:[%s16429_s5 + $0x2068] sm:$0xff]  }
 0x463   : > { %14665 = vmatprep.subr.bf16.mxu1 %v15971_v18  ;;  %v16006_v13 = vld [vmem:[%s16429_s5 + $0x2028] sm:$0xff]   ;;  %v16011_v18 = vld [vmem:[%s16429_s5 + $0x20f0] sm:$0xff]  }
 0x465   : > { %14644 = vmatpush3.bf16.msra.mxu0 %v15970_v16  ;;  %v16009_v16 = vld [vmem:[%s16429_s5 + $0x2070] sm:$0xff]  }
 0x466   : > { %14666 = vmatpush3.bf16.msra.mxu1 %v15972_v21  ;;  %14645 = vmatprep.subr.bf16.mxu0 %v15973_v23  ;;  %v16014_v21 = vld [vmem:[%s16429_s5 + $0x2038] sm:$0xff]   ;;  %v447_v23 = vld [vmem:[%s16453_s15 + $0x408] sm:$0xff] }
 0x467   : > { %v14343_v5 = vpop.f32.mrb[96].mxu0  ;;  %14667 = vmatprep.subr.bf16.mxu1 %v15975_v26  ;;  %v446_v26 = vld [vmem:[%s16453_s15 + $0x400] sm:$0xff] }
 0x468   : > { %v14344_v7 = vpop.f32.mrb[97].mxu0  ;;  %v14365_v12 = vpop.f32.mrb[96].mxu1 }
 0x469   : > { %v14345_v9 = vadd.f32 %v14344_v7, %v14343_v5  ;;  %v14346_v10 = vpop.f32.mrb[98].mxu0  ;;  %v14366_v17 = vpop.f32.mrb[97].mxu1  ;;  %14646 = vmatpush3.bf16.msra.mxu0 %v15974_v25  ;;  %v16016_v25 = vld [vmem:[%s16429_s5 + $0x20b8] sm:$0xff]  }
 0x46a   : > { %v14347_v15 = vpop.f32.mrb[99].mxu0  ;;  %v14367_v19 = vadd.f32 %v14366_v17, %v14365_v12  ;;  %v14368_v20 = vpop.f32.mrb[98].mxu1  ;;  %14668 = vmatpush3.bf16.msra.mxu1 %v15976_v27  ;;  %14647 = vmatprep.subr.bf16.mxu0 %v15977_v28  ;;  %v16010_v17 = vld [vmem:[%s16429_s5 + $0x2030] sm:$0xff]   ;;  %v581_v27 = vpack.c.bf16 %v446_v26, %v446_v26  ;;  %v16017_v28 = vld [vmem:[%s16429_s5 + $0x2140] sm:$0xff]  }
 0x46b   : > { %v11183_v14 = vadd.f32 %v14345_v9, %v17633_v37  ;;  %v14369_v22 = vpop.f32.mrb[99].mxu1  ;;  %14669 = vmatprep.subr.bf16.mxu1 %v15979_v30  ;;  %v15984_v37 = vld [vmem:[%s16429_s5 + $0x1fb8] sm:$0xff]   ;;  %v16004_v9 = vld [vmem:[%s16429_s5 + $0x20a0] sm:$0xff]   ;;  %v16008_v15 = vld [vmem:[%s16429_s5 + $0x20a8] sm:$0xff]  }
 0x46c   : > { %v16013_v20 = vld [vmem:[%s16429_s5 + $0x2078] sm:$0xff]  }
 0x46d   : > { %v17671_v24 = vadd.f32 %v14367_v19, %v11183_v14  ;;  %14648 = vmatpush3.bf16.msra.mxu0 %v15978_v29  ;;  %v16007_v14 = vld [vmem:[%s16429_s5 + $0x20e8] sm:$0xff]   ;;  %v16012_v19 = vld [vmem:[%s16429_s5 + $0x20b0] sm:$0xff]   ;;  %v16015_v22 = vld [vmem:[%s16429_s5 + $0x20f8] sm:$0xff]  }
 0x46e   : > { %14670 = vmatpush3.bf16.msra.mxu1 %v15980_v31  ;;  %14649 = vmatprep.subr.bf16.mxu0 %v15981_v32  ;;  %v449_v29 = vld [vmem:[%s16453_s15 + $0x418] sm:$0xff]  ;;  %v16018_v31 = vld [vmem:[%s16429_s5 + $0x2100] sm:$0xff]   ;;  %v448_v32 = vld [vmem:[%s16453_s15 + $0x410] sm:$0xff] }
 0x46f   : > { %14671 = vmatprep.subr.bf16.mxu1 %v15983_v34  ;;  %v584_v30 = vpack.c.bf16 %v449_v29, %v449_v29  ;;  %v583_v34 = vpack.c.bf16 %v448_v32, %v448_v32 }
 0x471   : > { %14650 = vmatpush3.bf16.msra.mxu0 %v15982_v33  ;;  %v16202_v33 = vmov 0.0  }
 0x472   : > { %14672 = vmatpush3.bf16.msra.mxu1 %v15984_v37  ;;  %14679 = vmatprep.subr.bf16.mxu0 %v15985_v40  ;;  %v16021_v37 = vld [vmem:[%s16429_s5 + $0x2108] sm:$0xff]   ;;  %v16024_v40 = vld [vmem:[%s16429_s5 + $0x2110] sm:$0xff]  }
 0x473   : > { %14701 = vmatprep.subr.bf16.mxu1 %v15987_v46 }
 0x474   : > { %11741 = vmatmul.mubr.bf16.vlgmr.msra.gmra.mrb[124].mxu0 %v577_v39  ;;  %v16023_v39 = vld [vmem:[%s16429_s5 + $0x2150] sm:$0xff]  }
 0x475   : > { %14680 = vmatpush3.bf16.msra.mxu0 %v15986_v43  ;;  %11781 = vmatmul.mubr.bf16.vlgmr.msra.gmra.mrb[124].mxu1 %v579_v45  ;;  %v16027_v43 = vld [vmem:[%s16429_s5 + $0x2118] sm:$0xff]  }
 0x476   : > { %14702 = vmatpush3.bf16.msra.mxu1 %v15988_v47  ;;  %14681 = vmatprep.subr.bf16.mxu0 %v15989_v48  ;;  %v16028_v45 = vld [vmem:[%s16429_s5 + $0x2198] sm:$0xff]   ;;  %v16030_v47 = vld [vmem:[%s16429_s5 + $0x2120] sm:$0xff]  }
 0x477   : > { %14703 = vmatprep.subr.bf16.mxu1 %v15991_v50  ;;  %11860 = vmatprep.mubr.bf16.mxu1 %v584_v30 }
 0x479   : > { %14682 = vmatpush3.bf16.msra.mxu0 %v15990_v49  ;;  %v16031_v49 = vld [vmem:[%s16429_s5 + $0x21a0] sm:$0xff]  }
 0x47a   : > { %14704 = vmatpush3.bf16.msra.mxu1 %v15992_v51  ;;  %14683 = vmatprep.subr.bf16.mxu0 %v15993_v52  ;;  %v16032_v52 = vld [vmem:[%s16429_s5 + $0x2168] sm:$0xff]  }
 0x47b   : > { %14705 = vmatprep.subr.bf16.mxu1 %v15995_v54 }
 0x47d   : > { %14684 = vmatpush3.bf16.msra.mxu0 %v15994_v53 }
 0x47e   : > { %14706 = vmatpush3.bf16.msra.mxu1 %v15996_v55  ;;  %14685 = vmatprep.subr.bf16.mxu0 %v15997_v56 }
 0x47f   : > { %14707 = vmatprep.subr.bf16.mxu1 %v15999_v60 }
 0x481   : > { %14686 = vmatpush3.bf16.msra.mxu0 %v15998_v58 }
 0x482   : > { %14708 = vmatpush3.bf16.msra.mxu1 %v16000_v63  ;;  %14687 = vmatprep.subr.bf16.mxu0 %v16001_v1  ;;  %v16034_v63 = vld [vmem:[%s16429_s5 + $0x21a8] sm:$0xff]   ;;  %v451_v1 = vld [vmem:[%s16453_s15 + $0x428] sm:$0xff] }
 0x483   : > { %14709 = vmatprep.subr.bf16.mxu1 %v16003_v6  ;;  %v450_v6 = vld [vmem:[%s16453_s15 + $0x420] sm:$0xff] }
 0x485   : > { %14688 = vmatpush3.bf16.msra.mxu0 %v16002_v4  ;;  %v16037_v4 = vld [vmem:[%s16429_s5 + $0x21b0] sm:$0xff]  }
 0x486   : > { %14710 = vmatpush3.bf16.msra.mxu1 %v16004_v9  ;;  %14689 = vmatprep.subr.bf16.mxu0 %v16005_v11  ;;  %v585_v9 = vpack.c.bf16 %v450_v6, %v450_v6 }
 0x487   : > { %v14387_v57 = vpop.f32.mrb[100].mxu0  ;;  %14711 = vmatprep.subr.bf16.mxu1 %v16007_v14 }
 0x488   : > { %v14388_v59 = vpop.f32.mrb[101].mxu0  ;;  %v14409_v0 = vpop.f32.mrb[100].mxu1 }
 0x489   : > { %v14389_v61 = vadd.f32 %v14388_v59, %v14387_v57  ;;  %v14390_v62 = vpop.f32.mrb[102].mxu0  ;;  %v14410_v5 = vpop.f32.mrb[101].mxu1  ;;  %14690 = vmatpush3.bf16.msra.mxu0 %v16006_v13  ;;  %v16033_v59 = vld [vmem:[%s16429_s5 + $0x2128] sm:$0xff]  }
 0x48a   : > { %v14391_v3 = vpop.f32.mrb[103].mxu0  ;;  %v14411_v7 = vadd.f32 %v14410_v5, %v14409_v0  ;;  %v14412_v8 = vpop.f32.mrb[102].mxu1  ;;  %14712 = vmatpush3.bf16.msra.mxu1 %v16008_v15  ;;  %14691 = vmatprep.subr.bf16.mxu0 %v16009_v16  ;;  %v16035_v62 = vld [vmem:[%s16429_s5 + $0x2170] sm:$0xff]   ;;  %v16039_v5 = vld [vmem:[%s16429_s5 + $0x2138] sm:$0xff]  }
 0x48b   : > { %v11263_v2 = vadd.f32 %v14389_v61, %v17671_v24  ;;  %v14413_v10 = vpop.f32.mrb[103].mxu1  ;;  %14713 = vmatprep.subr.bf16.mxu1 %v16011_v18  ;;  %v582_v24 = vpack.c.bf16 %v447_v23, %v447_v23  ;;  %v16036_v0 = vld [vmem:[%s16429_s5 + $0x2130] sm:$0xff]   ;;  %v586_v3 = vpack.c.bf16 %v451_v1, %v451_v1  ;;  %v452_v8 = vld [vmem:[%s16453_s15 + $0x430] sm:$0xff] }
 0x48c   : > { %v587_v10 = vpack.c.bf16 %v452_v8, %v452_v8 }
 0x48d   : > { %v17710_v12 = vadd.f32 %v14411_v7, %v11263_v2  ;;  %14692 = vmatpush3.bf16.msra.mxu0 %v16010_v17  ;;  %11820 = vmatprep.mubr.bf16.mxu0 %v582_v24  ;;  %v16038_v2 = vld [vmem:[%s16429_s5 + $0x2178] sm:$0xff]  }
 0x48e   : > { %14714 = vmatpush3.bf16.msra.mxu1 %v16012_v19  ;;  %14693 = vmatprep.subr.bf16.mxu0 %v16013_v20  ;;  %v16040_v7 = vld [vmem:[%s16429_s5 + $0x21b8] sm:$0xff]  }
 0x48f   : > { %14715 = vmatprep.subr.bf16.mxu1 %v16015_v22 }
 0x491   : > { %14694 = vmatpush3.bf16.msra.mxu0 %v16014_v21 }
 0x492   : > { %14716 = vmatpush3.bf16.msra.mxu1 %v16016_v25  ;;  %14723 = vmatprep.subr.bf16.mxu0 %v16017_v28 }
 0x493   : > { %14771 = vmatprep.subr.bf16.mxu1 %v16202_v33 }
 0x494   : > { %11821 = vmatmul.mubr.bf16.vlgmr.msra.gmra.mrb[128].mxu0 %v581_v27 }
 0x495   : > { %14724 = vmatpush3.bf16.msra.mxu0 %v16018_v31  ;;  %11861 = vmatmul.mubr.bf16.vlgmr.msra.gmra.mrb[128].mxu1 %v583_v34 }
 0x496   : > { %14772 = vmatpush3.bf16.msra.mxu1 %v16019_v35  ;;  %14725 = vmatprep.subr.bf16.mxu0 %v16020_v36 }
 0x497   : > { %14773 = vmatprep.subr.bf16.mxu1 %v16202_v33  ;;  %14787 = vmatprep.mubr.msk.bf16.mxu1 %vm16203_vm0, %v16202_v33 }
 0x498   : > { %11900 = vmatprep.mubr.bf16.mxu0 %v586_v3 }
 0x499   : > { %14726 = vmatpush3.bf16.msra.mxu0 %v16021_v37 }
 0x49a   : > { %14727 = vmatprep.subr.bf16.mxu0 %v16023_v39  ;;  %14774 = vmatpush3.bf16.msra.mxu1 %v16022_v38 }
 0x49b   : > { %14775 = vmatprep.subr.bf16.mxu1 %v16202_v33 }
 0x49d   : > { %14728 = vmatpush3.bf16.msra.mxu0 %v16024_v40 }
 0x49e   : > { %14729 = vmatprep.subr.bf16.mxu0 %v16026_v42  ;;  %14776 = vmatpush3.bf16.msra.mxu1 %v16025_v41 }
 0x49f   : > { %14777 = vmatprep.subr.bf16.mxu1 %v16202_v33 }
 0x4a1   : > { %14730 = vmatpush3.bf16.msra.mxu0 %v16027_v43 }
 0x4a2   : > { %14731 = vmatprep.subr.bf16.mxu0 %v16029_v44  ;;  %14778 = vmatpush3.bf16.msra.mxu1 %v16028_v45 }
 0x4a3   : > { %14779 = vmatprep.subr.bf16.mxu1 %v16202_v33 }
 0x4a5   : > { %14732 = vmatpush3.bf16.msra.mxu0 %v16030_v47 }
 0x4a6   : > { %14733 = vmatprep.subr.bf16.mxu0 %v16032_v52  ;;  %14780 = vmatpush3.bf16.msra.mxu1 %v16031_v49 }
 0x4a7   : > { %v14431_v46 = vpop.f32.mrb[104].mxu0  ;;  %14781 = vmatprep.subr.bf16.mxu1 %v16202_v33 }
 0x4a8   : > { %v14432_v48 = vpop.f32.mrb[105].mxu0  ;;  %v14453_v53 = vpop.f32.mrb[104].mxu1 }
 0x4a9   : > { %v14433_v50 = vadd.f32 %v14432_v48, %v14431_v46  ;;  %v14434_v51 = vpop.f32.mrb[106].mxu0  ;;  %v14454_v56 = vpop.f32.mrb[105].mxu1  ;;  %14734 = vmatpush3.bf16.msra.mxu0 %v16033_v59 }
 0x4aa   : > { %v14435_v55 = vpop.f32.mrb[107].mxu0  ;;  %v14455_v57 = vadd.f32 %v14454_v56, %v14453_v53  ;;  %v14456_v58 = vpop.f32.mrb[106].mxu1  ;;  %14735 = vmatprep.subr.bf16.mxu0 %v16035_v62  ;;  %14782 = vmatpush3.bf16.msra.mxu1 %v16034_v63 }
 0x4ab   : > { %v11343_v54 = vadd.f32 %v14433_v50, %v17710_v12  ;;  %v14457_v60 = vpop.f32.mrb[107].mxu1  ;;  %14783 = vmatprep.subr.bf16.mxu1 %v16202_v33 }
 0x4ad   : > { %v11383_v61 = vadd.f32 %v14455_v57, %v11343_v54  ;;  %14736 = vmatpush3.bf16.msra.mxu0 %v16036_v0 }
 0x4ae   : > { %14737 = vmatprep.subr.bf16.mxu0 %v16038_v2  ;;  %14784 = vmatpush3.bf16.msra.mxu1 %v16037_v4 }
 0x4af   : > { %14785 = vmatprep.subr.bf16.mxu1 %v16202_v33 }
 0x4b1   : > { %14738 = vmatpush3.bf16.msra.mxu0 %v16039_v5 }
 0x4b2   : > { %14786 = vmatpush3.bf16.msra.mxu1 %v16040_v7 }
 0x4b4   : > { %11901 = vmatmul.mubr.bf16.vlgmr.msra.gmra.mrb[132].mxu0 %v585_v9 }
 0x4b5   : > { %14788 = vmatmul.mubr.bf16.vlgmr.msra.gmra.mrb[132].mxu1 %v587_v10 }
 0x4c7   : > { %v14475_v11 = vpop.f32.mrb[108].mxu0 }
 0x4c8   : > { %v14476_v12 = vpop.f32.mrb[109].mxu0  ;;  %v14497_v15 = vpop.f32.mrb[108].mxu1 }
 0x4c9   : > { %v14477_v13 = vadd.f32 %v14476_v12, %v14475_v11  ;;  %v14478_v14 = vpop.f32.mrb[110].mxu0  ;;  %v14498_v18 = vpop.f32.mrb[109].mxu1 }
 0x4ca   : > { %v14479_v16 = vpop.f32.mrb[111].mxu0  ;;  %v14499_v19 = vadd.f32 %v14498_v18, %v14497_v15  ;;  %v14500_v20 = vpop.f32.mrb[110].mxu1 }
 0x4cb   : > { %v11423_v17 = vadd.f32 %v14477_v13, %v11383_v61  ;;  %v14501_v21 = vpop.f32.mrb[111].mxu1 }
 0x4cd   : > { %v11463_v22 = vadd.f32 %v14499_v19, %v11423_v17 }
 0x4e7   : > { %v14519_v23 = vpop.f32.mrb[112].mxu0 }
 0x4e8   : > { %v14520_v24 = vpop.f32.mrb[113].mxu0  ;;  %v14541_v27 = vpop.f32.mrb[112].mxu1 }
 0x4e9   : > { %v14521_v25 = vadd.f32 %v14520_v24, %v14519_v23  ;;  %v14522_v26 = vpop.f32.mrb[114].mxu0  ;;  %v14542_v30 = vpop.f32.mrb[113].mxu1 }
 0x4ea   : > { %v14523_v28 = vpop.f32.mrb[115].mxu0  ;;  %v14543_v31 = vadd.f32 %v14542_v30, %v14541_v27  ;;  %v14544_v32 = vpop.f32.mrb[114].mxu1 }
 0x4eb   : > { %v11503_v29 = vadd.f32 %v14521_v25, %v11463_v22  ;;  %v14545_v33 = vpop.f32.mrb[115].mxu1  ;;  %v317_v28 = vld [vmem:[#allocation2] sm:$0xff] }
 0x4ec   : > { %v11964_v32 = vld [vmem:[%s16448_s8] sm:$0xff] (!%p13267_p8)  ;;  %v11965_v33 = vld [vmem:[%s16448_s8 + $0x8] sm:$0xff] (!%p13267_p8) }
 0x4ed   : > { %v11543_v34 = vadd.f32 %v14543_v31, %v11503_v29 }
 0x507   : > { %v14563_v35 = vpop.f32.mrb[116].mxu0 }
 0x508   : > { %v14564_v36 = vpop.f32.mrb[117].mxu0  ;;  %v14585_v39 = vpop.f32.mrb[116].mxu1 }
 0x509   : > { %v14565_v37 = vadd.f32 %v14564_v36, %v14563_v35  ;;  %v14566_v38 = vpop.f32.mrb[118].mxu0  ;;  %v14586_v41 = vpop.f32.mrb[117].mxu1  ;;  %v16204_v35 = vmov (!%p13267_p8), 0.0|0.0   ;;  %v14827_v36 = vpack.c.bf16 (!%p13267_p8), %v11965_v33, %v11964_v32 }
 0x50a   : > { %v14567_v40 = vpop.f32.mrb[119].mxu0  ;;  %v14587_v43 = vadd.f32 %v14586_v41, %v14585_v39  ;;  %v14588_v44 = vpop.f32.mrb[118].mxu1  ;;  %14826 = vmatprep.subr.bf16.mxu0 (!%p13267_p8), %v16204_v35  ;;  %v16206_v38 = vmov (!%p13267_p8), 0.0   ;;  %v11969_v41 = vld [vmem:[%s16448_s8 + $0x28] sm:$0xff] (!%p13267_p8) }
 0x50b   : > { %v11583_v42 = vadd.f32 %v14565_v37, %v11543_v34  ;;  %v14589_v45 = vpop.f32.mrb[119].mxu1  ;;  %v11966_v34 = vld [vmem:[%s16448_s8 + $0x10] sm:$0xff] (!%p13267_p8)  ;;  %v11967_v37 = vld [vmem:[%s16448_s8 + $0x18] sm:$0xff] (!%p13267_p8)  ;;  %14823 = vmatprep.mubr.msk.f32.mxu0 (!%p13267_p8), %vm16205_vm1, %v16206_v38  ;;  %14828 = vmatpush3.bf16.msra.mxu0 (!%p13267_p8), %v14827_v36  ;;  %v11968_v40 = vld [vmem:[%s16448_s8 + $0x20] sm:$0xff] (!%p13267_p8) }
 0x50c   : > { %v14830_v39 = vpack.c.bf16 (!%p13267_p8), %v11967_v37, %v11966_v34  ;;  %14829 = vmatprep.subr.bf16.mxu0 (!%p13267_p8), %v16204_v35  ;;  %v11971_v44 = vld [vmem:[%s16448_s8 + $0x38] sm:$0xff] (!%p13267_p8) }
 0x50d   : > { %v11623_v46 = vadd.f32 %v14587_v43, %v11583_v42  ;;  %v14833_v42 = vpack.c.bf16 (!%p13267_p8), %v11969_v41, %v11968_v40  ;;  %v11970_v43 = vld [vmem:[%s16448_s8 + $0x30] sm:$0xff] (!%p13267_p8) }
 0x50e   : > { %v14836_v45 = vpack.c.bf16 (!%p13267_p8), %v11971_v44, %v11970_v43 }
 0x50f   : > { %14831 = vmatpush3.bf16.msra.mxu0 (!%p13267_p8), %v14830_v39 }
 0x510   : > { %14832 = vmatprep.subr.bf16.mxu0 (!%p13267_p8), %v16204_v35 }
 0x513   : > { %14834 = vmatpush3.bf16.msra.mxu0 (!%p13267_p8), %v14833_v42 }
 0x514   : > { %14835 = vmatprep.subr.bf16.mxu0 (!%p13267_p8), %v16204_v35 }
 0x517   : > { %14837 = vmatpush3.bf16.msra.mxu0 (!%p13267_p8), %v14836_v45 }
 0x518   : > { %14838 = vmatprep.subr.bf16.mxu0 (!%p13267_p8), %v16204_v35 }
 0x527   : > { %v14607_v47 = vpop.f32.mrb[120].mxu0 }
 0x528   : > { %v14608_v48 = vpop.f32.mrb[121].mxu0  ;;  %v14629_v51 = vpop.f32.mrb[120].mxu1 }
 0x529   : > { %v14609_v49 = vadd.f32 %v14608_v48, %v14607_v47  ;;  %v14610_v50 = vpop.f32.mrb[122].mxu0  ;;  %v14630_v54 = vpop.f32.mrb[121].mxu1  ;;  %v11973_v47 = vld [vmem:[%s16448_s8 + $0x48] sm:$0xff] (!%p13267_p8) }
 0x52a   : > { %v14611_v52 = vpop.f32.mrb[123].mxu0  ;;  %v14631_v55 = vadd.f32 %v14630_v54, %v14629_v51  ;;  %v14632_v56 = vpop.f32.mrb[122].mxu1  ;;  %v11975_v50 = vld [vmem:[%s16448_s8 + $0x58] sm:$0xff] (!%p13267_p8) }
 0x52b   : > { %v11663_v53 = vadd.f32 %v14609_v49, %v11623_v46  ;;  %v14633_v57 = vpop.f32.mrb[123].mxu1  ;;  %v11972_v46 = vld [vmem:[%s16448_s8 + $0x40] sm:$0xff] (!%p13267_p8)  ;;  %v11974_v49 = vld [vmem:[%s16448_s8 + $0x50] sm:$0xff] (!%p13267_p8) }
 0x52c   : > { %v14839_v48 = vpack.c.bf16 (!%p13267_p8), %v11973_v47, %v11972_v46  ;;  %v14842_v51 = vpack.c.bf16 (!%p13267_p8), %v11975_v50, %v11974_v49  ;;  %v11976_v52 = vld [vmem:[%s16448_s8 + $0x60] sm:$0xff] (!%p13267_p8)  ;;  %v11978_v57 = vld [vmem:[%s16448_s8 + $0x70] sm:$0xff] (!%p13267_p8) }
 0x52d   : > { %v11703_v58 = vadd.f32 %v14631_v55, %v11663_v53  ;;  %v11977_v53 = vld [vmem:[%s16448_s8 + $0x68] sm:$0xff] (!%p13267_p8)  ;;  %v13268_v56 = vld [vmem:[%s16436_s30] ss:$0 sm:$0xff] (!%p13267_p8) }
 0x52e   : > { %14840 = vmatpush3.bf16.msra.mxu0 (!%p13267_p8), %v14839_v48  ;;  %v14845_v54 = vpack.c.bf16 (!%p13267_p8), %v11977_v53, %v11976_v52 }
 0x52f   : > { %14841 = vmatprep.subr.bf16.mxu0 (!%p13267_p8), %v16204_v35 }
 0x532   : > { %14843 = vmatpush3.bf16.msra.mxu0 (!%p13267_p8), %v14842_v51 }
 0x533   : > { %14844 = vmatprep.subr.bf16.mxu0 (!%p13267_p8), %v16204_v35 }
 0x536   : > { %14846 = vmatpush3.bf16.msra.mxu0 (!%p13267_p8), %v14845_v54 }
 0x537   : > { %14847 = vmatprep.subr.bf16.mxu0 (!%p13267_p8), %v16204_v35 }
 0x547   : > { %v14651_v59 = vpop.f32.mrb[124].mxu0 }
 0x548   : > { %v14652_v60 = vpop.f32.mrb[125].mxu0  ;;  %v14673_v63 = vpop.f32.mrb[124].mxu1 }
 0x549   : > { %v14653_v61 = vadd.f32 %v14652_v60, %v14651_v59  ;;  %v14654_v62 = vpop.f32.mrb[126].mxu0  ;;  %v14674_v2 = vpop.f32.mrb[125].mxu1 }
 0x54a   : > { %v14655_v0 = vpop.f32.mrb[127].mxu0  ;;  %v14675_v3 = vadd.f32 %v14674_v2, %v14673_v63  ;;  %v14676_v4 = vpop.f32.mrb[126].mxu1 }
 0x54b   : > { %v11743_v1 = vadd.f32 %v14653_v61, %v11703_v58  ;;  %v14677_v5 = vpop.f32.mrb[127].mxu1  ;;  %v11979_v58 = vld [vmem:[%s16448_s8 + $0x78] sm:$0xff] (!%p13267_p8) }
 0x54c   : > { %v14848_v60 = vpack.c.bf16 (!%p13267_p8), %v11979_v58, %v11978_v57 }
 0x54d   : > { %v11783_v6 = vadd.f32 %v14675_v3, %v11743_v1 }
 0x54e   : > { %14849 = vmatpush3.bf16.msra.mxu0 (!%p13267_p8), %v14848_v60 }
 0x567   : > { %v14695_v7 = vpop.f32.mrb[128].mxu0 }
 0x568   : > { %v14696_v8 = vpop.f32.mrb[129].mxu0  ;;  %v14717_v11 = vpop.f32.mrb[128].mxu1 }
 0x569   : > { %v14697_v9 = vadd.f32 %v14696_v8, %v14695_v7  ;;  %v14698_v10 = vpop.f32.mrb[130].mxu0  ;;  %v14718_v13 = vpop.f32.mrb[129].mxu1 }
 0x56a   : > { %v14699_v12 = vpop.f32.mrb[131].mxu0  ;;  %v14719_v15 = vadd.f32 %v14718_v13, %v14717_v11  ;;  %v14720_v16 = vpop.f32.mrb[130].mxu1 }
 0x56b   : > { %v11823_v14 = vadd.f32 %v14697_v9, %v11783_v6  ;;  %v14721_v17 = vpop.f32.mrb[131].mxu1 }
 0x56d   : > { %v11863_v18 = vadd.f32 %v14719_v15, %v11823_v14 }
 0x587   : > { %v14739_v19 = vpop.f32.mrb[132].mxu0 }
 0x588   : > { %v14740_v20 = vpop.f32.mrb[133].mxu0  ;;  %v11942_v23 = vpop.f32.mrb[132].mxu1 }
 0x589   : > { %v14741_v21 = vadd.f32 %v14740_v20, %v14739_v19  ;;  %v14742_v22 = vpop.f32.mrb[134].mxu0  ;;  %v14789_v25 = vpop.f32.mrb[133].mxu1 }
 0x58a   : > { %v14743_v24 = vpop.f32.mrb[135].mxu0  ;;  %v11945_v27 = vpop.f32.mrb[134].mxu1 }
 0x58b   : > { %v11903_v26 = vadd.f32 %v14741_v21, %v11863_v18  ;;  %v14790_v29 = vpop.f32.mrb[135].mxu1  ;;  %11953 = sbr.rel (%p13267_p8) target bundleno = 1650 (0x672), region = 52 }
 0x58d   : > { %v11943_v30 = vadd.f32 %v11942_v23, %v11903_v26 }
 0x58f   : > { %v11948_v31 = vadd.f32 %v11943_v30, %v317_v28 }
 0x591   : > { %11949 = vst [vmem:[#allocation2] sm:$0xff] %v11948_v31 }
 0x598   : > { %v11954_v55 = vld [vmem:[#allocation2] sm:$0xff] }
 0x599   : > { %v11962_v59 = vadd.f32 %v13268_v56, %v11954_v55 }
 0x59b   : > { %v11963_v61 = vmax.f32 %v11962_v59, 0.0 }
 0x59d   : > { %14824 = vmatmul.mubr.f32.vlgmr.msra.gmra.mrb[0].mxu0 %v11963_v61 }
 0x670   : > { %v12046_v62 = vpop.f32.mrb[0].mxu0 }
 0x671   : > { %12051 = vst.msk [vmem:[%s16459_s27] sm:$0xff] %vm12050_vm2, %v12046_v62  ;;  %v14825_v63 = vpop.f32.mrb[1].mxu0 }
 0x672 PF: > { %s20_s25 = sadd.s32 1, %s16195_s25   ;;  %s17842_s21 = sld [smem:[#allocation9_spill]] }
 0x673   : > { %p17_p11 = scmp.ge.s32.totalorder %s20_s25, 6   ;;  %s17843_s23 = sld [smem:[#allocation10_spill]] }
 0x674   : > { %s17844_s5 = sld [smem:[#allocation11_spill]]  ;;  %s17845_s15 = smov %s16159_s16 }
 0x675   : > { %s17846_s16 = smov %s16163_s17  ;;  %s17847_s17 = smov %s16378_s10 }
 0x676   : > { %s17848_s18 = smov %s16171_s19  ;;  %s17849_s19 = smov %s16175_s20 }
 0x677   : > { %s17850_s20 = smov %s16320_s11  ;;  %s17851_s22 = smov %s16191_s24 }
 0x678   :  { %19 = sbr.rel (!%p17_p11) target bundleno = 11 (0xb), region = 103 }
 0x67a   : > { %s17852_s24 = smov %s17844_s5 }
 0x67f   :  { %12071 = vsyncpa [#allocation4], 1 }
 0x680   :  { %12073 = vsyncpa [#allocation4 + $0x1], 1 }
 0x681   :  { %12074 = vsyncpa [#allocation6], 1 }
 0x682   :  { %12076 = vsyncpa [#allocation6 + $0x1], 1 }

</bundles_post_ra>
